<compile_context>
chip_gen: v7x
topology: tpu7x:2x2x1
jax: 0.10.0
libtpu: 0.0.40
codegen_flags: <defaults>
</compile_context>

<pallas_src>
import functools

import jax
import jax.numpy as jnp
import numpy as np
from jax.experimental import pallas as pl
from jax.experimental.pallas import tpu as pltpu


def _round_up(x, m):
    return (x + m - 1) // m * m


# ---------------------------------------------------------------------------
# Tiled matmul kernel:  out = relu?(a @ w + b),  K-accumulated in VMEM.
# ---------------------------------------------------------------------------
def _mm_kernel(a_ref, w_ref, b_ref, o_ref, acc_ref, *, relu_out):
    @pl.when(pl.program_id(2) == 0)
    def _init():
        acc_ref[...] = jnp.zeros_like(acc_ref)

    acc_ref[...] += jnp.dot(a_ref[...].astype(jnp.bfloat16), w_ref[...],
                            preferred_element_type=jnp.float32)

    @pl.when(pl.program_id(2) == pl.num_programs(2) - 1)
    def _finalize():
        out = acc_ref[...] + b_ref[...]          # bias only once, at the end
        if relu_out:
            out = jnp.maximum(out, 0.0)
        o_ref[...] = out.astype(o_ref.dtype)


def _matmul_bias(a, w_bf16, b, *, relu_out=False):
    """a: f32 (M, K); w_bf16: bf16 (K, N); b: f32 (1, N) -> f32 (M, N)."""
    M, K = a.shape
    _, N = w_bf16.shape

    Kp = _round_up(K, 128)
    Np = _round_up(N, 128)
    TM = 512 if M >= 512 else _round_up(M, 8)
    Mp = _round_up(M, TM)
    TN = 256 if Np % 256 == 0 else 128
    TK = next(t for t in (512, 384, 256, 128) if Kp % t == 0)

    a_p = jnp.pad(a, ((0, Mp - M), (0, Kp - K)))
    w_p = jnp.pad(w_bf16, ((0, Kp - K), (0, Np - N)))
    b_p = jnp.pad(b, ((0, 0), (0, Np - N)))

    grid = (Mp // TM, Np // TN, Kp // TK)
    out = pl.pallas_call(
        functools.partial(_mm_kernel, relu_out=relu_out),
        out_shape=jax.ShapeDtypeStruct((Mp, Np), jnp.float32),
        grid=grid,
        in_specs=[
            pl.BlockSpec((TM, TK), lambda i, j, k: (i, k)),
            pl.BlockSpec((TK, TN), lambda i, j, k: (k, j)),
            pl.BlockSpec((1, TN), lambda i, j, k: (0, j)),
        ],
        out_specs=pl.BlockSpec((TM, TN), lambda i, j, k: (i, j)),
        scratch_shapes=[pltpu.VMEM((TM, TN), jnp.float32)],
        compiler_params=pltpu.CompilerParams(
            dimension_semantics=("parallel", "parallel", "arbitrary"),
            vmem_limit_bytes=48 * 1024 * 1024),
    )(a_p, w_p, b_p)
    return out[:M, :N]


# ---------------------------------------------------------------------------
# Fused ResidualBlock kernel:
#   y = h + Conv1x1(ReLU(Conv3x3(ReLU(h)))) [ then optional final Conv1x1 ]
# 3x3 conv = 9 shifted matmuls over a row-padded, flattened image (halo rows
# handled by zero padding, halo columns by a per-tap column mask).
# ---------------------------------------------------------------------------
def _resblock_kernel(*refs, W, HW, has_final):
    if has_final:
        (x2_ref, col_ref, w1_ref, b1_ref, w2_ref, b2_ref,
         w3_ref, b3_ref, o_ref, xr_ref, acc_ref) = refs
    else:
        (x2_ref, col_ref, w1_ref, b1_ref, w2_ref, b2_ref,
         o_ref, xr_ref, acc_ref) = refs

    # ReLU applied once per element (not per duplicated patch).
    xr_ref[...] = jnp.maximum(x2_ref[...], 0.0)
    acc_ref[...] = jnp.zeros_like(acc_ref)

    col = col_ref[...]                                     # (HW, 1) int32

    # 3x3 conv as 9 shifted bf16 matmuls accumulated in f32 VMEM.
    for di in range(3):
        for dj in range(3):
            off = di * W + dj
            lhs = xr_ref[off:off + HW, :].astype(jnp.bfloat16)
            if dj == 0:      # left neighbour invalid at column 0
                lhs = jnp.where(col != 0, lhs, jnp.array(0.0, dtype=jnp.bfloat16))
            elif dj == 2:    # right neighbour invalid at column W-1
                lhs = jnp.where(col != W - 1, lhs, jnp.array(0.0, dtype=jnp.bfloat16))
            acc_ref[...] += jnp.dot(lhs, w1_ref[di * 3 + dj],
                                    preferred_element_type=jnp.float32)

    t = jnp.maximum(acc_ref[...] + b1_ref[...], 0.0)       # ReLU
    y = jnp.dot(t.astype(jnp.bfloat16), w2_ref[...],
                preferred_element_type=jnp.float32) + b2_ref[...]
    y = y + x2_ref[W + 1:W + 1 + HW, :]                    # residual (pre-ReLU h)
    if has_final:                                          # fused final 1x1 conv
        y = jnp.dot(y.astype(jnp.bfloat16), w3_ref[...],
                    preferred_element_type=jnp.float32) + b3_ref[...]
    o_ref[...] = y.astype(o_ref.dtype)


def _residual_block(h_nhwc, w1_taps, b1, w2, b2, w3=None, b3=None):
    Nb, H, W, Dp = h_nhwc.shape
    HW = H * W
    X = (H + 2) * W + 2

    # Row-pad, flatten spatial, pad one extra scalar row front/back.
    g = jnp.pad(h_nhwc, ((0, 0), (1, 1), (0, 0), (0, 0))).reshape(Nb, (H + 2) * W, Dp)
    g = jnp.pad(g, ((0, 0), (1, 1), (0, 0)))
    col = (jnp.arange(HW, dtype=jnp.int32) % W).reshape(HW, 1)

    has_final = w3 is not None
    inputs = [g, col, w1_taps, b1, w2, b2] + ([w3, b3] if has_final else [])
    in_specs = [
        pl.BlockSpec((None, X, Dp), lambda b: (b, 0, 0)),
        pl.BlockSpec((HW, 1), lambda b: (0, 0)),
        pl.BlockSpec((9, Dp, Dp), lambda b: (0, 0, 0)),
        pl.BlockSpec((1, Dp), lambda b: (0, 0)),
        pl.BlockSpec((Dp, Dp), lambda b: (0, 0)),
        pl.BlockSpec((1, Dp), lambda b: (0, 0)),
    ]
    if has_final:
        in_specs += [pl.BlockSpec((Dp, Dp), lambda b: (0, 0)),
                     pl.BlockSpec((1, Dp), lambda b: (0, 0))]

    out = pl.pallas_call(
        functools.partial(_resblock_kernel, W=W, HW=HW, has_final=has_final),
        out_shape=jax.ShapeDtypeStruct((Nb, HW, Dp), jnp.float32),
        grid=(Nb,),
        in_specs=in_specs,
        out_specs=pl.BlockSpec((None, HW, Dp), lambda b: (b, 0, 0)),
        scratch_shapes=[pltpu.VMEM((X, Dp), jnp.float32),     # ReLU'd activation
                        pltpu.VMEM((HW, Dp), jnp.float32)],   # 3x3 accumulator
        compiler_params=pltpu.CompilerParams(
            dimension_semantics=("parallel",),
            vmem_limit_bytes=48 * 1024 * 1024),
    )(*inputs)
    return out.reshape(Nb, H, W, Dp)


# ---------------------------------------------------------------------------
# Glue: im2col for the two stride-2 4x4 convs (pure reshuffling, stays in JAX)
# ---------------------------------------------------------------------------
def _im2col(x, kh, kw, stride, pad):
    N, H, W, C = x.shape
    xp = jnp.pad(x, ((0, 0), (pad, pad), (pad, pad), (0, 0)))
    Ho = (H + 2 * pad - kh) // stride + 1
    Wo = (W + 2 * pad - kw) // stride + 1
    cols = []
    for i in range(kh):
        for j in range(kw):
            cols.append(xp[:, i:i + stride * Ho:stride, j:j + stride * Wo:stride, :])
    patches = jnp.stack(cols, axis=3)                    # (N, Ho, Wo, kh*kw, C)
    return patches.reshape(N * Ho * Wo, kh * kw * C), (N, Ho, Wo)


# ---------------------------------------------------------------------------
# Parameter prep: pad channels to a lane-dense multiple of 128, pre-cast
# matmul weights to bf16, flatten into the layouts the kernels expect.
# ---------------------------------------------------------------------------
def _prepare_params(p, img_channels, dim_hidden):
    Dp = max(128, _round_up(dim_hidden, 128))

    def pad_w(w, ci_pad, co_pad):                        # HWIO
        kh, kw, ci, co = w.shape
        return jnp.pad(w, ((0, 0), (0, 0), (0, ci_pad - ci), (0, co_pad - co)))

    def pad_b(b, co_pad):
        return jnp.pad(b, (0, co_pad - b.shape[0])).reshape(1, co_pad).astype(jnp.float32)

    q = {"Dp": Dp}
    q["w1"] = pad_w(p["w1"], img_channels, Dp).reshape(4 * 4 * img_channels, Dp).astype(jnp.bfloat16)
    q["b1"] = pad_b(p["b1"], Dp)
    q["w2"] = pad_w(p["w2"], Dp, Dp).reshape(4 * 4 * Dp, Dp).astype(jnp.bfloat16)
    q["b2"] = pad_b(p["b2"], Dp)
    for rb in ("rb1", "rb2"):
        q[rb + "_w1"] = pad_w(p[rb + "_w1"], Dp, Dp).reshape(9, Dp, Dp).astype(jnp.bfloat16)
        q[rb + "_b1"] = pad_b(p[rb + "_b1"], Dp)
        q[rb + "_w2"] = pad_w(p[rb + "_w2"], Dp, Dp).reshape(Dp, Dp).astype(jnp.bfloat16)
        q[rb + "_b2"] = pad_b(p[rb + "_b2"], Dp)
    q["w3"] = pad_w(p["w3"], Dp, Dp).reshape(Dp, Dp).astype(jnp.bfloat16)
    q["b3"] = pad_b(p["b3"], Dp)
    return q


# ---------------------------------------------------------------------------
# Encoder forward (matches the PyTorch nn.Sequential exactly)
# ---------------------------------------------------------------------------
def encoder_forward(x_nchw, params):
    img_channels = params["w1"].shape[2]
    dim_hidden = params["b1"].shape[0]
    q = _prepare_params(params, img_channels, dim_hidden)
    Dp = q["Dp"]

    x = jnp.transpose(x_nchw, (0, 2, 3, 1)).astype(jnp.float32)   # NCHW -> NHWC

    # Conv2d(img_channels, D, k=4, s=2, p=1) + ReLU
    a, (n, ho, wo) = _im2col(x, 4, 4, 2, 1)
    h = _matmul_bias(a, q["w1"], q["b1"], relu_out=True).reshape(n, ho, wo, Dp)

    # Conv2d(D, D, k=4, s=2, p=1) + ReLU
    a, (n, ho, wo) = _im2col(h, 4, 4, 2, 1)
    h = _matmul_bias(a, q["w2"], q["b2"], relu_out=True).reshape(n, ho, wo, Dp)

    # ResidualBlock 1 (single fused kernel)
    h = _residual_block(h, q["rb1_w1"], q["rb1_b1"], q["rb1_w2"], q["rb1_b2"])

    # ResidualBlock 2 + final Conv2d(D, D, k=1) fused into one kernel
    out = _residual_block(h, q["rb2_w1"], q["rb2_b1"], q["rb2_w2"], q["rb2_b2"],
                          q["w3"], q["b3"])

    out = out[..., :dim_hidden]                 # drop channel padding (exact)
    return jnp.transpose(out, (0, 3, 1, 2))     # NHWC -> NCHW


# ---------------------------------------------------------------------------
# Pure-JAX reference (XLA convs) for correctness check
# ---------------------------------------------------------------------------
def reference_forward(x_nchw, p):
    x = jnp.transpose(x_nchw, (0, 2, 3, 1))

    def conv(x, w, b, stride, pad):
        y = jax.lax.conv_general_dilated(
            x, w, (stride, stride), [(pad, pad), (pad, pad)],
            dimension_numbers=("NHWC", "HWIO", "NHWC"))
        return y + b

    h = jax.nn.relu(conv(x, p["w1"], p["b1"], 2, 1))
    h = jax.nn.relu(conv(h, p["w2"], p["b2"], 2, 1))
    for rb in ("rb1", "rb2"):
        t = conv(jax.nn.relu(h), p[rb + "_w1"], p[rb + "_b1"], 1, 1)
        t = conv(jax.nn.relu(t), p[rb + "_w2"], p[rb + "_b2"], 1, 0)
        h = h + t
    out = conv(h, p["w3"], p["b3"], 1, 0)
    return jnp.transpose(out, (0, 3, 1, 2))


# ---------------------------------------------------------------------------
# Deterministic parameter init (HWIO layout)
# ---------------------------------------------------------------------------
def init_params(key, img_channels, dim_hidden):
    shapes = {
        "w1": (4, 4, img_channels, dim_hidden),
        "w2": (4, 4, dim_hidden, dim_hidden),
        "rb1_w1": (3, 3, dim_hidden, dim_hidden),
        "rb1_w2": (1, 1, dim_hidden, dim_hidden),
        "rb2_w1": (3, 3, dim_hidden, dim_hidden),
        "rb2_w2": (1, 1, dim_hidden, dim_hidden),
        "w3": (1, 1, dim_hidden, dim_hidden),
    }
    params = {}
    for name, shp in shapes.items():
        key, kw, kb = jax.random.split(key, 3)
        fan_in = shp[0] * shp[1] * shp[2]
        scale = 1.0 / np.sqrt(fan_in)
        params[name] = scale * jax.random.normal(kw, shp, dtype=jnp.float32)
        params[name.replace("w", "b")] = scale * jax.random.normal(
            kb, (shp[3],), dtype=jnp.float32)
    return params


if __name__ == "__main__":
    key = jax.random.PRNGKey(0)
    kx, kp = jax.random.split(key)

    img_channels, dim_hidden = 3, 32          # small dim_hidden for the demo
    x = jax.random.normal(kx, (2, img_channels, 16, 16), dtype=jnp.float32)
    params = init_params(kp, img_channels, dim_hidden)

    fwd = jax.jit(encoder_forward)
    out = jax.block_until_ready(fwd(x, params))
    ref = jax.block_until_ready(reference_forward(x, params))

    assert out.shape == (2, dim_hidden, 4, 4), out.shape
    # bf16 MXU operands with f32 accumulation -> ~1% worst-case deviation.
    np.testing.assert_allclose(np.asarray(out), np.asarray(ref),
                               rtol=2e-2, atol=2e-2)
    print("KERNEL_OK")
</pallas_src>

<mosaic_0001>
module attributes {stable_mosaic.version = 11 : i64} {
  func.func @_mm_kernel(%arg0: i32, %arg1: i32, %arg2: i32, %arg3: memref<128x128xf32, #tpu.memory_space<vmem>>, %arg4: memref<128x128xbf16, #tpu.memory_space<vmem>>, %arg5: memref<1x128xf32, #tpu.memory_space<vmem>>, %arg6: memref<128x128xf32, #tpu.memory_space<vmem>>, %arg7: memref<128x128xf32, #tpu.memory_space<vmem>>) attributes {dimension_semantics = [#tpu.dimension_semantics<parallel>, #tpu.dimension_semantics<parallel>, #tpu.dimension_semantics<arbitrary>], iteration_bounds = array<i64: 1, 1, 1>, scalar_prefetch = 0 : i64, scratch_operands = 1 : i64, tpu.core_type = #tpu.core_type<tc>, window_params = [{transform_indices = @transform_0, window_bounds = array<i64: 128, 128>}, {transform_indices = @transform_1, window_bounds = array<i64: 128, 128>}, {transform_indices = @transform_2, window_bounds = array<i64: 1, 128>}, {transform_indices = @transform_3, window_bounds = array<i64: 128, 128>}]} {
    %c0_i32 = arith.constant 0 : i32
    %0 = arith.cmpi eq, %arg2, %c0_i32 : i32
    %1 = arith.extui %0 : i1 to i32
    %c0_i32_0 = arith.constant 0 : i32
    %2 = arith.cmpi ne, %1, %c0_i32_0 : i32
    scf.if %2 {
      %cst_10 = arith.constant 0.000000e+00 : f32
      %13 = vector.broadcast %cst_10 : f32 to vector<128x128xf32>
      %c0_11 = arith.constant 0 : index
      %c0_12 = arith.constant 0 : index
      %14 = vector.load %arg7[%c0_11, %c0_12] : memref<128x128xf32, #tpu.memory_space<vmem>>, vector<128x128xf32>
      tpu.vector_store %arg7[%c0_11, %c0_12], %13 {strides = array<i32>} : memref<128x128xf32, #tpu.memory_space<vmem>>, vector<128x128xf32>,
    } else {
    }
    %c0 = arith.constant 0 : index
    %c0_1 = arith.constant 0 : index
    %3 = vector.load %arg7[%c0, %c0_1] : memref<128x128xf32, #tpu.memory_space<vmem>>, vector<128x128xf32>
    %c0_2 = arith.constant 0 : index
    %c0_3 = arith.constant 0 : index
    %4 = vector.load %arg3[%c0_2, %c0_3] : memref<128x128xf32, #tpu.memory_space<vmem>>, vector<128x128xf32>
    %5 = arith.truncf %4 : vector<128x128xf32> to vector<128x128xbf16>
    %c0_4 = arith.constant 0 : index
    %c0_5 = arith.constant 0 : index
    %6 = vector.load %arg4[%c0_4, %c0_5] : memref<128x128xbf16, #tpu.memory_space<vmem>>, vector<128x128xbf16>
    %cst = arith.constant dense<0.000000e+00> : vector<128x128xf32>
    %7 = tpu.matmul %5, %6, %cst {dimension_numbers = #tpu.dot_dimension_numbers<[1], [0], [0], [1], [0, 0, 1, 1], [], []>} : vector<128x128xbf16>, vector<128x128xbf16>, vector<128x128xf32> -> vector<128x128xf32>
    %8 = arith.addf %3, %7 : vector<128x128xf32>
    %c0_6 = arith.constant 0 : index
    %c0_7 = arith.constant 0 : index
    %9 = vector.load %arg7[%c0_6, %c0_7] : memref<128x128xf32, #tpu.memory_space<vmem>>, vector<128x128xf32>
    tpu.vector_store %arg7[%c0_6, %c0_7], %8 {strides = array<i32>} : memref<128x128xf32, #tpu.memory_space<vmem>>, vector<128x128xf32>,
    %c0_i32_8 = arith.constant 0 : i32
    %10 = arith.cmpi eq, %arg2, %c0_i32_8 : i32
    %11 = arith.extui %10 : i1 to i32
    %c0_i32_9 = arith.constant 0 : i32
    %12 = arith.cmpi ne, %11, %c0_i32_9 : i32
    scf.if %12 {
      %c0_10 = arith.constant 0 : index
      %c0_11 = arith.constant 0 : index
      %13 = vector.load %arg7[%c0_10, %c0_11] : memref<128x128xf32, #tpu.memory_space<vmem>>, vector<128x128xf32>
      %c0_12 = arith.constant 0 : index
      %c0_13 = arith.constant 0 : index
      %14 = vector.load %arg5[%c0_12, %c0_13] : memref<1x128xf32, #tpu.memory_space<vmem>>, vector<1x128xf32>
      %15 = vector.broadcast %14 : vector<1x128xf32> to vector<128x128xf32>
      %16 = arith.addf %13, %15 : vector<128x128xf32>
      %cst_14 = arith.constant 0.000000e+00 : f32
      %17 = vector.broadcast %cst_14 : f32 to vector<128x128xf32>
      %18 = arith.maximumf %16, %17 : vector<128x128xf32>
      %c0_15 = arith.constant 0 : index
      %c0_16 = arith.constant 0 : index
      %19 = vector.load %arg6[%c0_15, %c0_16] : memref<128x128xf32, #tpu.memory_space<vmem>>, vector<128x128xf32>
      tpu.vector_store %arg6[%c0_15, %c0_16], %18 {strides = array<i32>} : memref<128x128xf32, #tpu.memory_space<vmem>>, vector<128x128xf32>,
    } else {
    }
    return
  }
  func.func @transform_0(%arg0: i32, %arg1: i32, %arg2: i32) -> (i32, i32) {
    %c0_i32 = arith.constant 0 : i32
    return %arg0, %arg2 : i32, i32
  }
  func.func @transform_1(%arg0: i32, %arg1: i32, %arg2: i32) -> (i32, i32) {
    %c0_i32 = arith.constant 0 : i32
    return %arg2, %arg1 : i32, i32
  }
  func.func @transform_2(%arg0: i32, %arg1: i32, %arg2: i32) -> (i32, i32) {
    %c0_i32 = arith.constant 0 : i32
    %c0_i32_0 = arith.constant 0 : i32
    return %c0_i32, %arg1 : i32, i32
  }
  func.func @transform_3(%arg0: i32, %arg1: i32, %arg2: i32) -> (i32, i32) {
    %c0_i32 = arith.constant 0 : i32
    return %arg0, %arg1 : i32, i32
  }
}

module attributes {stable_mosaic.version = 11 : i64} {
  func.func @_mm_kernel(%arg0: i32, %arg1: i32, %arg2: i32, %arg3: memref<32x512xf32, #tpu.memory_space<vmem>>, %arg4: memref<512x128xbf16, #tpu.memory_space<vmem>>, %arg5: memref<1x128xf32, #tpu.memory_space<vmem>>, %arg6: memref<32x128xf32, #tpu.memory_space<vmem>>, %arg7: memref<32x128xf32, #tpu.memory_space<vmem>>) attributes {dimension_semantics = [#tpu.dimension_semantics<parallel>, #tpu.dimension_semantics<parallel>, #tpu.dimension_semantics<arbitrary>], iteration_bounds = array<i64: 1, 1, 4>, scalar_prefetch = 0 : i64, scratch_operands = 1 : i64, tpu.core_type = #tpu.core_type<tc>, window_params = [{transform_indices = @transform_0, window_bounds = array<i64: 32, 512>}, {transform_indices = @transform_1, window_bounds = array<i64: 512, 128>}, {transform_indices = @transform_2, window_bounds = array<i64: 1, 128>}, {transform_indices = @transform_3, window_bounds = array<i64: 32, 128>}]} {
    %c0_i32 = arith.constant 0 : i32
    %0 = arith.cmpi eq, %arg2, %c0_i32 : i32
    %1 = arith.extui %0 : i1 to i32
    %c0_i32_0 = arith.constant 0 : i32
    %2 = arith.cmpi ne, %1, %c0_i32_0 : i32
    scf.if %2 {
      %cst_9 = arith.constant 0.000000e+00 : f32
      %13 = vector.broadcast %cst_9 : f32 to vector<32x128xf32>
      %c0_10 = arith.constant 0 : index
      %c0_11 = arith.constant 0 : index
      %14 = vector.load %arg7[%c0_10, %c0_11] : memref<32x128xf32, #tpu.memory_space<vmem>>, vector<32x128xf32>
      tpu.vector_store %arg7[%c0_10, %c0_11], %13 {strides = array<i32>} : memref<32x128xf32, #tpu.memory_space<vmem>>, vector<32x128xf32>,
    } else {
    }
    %c0 = arith.constant 0 : index
    %c0_1 = arith.constant 0 : index
    %3 = vector.load %arg7[%c0, %c0_1] : memref<32x128xf32, #tpu.memory_space<vmem>>, vector<32x128xf32>
    %c0_2 = arith.constant 0 : index
    %c0_3 = arith.constant 0 : index
    %4 = vector.load %arg3[%c0_2, %c0_3] : memref<32x512xf32, #tpu.memory_space<vmem>>, vector<32x512xf32>
    %5 = arith.truncf %4 : vector<32x512xf32> to vector<32x512xbf16>
    %c0_4 = arith.constant 0 : index
    %c0_5 = arith.constant 0 : index
    %6 = vector.load %arg4[%c0_4, %c0_5] : memref<512x128xbf16, #tpu.memory_space<vmem>>, vector<512x128xbf16>
    %cst = arith.constant dense<0.000000e+00> : vector<32x128xf32>
    %7 = tpu.matmul %5, %6, %cst {dimension_numbers = #tpu.dot_dimension_numbers<[1], [0], [0], [1], [0, 0, 1, 1], [], []>} : vector<32x512xbf16>, vector<512x128xbf16>, vector<32x128xf32> -> vector<32x128xf32>
    %8 = arith.addf %3, %7 : vector<32x128xf32>
    %c0_6 = arith.constant 0 : index
    %c0_7 = arith.constant 0 : index
    %9 = vector.load %arg7[%c0_6, %c0_7] : memref<32x128xf32, #tpu.memory_space<vmem>>, vector<32x128xf32>
    tpu.vector_store %arg7[%c0_6, %c0_7], %8 {strides = array<i32>} : memref<32x128xf32, #tpu.memory_space<vmem>>, vector<32x128xf32>,
    %c3_i32 = arith.constant 3 : i32
    %10 = arith.cmpi eq, %arg2, %c3_i32 : i32
    %11 = arith.extui %10 : i1 to i32
    %c0_i32_8 = arith.constant 0 : i32
    %12 = arith.cmpi ne, %11, %c0_i32_8 : i32
    scf.if %12 {
      %c0_9 = arith.constant 0 : index
      %c0_10 = arith.constant 0 : index
      %13 = vector.load %arg7[%c0_9, %c0_10] : memref<32x128xf32, #tpu.memory_space<vmem>>, vector<32x128xf32>
      %c0_11 = arith.constant 0 : index
      %c0_12 = arith.constant 0 : index
      %14 = vector.load %arg5[%c0_11, %c0_12] : memref<1x128xf32, #tpu.memory_space<vmem>>, vector<1x128xf32>
      %15 = vector.broadcast %14 : vector<1x128xf32> to vector<32x128xf32>
      %16 = arith.addf %13, %15 : vector<32x128xf32>
      %cst_13 = arith.constant 0.000000e+00 : f32
      %17 = vector.broadcast %cst_13 : f32 to vector<32x128xf32>
      %18 = arith.maximumf %16, %17 : vector<32x128xf32>
      %c0_14 = arith.constant 0 : index
      %c0_15 = arith.constant 0 : index
      %19 = vector.load %arg6[%c0_14, %c0_15] : memref<32x128xf32, #tpu.memory_space<vmem>>, vector<32x128xf32>
      tpu.vector_store %arg6[%c0_14, %c0_15], %18 {strides = array<i32>} : memref<32x128xf32, #tpu.memory_space<vmem>>, vector<32x128xf32>,
    } else {
    }
    return
  }
  func.func @transform_0(%arg0: i32, %arg1: i32, %arg2: i32) -> (i32, i32) {
    %c0_i32 = arith.constant 0 : i32
    return %arg0, %arg2 : i32, i32
  }
  func.func @transform_1(%arg0: i32, %arg1: i32, %arg2: i32) -> (i32, i32) {
    %c0_i32 = arith.constant 0 : i32
    return %arg2, %arg1 : i32, i32
  }
  func.func @transform_2(%arg0: i32, %arg1: i32, %arg2: i32) -> (i32, i32) {
    %c0_i32 = arith.constant 0 : i32
    %c0_i32_0 = arith.constant 0 : i32
    return %c0_i32, %arg1 : i32, i32
  }
  func.func @transform_3(%arg0: i32, %arg1: i32, %arg2: i32) -> (i32, i32) {
    %c0_i32 = arith.constant 0 : i32
    return %arg0, %arg1 : i32, i32
  }
}

module attributes {stable_mosaic.version = 11 : i64} {
  func.func @_resblock_kernel(%arg0: i32, %arg1: memref<1x26x128xf32, #tpu.memory_space<vmem>>, %arg2: memref<16x1xi32, #tpu.memory_space<vmem>>, %arg3: memref<9x128x128xbf16, #tpu.memory_space<vmem>>, %arg4: memref<1x128xf32, #tpu.memory_space<vmem>>, %arg5: memref<128x128xbf16, #tpu.memory_space<vmem>>, %arg6: memref<1x128xf32, #tpu.memory_space<vmem>>, %arg7: memref<1x16x128xf32, #tpu.memory_space<vmem>>, %arg8: memref<26x128xf32, #tpu.memory_space<vmem>>, %arg9: memref<16x128xf32, #tpu.memory_space<vmem>>) attributes {dimension_semantics = [#tpu.dimension_semantics<parallel>], iteration_bounds = array<i64: 2>, scalar_prefetch = 0 : i64, scratch_operands = 2 : i64, tpu.core_type = #tpu.core_type<tc>, window_params = [{transform_indices = @transform_0, window_bounds = array<i64: 1, 26, 128>}, {pipeline_mode = #tpu.pipeline_mode<synchronous>, transform_indices = @transform_1, window_bounds = array<i64: 16, 1>}, {pipeline_mode = #tpu.pipeline_mode<synchronous>, transform_indices = @transform_2, window_bounds = array<i64: 9, 128, 128>}, {pipeline_mode = #tpu.pipeline_mode<synchronous>, transform_indices = @transform_3, window_bounds = array<i64: 1, 128>}, {pipeline_mode = #tpu.pipeline_mode<synchronous>, transform_indices = @transform_4, window_bounds = array<i64: 128, 128>}, {pipeline_mode = #tpu.pipeline_mode<synchronous>, transform_indices = @transform_5, window_bounds = array<i64: 1, 128>}, {transform_indices = @transform_6, window_bounds = array<i64: 1, 16, 128>}]} {
    %c0 = arith.constant 0 : index
    %c0_0 = arith.constant 0 : index
    %c0_1 = arith.constant 0 : index
    %0 = vector.load %arg1[%c0, %c0_0, %c0_1] : memref<1x26x128xf32, #tpu.memory_space<vmem>>, vector<1x26x128xf32>
    %1 = vector.shape_cast %0 : vector<1x26x128xf32> to vector<26x128xf32>
    %cst = arith.constant 0.000000e+00 : f32
    %2 = vector.broadcast %cst : f32 to vector<26x128xf32>
    %3 = arith.maximumf %1, %2 : vector<26x128xf32>
    %c0_2 = arith.constant 0 : index
    %c0_3 = arith.constant 0 : index
    %4 = vector.load %arg8[%c0_2, %c0_3] : memref<26x128xf32, #tpu.memory_space<vmem>>, vector<26x128xf32>
    tpu.vector_store %arg8[%c0_2, %c0_3], %3 {strides = array<i32>} : memref<26x128xf32, #tpu.memory_space<vmem>>, vector<26x128xf32>,
    %cst_4 = arith.constant 0.000000e+00 : f32
    %5 = vector.broadcast %cst_4 : f32 to vector<16x128xf32>
    %c0_5 = arith.constant 0 : index
    %c0_6 = arith.constant 0 : index
    %6 = vector.load %arg9[%c0_5, %c0_6] : memref<16x128xf32, #tpu.memory_space<vmem>>, vector<16x128xf32>
    tpu.vector_store %arg9[%c0_5, %c0_6], %5 {strides = array<i32>} : memref<16x128xf32, #tpu.memory_space<vmem>>, vector<16x128xf32>,
    %c0_7 = arith.constant 0 : index
    %c0_8 = arith.constant 0 : index
    %7 = vector.load %arg2[%c0_7, %c0_8] : memref<16x1xi32, #tpu.memory_space<vmem>>, vector<16x1xi32>
    %c0_9 = arith.constant 0 : index
    %c0_10 = arith.constant 0 : index
    %8 = vector.load %arg8[%c0_9, %c0_10] : memref<26x128xf32, #tpu.memory_space<vmem>>, vector<16x128xf32>
    %9 = arith.truncf %8 : vector<16x128xf32> to vector<16x128xbf16>
    %c0_i32 = arith.constant 0 : i32
    %10 = vector.broadcast %c0_i32 : i32 to vector<16x1xi32>
    %11 = arith.cmpi ne, %7, %10 : vector<16x1xi32>
    %cst_11 = arith.constant 0.000000e+00 : bf16
    %12 = vector.shape_cast %11 : vector<16x1xi1> to vector<16x1xi1>
    %13 = vector.broadcast %12 : vector<16x1xi1> to vector<16x128xi1>
    %14 = vector.broadcast %cst_11 : bf16 to vector<16x128xbf16>
    %15 = arith.select %13, %9, %14 : vector<16x128xi1>, vector<16x128xbf16>
    %c0_12 = arith.constant 0 : index
    %c0_13 = arith.constant 0 : index
    %16 = vector.load %arg9[%c0_12, %c0_13] : memref<16x128xf32, #tpu.memory_space<vmem>>, vector<16x128xf32>
    %c0_14 = arith.constant 0 : index
    %c0_15 = arith.constant 0 : index
    %c0_16 = arith.constant 0 : index
    %17 = vector.load %arg3[%c0_14, %c0_15, %c0_16] : memref<9x128x128xbf16, #tpu.memory_space<vmem>>, vector<1x128x128xbf16>
    %18 = vector.shape_cast %17 : vector<1x128x128xbf16> to vector<128x128xbf16>
    %cst_17 = arith.constant dense<0.000000e+00> : vector<16x128xf32>
    %19 = tpu.matmul %15, %18, %cst_17 {dimension_numbers = #tpu.dot_dimension_numbers<[1], [0], [0], [1], [0, 0, 1, 1], [], []>} : vector<16x128xbf16>, vector<128x128xbf16>, vector<16x128xf32> -> vector<16x128xf32>
    %20 = arith.addf %16, %19 : vector<16x128xf32>
    %c0_18 = arith.constant 0 : index
    %c0_19 = arith.constant 0 : index
    %21 = vector.load %arg9[%c0_18, %c0_19] : memref<16x128xf32, #tpu.memory_space<vmem>>, vector<16x128xf32>
    tpu.vector_store %arg9[%c0_18, %c0_19], %20 {strides = array<i32>} : memref<16x128xf32, #tpu.memory_space<vmem>>, vector<16x128xf32>,
    %c1 = arith.constant 1 : index
    %c0_20 = arith.constant 0 : index
    %22 = vector.load %arg8[%c1, %c0_20] : memref<26x128xf32, #tpu.memory_space<vmem>>, vector<16x128xf32>
    %23 = arith.truncf %22 : vector<16x128xf32> to vector<16x128xbf16>
    %c0_21 = arith.constant 0 : index
    %c0_22 = arith.constant 0 : index
    %24 = vector.load %arg9[%c0_21, %c0_22] : memref<16x128xf32, #tpu.memory_space<vmem>>, vector<16x128xf32>
    %c1_23 = arith.constant 1 : index
    %c0_24 = arith.constant 0 : index
    %c0_25 = arith.constant 0 : index
    %25 = vector.load %arg3[%c1_23, %c0_24, %c0_25] : memref<9x128x128xbf16, #tpu.memory_space<vmem>>, vector<1x128x128xbf16>
    %26 = vector.shape_cast %25 : vector<1x128x128xbf16> to vector<128x128xbf16>
    %cst_26 = arith.constant dense<0.000000e+00> : vector<16x128xf32>
    %27 = tpu.matmul %23, %26, %cst_26 {dimension_numbers = #tpu.dot_dimension_numbers<[1], [0], [0], [1], [0, 0, 1, 1], [], []>} : vector<16x128xbf16>, vector<128x128xbf16>, vector<16x128xf32> -> vector<16x128xf32>
    %28 = arith.addf %24, %27 : vector<16x128xf32>
    %c0_27 = arith.constant 0 : index
    %c0_28 = arith.constant 0 : index
    %29 = vector.load %arg9[%c0_27, %c0_28] : memref<16x128xf32, #tpu.memory_space<vmem>>, vector<16x128xf32>
    tpu.vector_store %arg9[%c0_27, %c0_28], %28 {strides = array<i32>} : memref<16x128xf32, #tpu.memory_space<vmem>>, vector<16x128xf32>,
    %c2 = arith.constant 2 : index
    %c0_29 = arith.constant 0 : index
    %30 = vector.load %arg8[%c2, %c0_29] : memref<26x128xf32, #tpu.memory_space<vmem>>, vector<16x128xf32>
    %31 = arith.truncf %30 : vector<16x128xf32> to vector<16x128xbf16>
    %c3_i32 = arith.constant 3 : i32
    %32 = vector.broadcast %c3_i32 : i32 to vector<16x1xi32>
    %33 = arith.cmpi ne, %7, %32 : vector<16x1xi32>
    %cst_30 = arith.constant 0.000000e+00 : bf16
    %34 = vector.shape_cast %33 : vector<16x1xi1> to vector<16x1xi1>
    %35 = vector.broadcast %34 : vector<16x1xi1> to vector<16x128xi1>
    %36 = vector.broadcast %cst_30 : bf16 to vector<16x128xbf16>
    %37 = arith.select %35, %31, %36 : vector<16x128xi1>, vector<16x128xbf16>
    %c0_31 = arith.constant 0 : index
    %c0_32 = arith.constant 0 : index
    %38 = vector.load %arg9[%c0_31, %c0_32] : memref<16x128xf32, #tpu.memory_space<vmem>>, vector<16x128xf32>
    %c2_33 = arith.constant 2 : index
    %c0_34 = arith.constant 0 : index
    %c0_35 = arith.constant 0 : index
    %39 = vector.load %arg3[%c2_33, %c0_34, %c0_35] : memref<9x128x128xbf16, #tpu.memory_space<vmem>>, vector<1x128x128xbf16>
    %40 = vector.shape_cast %39 : vector<1x128x128xbf16> to vector<128x128xbf16>
    %cst_36 = arith.constant dense<0.000000e+00> : vector<16x128xf32>
    %41 = tpu.matmul %37, %40, %cst_36 {dimension_numbers = #tpu.dot_dimension_numbers<[1], [0], [0], [1], [0, 0, 1, 1], [], []>} : vector<16x128xbf16>, vector<128x128xbf16>, vector<16x128xf32> -> vector<16x128xf32>
    %42 = arith.addf %38, %41 : vector<16x128xf32>
    %c0_37 = arith.constant 0 : index
    %c0_38 = arith.constant 0 : index
    %43 = vector.load %arg9[%c0_37, %c0_38] : memref<16x128xf32, #tpu.memory_space<vmem>>, vector<16x128xf32>
    tpu.vector_store %arg9[%c0_37, %c0_38], %42 {strides = array<i32>} : memref<16x128xf32, #tpu.memory_space<vmem>>, vector<16x128xf32>,
    %c4 = arith.constant 4 : index
    %c0_39 = arith.constant 0 : index
    %44 = vector.load %arg8[%c4, %c0_39] : memref<26x128xf32, #tpu.memory_space<vmem>>, vector<16x128xf32>
    %45 = arith.truncf %44 : vector<16x128xf32> to vector<16x128xbf16>
    %c0_i32_40 = arith.constant 0 : i32
    %46 = vector.broadcast %c0_i32_40 : i32 to vector<16x1xi32>
    %47 = arith.cmpi ne, %7, %46 : vector<16x1xi32>
    %cst_41 = arith.constant 0.000000e+00 : bf16
    %48 = vector.shape_cast %47 : vector<16x1xi1> to vector<16x1xi1>
    %49 = vector.broadcast %48 : vector<16x1xi1> to vector<16x128xi1>
    %50 = vector.broadcast %cst_41 : bf16 to vector<16x128xbf16>
    %51 = arith.select %49, %45, %50 : vector<16x128xi1>, vector<16x128xbf16>
    %c0_42 = arith.constant 0 : index
    %c0_43 = arith.constant 0 : index
    %52 = vector.load %arg9[%c0_42, %c0_43] : memref<16x128xf32, #tpu.memory_space<vmem>>, vector<16x128xf32>
    %c3 = arith.constant 3 : index
    %c0_44 = arith.constant 0 : index
    %c0_45 = arith.constant 0 : index
    %53 = vector.load %arg3[%c3, %c0_44, %c0_45] : memref<9x128x128xbf16, #tpu.memory_space<vmem>>, vector<1x128x128xbf16>
    %54 = vector.shape_cast %53 : vector<1x128x128xbf16> to vector<128x128xbf16>
    %cst_46 = arith.constant dense<0.000000e+00> : vector<16x128xf32>
    %55 = tpu.matmul %51, %54, %cst_46 {dimension_numbers = #tpu.dot_dimension_numbers<[1], [0], [0], [1], [0, 0, 1, 1], [], []>} : vector<16x128xbf16>, vector<128x128xbf16>, vector<16x128xf32> -> vector<16x128xf32>
    %56 = arith.addf %52, %55 : vector<16x128xf32>
    %c0_47 = arith.constant 0 : index
    %c0_48 = arith.constant 0 : index
    %57 = vector.load %arg9[%c0_47, %c0_48] : memref<16x128xf32, #tpu.memory_space<vmem>>, vector<16x128xf32>
    tpu.vector_store %arg9[%c0_47, %c0_48], %56 {strides = array<i32>} : memref<16x128xf32, #tpu.memory_space<vmem>>, vector<16x128xf32>,
    %c5 = arith.constant 5 : index
    %c0_49 = arith.constant 0 : index
    %58 = vector.load %arg8[%c5, %c0_49] : memref<26x128xf32, #tpu.memory_space<vmem>>, vector<16x128xf32>
    %59 = arith.truncf %58 : vector<16x128xf32> to vector<16x128xbf16>
    %c0_50 = arith.constant 0 : index
    %c0_51 = arith.constant 0 : index
    %60 = vector.load %arg9[%c0_50, %c0_51] : memref<16x128xf32, #tpu.memory_space<vmem>>, vector<16x128xf32>
    %c4_52 = arith.constant 4 : index
    %c0_53 = arith.constant 0 : index
    %c0_54 = arith.constant 0 : index
    %61 = vector.load %arg3[%c4_52, %c0_53, %c0_54] : memref<9x128x128xbf16, #tpu.memory_space<vmem>>, vector<1x128x128xbf16>
    %62 = vector.shape_cast %61 : vector<1x128x128xbf16> to vector<128x128xbf16>
    %cst_55 = arith.constant dense<0.000000e+00> : vector<16x128xf32>
    %63 = tpu.matmul %59, %62, %cst_55 {dimension_numbers = #tpu.dot_dimension_numbers<[1], [0], [0], [1], [0, 0, 1, 1], [], []>} : vector<16x128xbf16>, vector<128x128xbf16>, vector<16x128xf32> -> vector<16x128xf32>
    %64 = arith.addf %60, %63 : vector<16x128xf32>
    %c0_56 = arith.constant 0 : index
    %c0_57 = arith.constant 0 : index
    %65 = vector.load %arg9[%c0_56, %c0_57] : memref<16x128xf32, #tpu.memory_space<vmem>>, vector<16x128xf32>
    tpu.vector_store %arg9[%c0_56, %c0_57], %64 {strides = array<i32>} : memref<16x128xf32, #tpu.memory_space<vmem>>, vector<16x128xf32>,
    %c6 = arith.constant 6 : index
    %c0_58 = arith.constant 0 : index
    %66 = vector.load %arg8[%c6, %c0_58] : memref<26x128xf32, #tpu.memory_space<vmem>>, vector<16x128xf32>
    %67 = arith.truncf %66 : vector<16x128xf32> to vector<16x128xbf16>
    %c3_i32_59 = arith.constant 3 : i32
    %68 = vector.broadcast %c3_i32_59 : i32 to vector<16x1xi32>
    %69 = arith.cmpi ne, %7, %68 : vector<16x1xi32>
    %cst_60 = arith.constant 0.000000e+00 : bf16
    %70 = vector.shape_cast %69 : vector<16x1xi1> to vector<16x1xi1>
    %71 = vector.broadcast %70 : vector<16x1xi1> to vector<16x128xi1>
    %72 = vector.broadcast %cst_60 : bf16 to vector<16x128xbf16>
    %73 = arith.select %71, %67, %72 : vector<16x128xi1>, vector<16x128xbf16>
    %c0_61 = arith.constant 0 : index
    %c0_62 = arith.constant 0 : index
    %74 = vector.load %arg9[%c0_61, %c0_62] : memref<16x128xf32, #tpu.memory_space<vmem>>, vector<16x128xf32>
    %c5_63 = arith.constant 5 : index
    %c0_64 = arith.constant 0 : index
    %c0_65 = arith.constant 0 : index
    %75 = vector.load %arg3[%c5_63, %c0_64, %c0_65] : memref<9x128x128xbf16, #tpu.memory_space<vmem>>, vector<1x128x128xbf16>
    %76 = vector.shape_cast %75 : vector<1x128x128xbf16> to vector<128x128xbf16>
    %cst_66 = arith.constant dense<0.000000e+00> : vector<16x128xf32>
    %77 = tpu.matmul %73, %76, %cst_66 {dimension_numbers = #tpu.dot_dimension_numbers<[1], [0], [0], [1], [0, 0, 1, 1], [], []>} : vector<16x128xbf16>, vector<128x128xbf16>, vector<16x128xf32> -> vector<16x128xf32>
    %78 = arith.addf %74, %77 : vector<16x128xf32>
    %c0_67 = arith.constant 0 : index
    %c0_68 = arith.constant 0 : index
    %79 = vector.load %arg9[%c0_67, %c0_68] : memref<16x128xf32, #tpu.memory_space<vmem>>, vector<16x128xf32>
    tpu.vector_store %arg9[%c0_67, %c0_68], %78 {strides = array<i32>} : memref<16x128xf32, #tpu.memory_space<vmem>>, vector<16x128xf32>,
    %c8 = arith.constant 8 : index
    %c0_69 = arith.constant 0 : index
    %80 = vector.load %arg8[%c8, %c0_69] : memref<26x128xf32, #tpu.memory_space<vmem>>, vector<16x128xf32>
    %81 = arith.truncf %80 : vector<16x128xf32> to vector<16x128xbf16>
    %c0_i32_70 = arith.constant 0 : i32
    %82 = vector.broadcast %c0_i32_70 : i32 to vector<16x1xi32>
    %83 = arith.cmpi ne, %7, %82 : vector<16x1xi32>
    %cst_71 = arith.constant 0.000000e+00 : bf16
    %84 = vector.shape_cast %83 : vector<16x1xi1> to vector<16x1xi1>
    %85 = vector.broadcast %84 : vector<16x1xi1> to vector<16x128xi1>
    %86 = vector.broadcast %cst_71 : bf16 to vector<16x128xbf16>
    %87 = arith.select %85, %81, %86 : vector<16x128xi1>, vector<16x128xbf16>
    %c0_72 = arith.constant 0 : index
    %c0_73 = arith.constant 0 : index
    %88 = vector.load %arg9[%c0_72, %c0_73] : memref<16x128xf32, #tpu.memory_space<vmem>>, vector<16x128xf32>
    %c6_74 = arith.constant 6 : index
    %c0_75 = arith.constant 0 : index
    %c0_76 = arith.constant 0 : index
    %89 = vector.load %arg3[%c6_74, %c0_75, %c0_76] : memref<9x128x128xbf16, #tpu.memory_space<vmem>>, vector<1x128x128xbf16>
    %90 = vector.shape_cast %89 : vector<1x128x128xbf16> to vector<128x128xbf16>
    %cst_77 = arith.constant dense<0.000000e+00> : vector<16x128xf32>
    %91 = tpu.matmul %87, %90, %cst_77 {dimension_numbers = #tpu.dot_dimension_numbers<[1], [0], [0], [1], [0, 0, 1, 1], [], []>} : vector<16x128xbf16>, vector<128x128xbf16>, vector<16x128xf32> -> vector<16x128xf32>
    %92 = arith.addf %88, %91 : vector<16x128xf32>
    %c0_78 = arith.constant 0 : index
    %c0_79 = arith.constant 0 : index
    %93 = vector.load %arg9[%c0_78, %c0_79] : memref<16x128xf32, #tpu.memory_space<vmem>>, vector<16x128xf32>
    tpu.vector_store %arg9[%c0_78, %c0_79], %92 {strides = array<i32>} : memref<16x128xf32, #tpu.memory_space<vmem>>, vector<16x128xf32>,
    %c9 = arith.constant 9 : index
    %c0_80 = arith.constant 0 : index
    %94 = vector.load %arg8[%c9, %c0_80] : memref<26x128xf32, #tpu.memory_space<vmem>>, vector<16x128xf32>
    %95 = arith.truncf %94 : vector<16x128xf32> to vector<16x128xbf16>
    %c0_81 = arith.constant 0 : index
    %c0_82 = arith.constant 0 : index
    %96 = vector.load %arg9[%c0_81, %c0_82] : memref<16x128xf32, #tpu.memory_space<vmem>>, vector<16x128xf32>
    %c7 = arith.constant 7 : index
    %c0_83 = arith.constant 0 : index
    %c0_84 = arith.constant 0 : index
    %97 = vector.load %arg3[%c7, %c0_83, %c0_84] : memref<9x128x128xbf16, #tpu.memory_space<vmem>>, vector<1x128x128xbf16>
    %98 = vector.shape_cast %97 : vector<1x128x128xbf16> to vector<128x128xbf16>
    %cst_85 = arith.constant dense<0.000000e+00> : vector<16x128xf32>
    %99 = tpu.matmul %95, %98, %cst_85 {dimension_numbers = #tpu.dot_dimension_numbers<[1], [0], [0], [1], [0, 0, 1, 1], [], []>} : vector<16x128xbf16>, vector<128x128xbf16>, vector<16x128xf32> -> vector<16x128xf32>
    %100 = arith.addf %96, %99 : vector<16x128xf32>
    %c0_86 = arith.constant 0 : index
    %c0_87 = arith.constant 0 : index
    %101 = vector.load %arg9[%c0_86, %c0_87] : memref<16x128xf32, #tpu.memory_space<vmem>>, vector<16x128xf32>
    tpu.vector_store %arg9[%c0_86, %c0_87], %100 {strides = array<i32>} : memref<16x128xf32, #tpu.memory_space<vmem>>, vector<16x128xf32>,
    %c10 = arith.constant 10 : index
    %c0_88 = arith.constant 0 : index
    %102 = vector.load %arg8[%c10, %c0_88] : memref<26x128xf32, #tpu.memory_space<vmem>>, vector<16x128xf32>
    %103 = arith.truncf %102 : vector<16x128xf32> to vector<16x128xbf16>
    %c3_i32_89 = arith.constant 3 : i32
    %104 = vector.broadcast %c3_i32_89 : i32 to vector<16x1xi32>
    %105 = arith.cmpi ne, %7, %104 : vector<16x1xi32>
    %cst_90 = arith.constant 0.000000e+00 : bf16
    %106 = vector.shape_cast %105 : vector<16x1xi1> to vector<16x1xi1>
    %107 = vector.broadcast %106 : vector<16x1xi1> to vector<16x128xi1>
    %108 = vector.broadcast %cst_90 : bf16 to vector<16x128xbf16>
    %109 = arith.select %107, %103, %108 : vector<16x128xi1>, vector<16x128xbf16>
    %c0_91 = arith.constant 0 : index
    %c0_92 = arith.constant 0 : index
    %110 = vector.load %arg9[%c0_91, %c0_92] : memref<16x128xf32, #tpu.memory_space<vmem>>, vector<16x128xf32>
    %c8_93 = arith.constant 8 : index
    %c0_94 = arith.constant 0 : index
    %c0_95 = arith.constant 0 : index
    %111 = vector.load %arg3[%c8_93, %c0_94, %c0_95] : memref<9x128x128xbf16, #tpu.memory_space<vmem>>, vector<1x128x128xbf16>
    %112 = vector.shape_cast %111 : vector<1x128x128xbf16> to vector<128x128xbf16>
    %cst_96 = arith.constant dense<0.000000e+00> : vector<16x128xf32>
    %113 = tpu.matmul %109, %112, %cst_96 {dimension_numbers = #tpu.dot_dimension_numbers<[1], [0], [0], [1], [0, 0, 1, 1], [], []>} : vector<16x128xbf16>, vector<128x128xbf16>, vector<16x128xf32> -> vector<16x128xf32>
    %114 = arith.addf %110, %113 : vector<16x128xf32>
    %c0_97 = arith.constant 0 : index
    %c0_98 = arith.constant 0 : index
    %115 = vector.load %arg9[%c0_97, %c0_98] : memref<16x128xf32, #tpu.memory_space<vmem>>, vector<16x128xf32>
    tpu.vector_store %arg9[%c0_97, %c0_98], %114 {strides = array<i32>} : memref<16x128xf32, #tpu.memory_space<vmem>>, vector<16x128xf32>,
    %c0_99 = arith.constant 0 : index
    %c0_100 = arith.constant 0 : index
    %116 = vector.load %arg9[%c0_99, %c0_100] : memref<16x128xf32, #tpu.memory_space<vmem>>, vector<16x128xf32>
    %c0_101 = arith.constant 0 : index
    %c0_102 = arith.constant 0 : index
    %117 = vector.load %arg4[%c0_101, %c0_102] : memref<1x128xf32, #tpu.memory_space<vmem>>, vector<1x128xf32>
    %118 = vector.broadcast %117 : vector<1x128xf32> to vector<16x128xf32>
    %119 = arith.addf %116, %118 : vector<16x128xf32>
    %cst_103 = arith.constant 0.000000e+00 : f32
    %120 = vector.broadcast %cst_103 : f32 to vector<16x128xf32>
    %121 = arith.maximumf %119, %120 : vector<16x128xf32>
    %122 = arith.truncf %121 : vector<16x128xf32> to vector<16x128xbf16>
    %c0_104 = arith.constant 0 : index
    %c0_105 = arith.constant 0 : index
    %123 = vector.load %arg5[%c0_104, %c0_105] : memref<128x128xbf16, #tpu.memory_space<vmem>>, vector<128x128xbf16>
    %cst_106 = arith.constant dense<0.000000e+00> : vector<16x128xf32>
    %124 = tpu.matmul %122, %123, %cst_106 {dimension_numbers = #tpu.dot_dimension_numbers<[1], [0], [0], [1], [0, 0, 1, 1], [], []>} : vector<16x128xbf16>, vector<128x128xbf16>, vector<16x128xf32> -> vector<16x128xf32>
    %c0_107 = arith.constant 0 : index
    %c0_108 = arith.constant 0 : index
    %125 = vector.load %arg6[%c0_107, %c0_108] : memref<1x128xf32, #tpu.memory_space<vmem>>, vector<1x128xf32>
    %126 = vector.broadcast %125 : vector<1x128xf32> to vector<16x128xf32>
    %127 = arith.addf %124, %126 : vector<16x128xf32>
    %c0_109 = arith.constant 0 : index
    %c5_110 = arith.constant 5 : index
    %c0_111 = arith.constant 0 : index
    %128 = vector.load %arg1[%c0_109, %c5_110, %c0_111] : memref<1x26x128xf32, #tpu.memory_space<vmem>>, vector<1x16x128xf32>
    %129 = vector.shape_cast %128 : vector<1x16x128xf32> to vector<16x128xf32>
    %130 = arith.addf %127, %129 : vector<16x128xf32>
    %c0_112 = arith.constant 0 : index
    %c0_113 = arith.constant 0 : index
    %c0_114 = arith.constant 0 : index
    %131 = vector.load %arg7[%c0_112, %c0_113, %c0_114] : memref<1x16x128xf32, #tpu.memory_space<vmem>>, vector<1x16x128xf32>
    %132 = vector.shape_cast %131 : vector<1x16x128xf32> to vector<16x128xf32>
    %133 = vector.shape_cast %130 : vector<16x128xf32> to vector<1x16x128xf32>
    tpu.vector_store %arg7[%c0_112, %c0_113, %c0_114], %133 {strides = array<i32>} : memref<1x16x128xf32, #tpu.memory_space<vmem>>, vector<1x16x128xf32>,
    return
  }
  func.func @transform_0(%arg0: i32) -> (i32, i32, i32) {
    %c0_i32 = arith.constant 0 : i32
    %c0_i32_0 = arith.constant 0 : i32
    %c0_i32_1 = arith.constant 0 : i32
    return %arg0, %c0_i32, %c0_i32_0 : i32, i32, i32
  }
  func.func @transform_1(%arg0: i32) -> (i32, i32) {
    %c0_i32 = arith.constant 0 : i32
    %c0_i32_0 = arith.constant 0 : i32
    %c0_i32_1 = arith.constant 0 : i32
    return %c0_i32, %c0_i32_0 : i32, i32
  }
  func.func @transform_2(%arg0: i32) -> (i32, i32, i32) {
    %c0_i32 = arith.constant 0 : i32
    %c0_i32_0 = arith.constant 0 : i32
    %c0_i32_1 = arith.constant 0 : i32
    %c0_i32_2 = arith.constant 0 : i32
    return %c0_i32, %c0_i32_0, %c0_i32_1 : i32, i32, i32
  }
  func.func @transform_3(%arg0: i32) -> (i32, i32) {
    %c0_i32 = arith.constant 0 : i32
    %c0_i32_0 = arith.constant 0 : i32
    %c0_i32_1 = arith.constant 0 : i32
    return %c0_i32, %c0_i32_0 : i32, i32
  }
  func.func @transform_4(%arg0: i32) -> (i32, i32) {
    %c0_i32 = arith.constant 0 : i32
    %c0_i32_0 = arith.constant 0 : i32
    %c0_i32_1 = arith.constant 0 : i32
    return %c0_i32, %c0_i32_0 : i32, i32
  }
  func.func @transform_5(%arg0: i32) -> (i32, i32) {
    %c0_i32 = arith.constant 0 : i32
    %c0_i32_0 = arith.constant 0 : i32
    %c0_i32_1 = arith.constant 0 : i32
    return %c0_i32, %c0_i32_0 : i32, i32
  }
  func.func @transform_6(%arg0: i32) -> (i32, i32, i32) {
    %c0_i32 = arith.constant 0 : i32
    %c0_i32_0 = arith.constant 0 : i32
    %c0_i32_1 = arith.constant 0 : i32
    return %arg0, %c0_i32, %c0_i32_0 : i32, i32, i32
  }
}

module attributes {stable_mosaic.version = 11 : i64} {
  func.func @_resblock_kernel(%arg0: i32, %arg1: memref<1x26x128xf32, #tpu.memory_space<vmem>>, %arg2: memref<16x1xi32, #tpu.memory_space<vmem>>, %arg3: memref<9x128x128xbf16, #tpu.memory_space<vmem>>, %arg4: memref<1x128xf32, #tpu.memory_space<vmem>>, %arg5: memref<128x128xbf16, #tpu.memory_space<vmem>>, %arg6: memref<1x128xf32, #tpu.memory_space<vmem>>, %arg7: memref<128x128xbf16, #tpu.memory_space<vmem>>, %arg8: memref<1x128xf32, #tpu.memory_space<vmem>>, %arg9: memref<1x16x128xf32, #tpu.memory_space<vmem>>, %arg10: memref<26x128xf32, #tpu.memory_space<vmem>>, %arg11: memref<16x128xf32, #tpu.memory_space<vmem>>) attributes {dimension_semantics = [#tpu.dimension_semantics<parallel>], iteration_bounds = array<i64: 2>, scalar_prefetch = 0 : i64, scratch_operands = 2 : i64, tpu.core_type = #tpu.core_type<tc>, window_params = [{transform_indices = @transform_0, window_bounds = array<i64: 1, 26, 128>}, {pipeline_mode = #tpu.pipeline_mode<synchronous>, transform_indices = @transform_1, window_bounds = array<i64: 16, 1>}, {pipeline_mode = #tpu.pipeline_mode<synchronous>, transform_indices = @transform_2, window_bounds = array<i64: 9, 128, 128>}, {pipeline_mode = #tpu.pipeline_mode<synchronous>, transform_indices = @transform_3, window_bounds = array<i64: 1, 128>}, {pipeline_mode = #tpu.pipeline_mode<synchronous>, transform_indices = @transform_4, window_bounds = array<i64: 128, 128>}, {pipeline_mode = #tpu.pipeline_mode<synchronous>, transform_indices = @transform_5, window_bounds = array<i64: 1, 128>}, {pipeline_mode = #tpu.pipeline_mode<synchronous>, transform_indices = @transform_6, window_bounds = array<i64: 128, 128>}, {pipeline_mode = #tpu.pipeline_mode<synchronous>, transform_indices = @transform_7, window_bounds = array<i64: 1, 128>}, {transform_indices = @transform_8, window_bounds = array<i64: 1, 16, 128>}]} {
    %c0 = arith.constant 0 : index
    %c0_0 = arith.constant 0 : index
    %c0_1 = arith.constant 0 : index
    %0 = vector.load %arg1[%c0, %c0_0, %c0_1] : memref<1x26x128xf32, #tpu.memory_space<vmem>>, vector<1x26x128xf32>
    %1 = vector.shape_cast %0 : vector<1x26x128xf32> to vector<26x128xf32>
    %cst = arith.constant 0.000000e+00 : f32
    %2 = vector.broadcast %cst : f32 to vector<26x128xf32>
    %3 = arith.maximumf %1, %2 : vector<26x128xf32>
    %c0_2 = arith.constant 0 : index
    %c0_3 = arith.constant 0 : index
    %4 = vector.load %arg10[%c0_2, %c0_3] : memref<26x128xf32, #tpu.memory_space<vmem>>, vector<26x128xf32>
    tpu.vector_store %arg10[%c0_2, %c0_3], %3 {strides = array<i32>} : memref<26x128xf32, #tpu.memory_space<vmem>>, vector<26x128xf32>,
    %cst_4 = arith.constant 0.000000e+00 : f32
    %5 = vector.broadcast %cst_4 : f32 to vector<16x128xf32>
    %c0_5 = arith.constant 0 : index
    %c0_6 = arith.constant 0 : index
    %6 = vector.load %arg11[%c0_5, %c0_6] : memref<16x128xf32, #tpu.memory_space<vmem>>, vector<16x128xf32>
    tpu.vector_store %arg11[%c0_5, %c0_6], %5 {strides = array<i32>} : memref<16x128xf32, #tpu.memory_space<vmem>>, vector<16x128xf32>,
    %c0_7 = arith.constant 0 : index
    %c0_8 = arith.constant 0 : index
    %7 = vector.load %arg2[%c0_7, %c0_8] : memref<16x1xi32, #tpu.memory_space<vmem>>, vector<16x1xi32>
    %c0_9 = arith.constant 0 : index
    %c0_10 = arith.constant 0 : index
    %8 = vector.load %arg10[%c0_9, %c0_10] : memref<26x128xf32, #tpu.memory_space<vmem>>, vector<16x128xf32>
    %9 = arith.truncf %8 : vector<16x128xf32> to vector<16x128xbf16>
    %c0_i32 = arith.constant 0 : i32
    %10 = vector.broadcast %c0_i32 : i32 to vector<16x1xi32>
    %11 = arith.cmpi ne, %7, %10 : vector<16x1xi32>
    %cst_11 = arith.constant 0.000000e+00 : bf16
    %12 = vector.shape_cast %11 : vector<16x1xi1> to vector<16x1xi1>
    %13 = vector.broadcast %12 : vector<16x1xi1> to vector<16x128xi1>
    %14 = vector.broadcast %cst_11 : bf16 to vector<16x128xbf16>
    %15 = arith.select %13, %9, %14 : vector<16x128xi1>, vector<16x128xbf16>
    %c0_12 = arith.constant 0 : index
    %c0_13 = arith.constant 0 : index
    %16 = vector.load %arg11[%c0_12, %c0_13] : memref<16x128xf32, #tpu.memory_space<vmem>>, vector<16x128xf32>
    %c0_14 = arith.constant 0 : index
    %c0_15 = arith.constant 0 : index
    %c0_16 = arith.constant 0 : index
    %17 = vector.load %arg3[%c0_14, %c0_15, %c0_16] : memref<9x128x128xbf16, #tpu.memory_space<vmem>>, vector<1x128x128xbf16>
    %18 = vector.shape_cast %17 : vector<1x128x128xbf16> to vector<128x128xbf16>
    %cst_17 = arith.constant dense<0.000000e+00> : vector<16x128xf32>
    %19 = tpu.matmul %15, %18, %cst_17 {dimension_numbers = #tpu.dot_dimension_numbers<[1], [0], [0], [1], [0, 0, 1, 1], [], []>} : vector<16x128xbf16>, vector<128x128xbf16>, vector<16x128xf32> -> vector<16x128xf32>
    %20 = arith.addf %16, %19 : vector<16x128xf32>
    %c0_18 = arith.constant 0 : index
    %c0_19 = arith.constant 0 : index
    %21 = vector.load %arg11[%c0_18, %c0_19] : memref<16x128xf32, #tpu.memory_space<vmem>>, vector<16x128xf32>
    tpu.vector_store %arg11[%c0_18, %c0_19], %20 {strides = array<i32>} : memref<16x128xf32, #tpu.memory_space<vmem>>, vector<16x128xf32>,
    %c1 = arith.constant 1 : index
    %c0_20 = arith.constant 0 : index
    %22 = vector.load %arg10[%c1, %c0_20] : memref<26x128xf32, #tpu.memory_space<vmem>>, vector<16x128xf32>
    %23 = arith.truncf %22 : vector<16x128xf32> to vector<16x128xbf16>
    %c0_21 = arith.constant 0 : index
    %c0_22 = arith.constant 0 : index
    %24 = vector.load %arg11[%c0_21, %c0_22] : memref<16x128xf32, #tpu.memory_space<vmem>>, vector<16x128xf32>
    %c1_23 = arith.constant 1 : index
    %c0_24 = arith.constant 0 : index
    %c0_25 = arith.constant 0 : index
    %25 = vector.load %arg3[%c1_23, %c0_24, %c0_25] : memref<9x128x128xbf16, #tpu.memory_space<vmem>>, vector<1x128x128xbf16>
    %26 = vector.shape_cast %25 : vector<1x128x128xbf16> to vector<128x128xbf16>
    %cst_26 = arith.constant dense<0.000000e+00> : vector<16x128xf32>
    %27 = tpu.matmul %23, %26, %cst_26 {dimension_numbers = #tpu.dot_dimension_numbers<[1], [0], [0], [1], [0, 0, 1, 1], [], []>} : vector<16x128xbf16>, vector<128x128xbf16>, vector<16x128xf32> -> vector<16x128xf32>
    %28 = arith.addf %24, %27 : vector<16x128xf32>
    %c0_27 = arith.constant 0 : index
    %c0_28 = arith.constant 0 : index
    %29 = vector.load %arg11[%c0_27, %c0_28] : memref<16x128xf32, #tpu.memory_space<vmem>>, vector<16x128xf32>
    tpu.vector_store %arg11[%c0_27, %c0_28], %28 {strides = array<i32>} : memref<16x128xf32, #tpu.memory_space<vmem>>, vector<16x128xf32>,
    %c2 = arith.constant 2 : index
    %c0_29 = arith.constant 0 : index
    %30 = vector.load %arg10[%c2, %c0_29] : memref<26x128xf32, #tpu.memory_space<vmem>>, vector<16x128xf32>
    %31 = arith.truncf %30 : vector<16x128xf32> to vector<16x128xbf16>
    %c3_i32 = arith.constant 3 : i32
    %32 = vector.broadcast %c3_i32 : i32 to vector<16x1xi32>
    %33 = arith.cmpi ne, %7, %32 : vector<16x1xi32>
    %cst_30 = arith.constant 0.000000e+00 : bf16
    %34 = vector.shape_cast %33 : vector<16x1xi1> to vector<16x1xi1>
    %35 = vector.broadcast %34 : vector<16x1xi1> to vector<16x128xi1>
    %36 = vector.broadcast %cst_30 : bf16 to vector<16x128xbf16>
    %37 = arith.select %35, %31, %36 : vector<16x128xi1>, vector<16x128xbf16>
    %c0_31 = arith.constant 0 : index
    %c0_32 = arith.constant 0 : index
    %38 = vector.load %arg11[%c0_31, %c0_32] : memref<16x128xf32, #tpu.memory_space<vmem>>, vector<16x128xf32>
    %c2_33 = arith.constant 2 : index
    %c0_34 = arith.constant 0 : index
    %c0_35 = arith.constant 0 : index
    %39 = vector.load %arg3[%c2_33, %c0_34, %c0_35] : memref<9x128x128xbf16, #tpu.memory_space<vmem>>, vector<1x128x128xbf16>
    %40 = vector.shape_cast %39 : vector<1x128x128xbf16> to vector<128x128xbf16>
    %cst_36 = arith.constant dense<0.000000e+00> : vector<16x128xf32>
    %41 = tpu.matmul %37, %40, %cst_36 {dimension_numbers = #tpu.dot_dimension_numbers<[1], [0], [0], [1], [0, 0, 1, 1], [], []>} : vector<16x128xbf16>, vector<128x128xbf16>, vector<16x128xf32> -> vector<16x128xf32>
    %42 = arith.addf %38, %41 : vector<16x128xf32>
    %c0_37 = arith.constant 0 : index
    %c0_38 = arith.constant 0 : index
    %43 = vector.load %arg11[%c0_37, %c0_38] : memref<16x128xf32, #tpu.memory_space<vmem>>, vector<16x128xf32>
    tpu.vector_store %arg11[%c0_37, %c0_38], %42 {strides = array<i32>} : memref<16x128xf32, #tpu.memory_space<vmem>>, vector<16x128xf32>,
    %c4 = arith.constant 4 : index
    %c0_39 = arith.constant 0 : index
    %44 = vector.load %arg10[%c4, %c0_39] : memref<26x128xf32, #tpu.memory_space<vmem>>, vector<16x128xf32>
    %45 = arith.truncf %44 : vector<16x128xf32> to vector<16x128xbf16>
    %c0_i32_40 = arith.constant 0 : i32
    %46 = vector.broadcast %c0_i32_40 : i32 to vector<16x1xi32>
    %47 = arith.cmpi ne, %7, %46 : vector<16x1xi32>
    %cst_41 = arith.constant 0.000000e+00 : bf16
    %48 = vector.shape_cast %47 : vector<16x1xi1> to vector<16x1xi1>
    %49 = vector.broadcast %48 : vector<16x1xi1> to vector<16x128xi1>
    %50 = vector.broadcast %cst_41 : bf16 to vector<16x128xbf16>
    %51 = arith.select %49, %45, %50 : vector<16x128xi1>, vector<16x128xbf16>
    %c0_42 = arith.constant 0 : index
    %c0_43 = arith.constant 0 : index
    %52 = vector.load %arg11[%c0_42, %c0_43] : memref<16x128xf32, #tpu.memory_space<vmem>>, vector<16x128xf32>
    %c3 = arith.constant 3 : index
    %c0_44 = arith.constant 0 : index
    %c0_45 = arith.constant 0 : index
    %53 = vector.load %arg3[%c3, %c0_44, %c0_45] : memref<9x128x128xbf16, #tpu.memory_space<vmem>>, vector<1x128x128xbf16>
    %54 = vector.shape_cast %53 : vector<1x128x128xbf16> to vector<128x128xbf16>
    %cst_46 = arith.constant dense<0.000000e+00> : vector<16x128xf32>
    %55 = tpu.matmul %51, %54, %cst_46 {dimension_numbers = #tpu.dot_dimension_numbers<[1], [0], [0], [1], [0, 0, 1, 1], [], []>} : vector<16x128xbf16>, vector<128x128xbf16>, vector<16x128xf32> -> vector<16x128xf32>
    %56 = arith.addf %52, %55 : vector<16x128xf32>
    %c0_47 = arith.constant 0 : index
    %c0_48 = arith.constant 0 : index
    %57 = vector.load %arg11[%c0_47, %c0_48] : memref<16x128xf32, #tpu.memory_space<vmem>>, vector<16x128xf32>
    tpu.vector_store %arg11[%c0_47, %c0_48], %56 {strides = array<i32>} : memref<16x128xf32, #tpu.memory_space<vmem>>, vector<16x128xf32>,
    %c5 = arith.constant 5 : index
    %c0_49 = arith.constant 0 : index
    %58 = vector.load %arg10[%c5, %c0_49] : memref<26x128xf32, #tpu.memory_space<vmem>>, vector<16x128xf32>
    %59 = arith.truncf %58 : vector<16x128xf32> to vector<16x128xbf16>
    %c0_50 = arith.constant 0 : index
    %c0_51 = arith.constant 0 : index
    %60 = vector.load %arg11[%c0_50, %c0_51] : memref<16x128xf32, #tpu.memory_space<vmem>>, vector<16x128xf32>
    %c4_52 = arith.constant 4 : index
    %c0_53 = arith.constant 0 : index
    %c0_54 = arith.constant 0 : index
    %61 = vector.load %arg3[%c4_52, %c0_53, %c0_54] : memref<9x128x128xbf16, #tpu.memory_space<vmem>>, vector<1x128x128xbf16>
    %62 = vector.shape_cast %61 : vector<1x128x128xbf16> to vector<128x128xbf16>
    %cst_55 = arith.constant dense<0.000000e+00> : vector<16x128xf32>
    %63 = tpu.matmul %59, %62, %cst_55 {dimension_numbers = #tpu.dot_dimension_numbers<[1], [0], [0], [1], [0, 0, 1, 1], [], []>} : vector<16x128xbf16>, vector<128x128xbf16>, vector<16x128xf32> -> vector<16x128xf32>
    %64 = arith.addf %60, %63 : vector<16x128xf32>
    %c0_56 = arith.constant 0 : index
    %c0_57 = arith.constant 0 : index
    %65 = vector.load %arg11[%c0_56, %c0_57] : memref<16x128xf32, #tpu.memory_space<vmem>>, vector<16x128xf32>
    tpu.vector_store %arg11[%c0_56, %c0_57], %64 {strides = array<i32>} : memref<16x128xf32, #tpu.memory_space<vmem>>, vector<16x128xf32>,
    %c6 = arith.constant 6 : index
    %c0_58 = arith.constant 0 : index
    %66 = vector.load %arg10[%c6, %c0_58] : memref<26x128xf32, #tpu.memory_space<vmem>>, vector<16x128xf32>
    %67 = arith.truncf %66 : vector<16x128xf32> to vector<16x128xbf16>
    %c3_i32_59 = arith.constant 3 : i32
    %68 = vector.broadcast %c3_i32_59 : i32 to vector<16x1xi32>
    %69 = arith.cmpi ne, %7, %68 : vector<16x1xi32>
    %cst_60 = arith.constant 0.000000e+00 : bf16
    %70 = vector.shape_cast %69 : vector<16x1xi1> to vector<16x1xi1>
    %71 = vector.broadcast %70 : vector<16x1xi1> to vector<16x128xi1>
    %72 = vector.broadcast %cst_60 : bf16 to vector<16x128xbf16>
    %73 = arith.select %71, %67, %72 : vector<16x128xi1>, vector<16x128xbf16>
    %c0_61 = arith.constant 0 : index
    %c0_62 = arith.constant 0 : index
    %74 = vector.load %arg11[%c0_61, %c0_62] : memref<16x128xf32, #tpu.memory_space<vmem>>, vector<16x128xf32>
    %c5_63 = arith.constant 5 : index
    %c0_64 = arith.constant 0 : index
    %c0_65 = arith.constant 0 : index
    %75 = vector.load %arg3[%c5_63, %c0_64, %c0_65] : memref<9x128x128xbf16, #tpu.memory_space<vmem>>, vector<1x128x128xbf16>
    %76 = vector.shape_cast %75 : vector<1x128x128xbf16> to vector<128x128xbf16>
    %cst_66 = arith.constant dense<0.000000e+00> : vector<16x128xf32>
    %77 = tpu.matmul %73, %76, %cst_66 {dimension_numbers = #tpu.dot_dimension_numbers<[1], [0], [0], [1], [0, 0, 1, 1], [], []>} : vector<16x128xbf16>, vector<128x128xbf16>, vector<16x128xf32> -> vector<16x128xf32>
    %78 = arith.addf %74, %77 : vector<16x128xf32>
    %c0_67 = arith.constant 0 : index
    %c0_68 = arith.constant 0 : index
    %79 = vector.load %arg11[%c0_67, %c0_68] : memref<16x128xf32, #tpu.memory_space<vmem>>, vector<16x128xf32>
    tpu.vector_store %arg11[%c0_67, %c0_68], %78 {strides = array<i32>} : memref<16x128xf32, #tpu.memory_space<vmem>>, vector<16x128xf32>,
    %c8 = arith.constant 8 : index
    %c0_69 = arith.constant 0 : index
    %80 = vector.load %arg10[%c8, %c0_69] : memref<26x128xf32, #tpu.memory_space<vmem>>, vector<16x128xf32>
    %81 = arith.truncf %80 : vector<16x128xf32> to vector<16x128xbf16>
    %c0_i32_70 = arith.constant 0 : i32
    %82 = vector.broadcast %c0_i32_70 : i32 to vector<16x1xi32>
    %83 = arith.cmpi ne, %7, %82 : vector<16x1xi32>
    %cst_71 = arith.constant 0.000000e+00 : bf16
    %84 = vector.shape_cast %83 : vector<16x1xi1> to vector<16x1xi1>
    %85 = vector.broadcast %84 : vector<16x1xi1> to vector<16x128xi1>
    %86 = vector.broadcast %cst_71 : bf16 to vector<16x128xbf16>
    %87 = arith.select %85, %81, %86 : vector<16x128xi1>, vector<16x128xbf16>
    %c0_72 = arith.constant 0 : index
    %c0_73 = arith.constant 0 : index
    %88 = vector.load %arg11[%c0_72, %c0_73] : memref<16x128xf32, #tpu.memory_space<vmem>>, vector<16x128xf32>
    %c6_74 = arith.constant 6 : index
    %c0_75 = arith.constant 0 : index
    %c0_76 = arith.constant 0 : index
    %89 = vector.load %arg3[%c6_74, %c0_75, %c0_76] : memref<9x128x128xbf16, #tpu.memory_space<vmem>>, vector<1x128x128xbf16>
    %90 = vector.shape_cast %89 : vector<1x128x128xbf16> to vector<128x128xbf16>
    %cst_77 = arith.constant dense<0.000000e+00> : vector<16x128xf32>
    %91 = tpu.matmul %87, %90, %cst_77 {dimension_numbers = #tpu.dot_dimension_numbers<[1], [0], [0], [1], [0, 0, 1, 1], [], []>} : vector<16x128xbf16>, vector<128x128xbf16>, vector<16x128xf32> -> vector<16x128xf32>
    %92 = arith.addf %88, %91 : vector<16x128xf32>
    %c0_78 = arith.constant 0 : index
    %c0_79 = arith.constant 0 : index
    %93 = vector.load %arg11[%c0_78, %c0_79] : memref<16x128xf32, #tpu.memory_space<vmem>>, vector<16x128xf32>
    tpu.vector_store %arg11[%c0_78, %c0_79], %92 {strides = array<i32>} : memref<16x128xf32, #tpu.memory_space<vmem>>, vector<16x128xf32>,
    %c9 = arith.constant 9 : index
    %c0_80 = arith.constant 0 : index
    %94 = vector.load %arg10[%c9, %c0_80] : memref<26x128xf32, #tpu.memory_space<vmem>>, vector<16x128xf32>
    %95 = arith.truncf %94 : vector<16x128xf32> to vector<16x128xbf16>
    %c0_81 = arith.constant 0 : index
    %c0_82 = arith.constant 0 : index
    %96 = vector.load %arg11[%c0_81, %c0_82] : memref<16x128xf32, #tpu.memory_space<vmem>>, vector<16x128xf32>
    %c7 = arith.constant 7 : index
    %c0_83 = arith.constant 0 : index
    %c0_84 = arith.constant 0 : index
    %97 = vector.load %arg3[%c7, %c0_83, %c0_84] : memref<9x128x128xbf16, #tpu.memory_space<vmem>>, vector<1x128x128xbf16>
    %98 = vector.shape_cast %97 : vector<1x128x128xbf16> to vector<128x128xbf16>
    %cst_85 = arith.constant dense<0.000000e+00> : vector<16x128xf32>
    %99 = tpu.matmul %95, %98, %cst_85 {dimension_numbers = #tpu.dot_dimension_numbers<[1], [0], [0], [1], [0, 0, 1, 1], [], []>} : vector<16x128xbf16>, vector<128x128xbf16>, vector<16x128xf32> -> vector<16x128xf32>
    %100 = arith.addf %96, %99 : vector<16x128xf32>
    %c0_86 = arith.constant 0 : index
    %c0_87 = arith.constant 0 : index
    %101 = vector.load %arg11[%c0_86, %c0_87] : memref<16x128xf32, #tpu.memory_space<vmem>>, vector<16x128xf32>
    tpu.vector_store %arg11[%c0_86, %c0_87], %100 {strides = array<i32>} : memref<16x128xf32, #tpu.memory_space<vmem>>, vector<16x128xf32>,
    %c10 = arith.constant 10 : index
    %c0_88 = arith.constant 0 : index
    %102 = vector.load %arg10[%c10, %c0_88] : memref<26x128xf32, #tpu.memory_space<vmem>>, vector<16x128xf32>
    %103 = arith.truncf %102 : vector<16x128xf32> to vector<16x128xbf16>
    %c3_i32_89 = arith.constant 3 : i32
    %104 = vector.broadcast %c3_i32_89 : i32 to vector<16x1xi32>
    %105 = arith.cmpi ne, %7, %104 : vector<16x1xi32>
    %cst_90 = arith.constant 0.000000e+00 : bf16
    %106 = vector.shape_cast %105 : vector<16x1xi1> to vector<16x1xi1>
    %107 = vector.broadcast %106 : vector<16x1xi1> to vector<16x128xi1>
    %108 = vector.broadcast %cst_90 : bf16 to vector<16x128xbf16>
    %109 = arith.select %107, %103, %108 : vector<16x128xi1>, vector<16x128xbf16>
    %c0_91 = arith.constant 0 : index
    %c0_92 = arith.constant 0 : index
    %110 = vector.load %arg11[%c0_91, %c0_92] : memref<16x128xf32, #tpu.memory_space<vmem>>, vector<16x128xf32>
    %c8_93 = arith.constant 8 : index
    %c0_94 = arith.constant 0 : index
    %c0_95 = arith.constant 0 : index
    %111 = vector.load %arg3[%c8_93, %c0_94, %c0_95] : memref<9x128x128xbf16, #tpu.memory_space<vmem>>, vector<1x128x128xbf16>
    %112 = vector.shape_cast %111 : vector<1x128x128xbf16> to vector<128x128xbf16>
    %cst_96 = arith.constant dense<0.000000e+00> : vector<16x128xf32>
    %113 = tpu.matmul %109, %112, %cst_96 {dimension_numbers = #tpu.dot_dimension_numbers<[1], [0], [0], [1], [0, 0, 1, 1], [], []>} : vector<16x128xbf16>, vector<128x128xbf16>, vector<16x128xf32> -> vector<16x128xf32>
    %114 = arith.addf %110, %113 : vector<16x128xf32>
    %c0_97 = arith.constant 0 : index
    %c0_98 = arith.constant 0 : index
    %115 = vector.load %arg11[%c0_97, %c0_98] : memref<16x128xf32, #tpu.memory_space<vmem>>, vector<16x128xf32>
    tpu.vector_store %arg11[%c0_97, %c0_98], %114 {strides = array<i32>} : memref<16x128xf32, #tpu.memory_space<vmem>>, vector<16x128xf32>,
    %c0_99 = arith.constant 0 : index
    %c0_100 = arith.constant 0 : index
    %116 = vector.load %arg11[%c0_99, %c0_100] : memref<16x128xf32, #tpu.memory_space<vmem>>, vector<16x128xf32>
    %c0_101 = arith.constant 0 : index
    %c0_102 = arith.constant 0 : index
    %117 = vector.load %arg4[%c0_101, %c0_102] : memref<1x128xf32, #tpu.memory_space<vmem>>, vector<1x128xf32>
    %118 = vector.broadcast %117 : vector<1x128xf32> to vector<16x128xf32>
    %119 = arith.addf %116, %118 : vector<16x128xf32>
    %cst_103 = arith.constant 0.000000e+00 : f32
    %120 = vector.broadcast %cst_103 : f32 to vector<16x128xf32>
    %121 = arith.maximumf %119, %120 : vector<16x128xf32>
    %122 = arith.truncf %121 : vector<16x128xf32> to vector<16x128xbf16>
    %c0_104 = arith.constant 0 : index
    %c0_105 = arith.constant 0 : index
    %123 = vector.load %arg5[%c0_104, %c0_105] : memref<128x128xbf16, #tpu.memory_space<vmem>>, vector<128x128xbf16>
    %cst_106 = arith.constant dense<0.000000e+00> : vector<16x128xf32>
    %124 = tpu.matmul %122, %123, %cst_106 {dimension_numbers = #tpu.dot_dimension_numbers<[1], [0], [0], [1], [0, 0, 1, 1], [], []>} : vector<16x128xbf16>, vector<128x128xbf16>, vector<16x128xf32> -> vector<16x128xf32>
    %c0_107 = arith.constant 0 : index
    %c0_108 = arith.constant 0 : index
    %125 = vector.load %arg6[%c0_107, %c0_108] : memref<1x128xf32, #tpu.memory_space<vmem>>, vector<1x128xf32>
    %126 = vector.broadcast %125 : vector<1x128xf32> to vector<16x128xf32>
    %127 = arith.addf %124, %126 : vector<16x128xf32>
    %c0_109 = arith.constant 0 : index
    %c5_110 = arith.constant 5 : index
    %c0_111 = arith.constant 0 : index
    %128 = vector.load %arg1[%c0_109, %c5_110, %c0_111] : memref<1x26x128xf32, #tpu.memory_space<vmem>>, vector<1x16x128xf32>
    %129 = vector.shape_cast %128 : vector<1x16x128xf32> to vector<16x128xf32>
    %130 = arith.addf %127, %129 : vector<16x128xf32>
    %131 = arith.truncf %130 : vector<16x128xf32> to vector<16x128xbf16>
    %c0_112 = arith.constant 0 : index
    %c0_113 = arith.constant 0 : index
    %132 = vector.load %arg7[%c0_112, %c0_113] : memref<128x128xbf16, #tpu.memory_space<vmem>>, vector<128x128xbf16>
    %cst_114 = arith.constant dense<0.000000e+00> : vector<16x128xf32>
    %133 = tpu.matmul %131, %132, %cst_114 {dimension_numbers = #tpu.dot_dimension_numbers<[1], [0], [0], [1], [0, 0, 1, 1], [], []>} : vector<16x128xbf16>, vector<128x128xbf16>, vector<16x128xf32> -> vector<16x128xf32>
    %c0_115 = arith.constant 0 : index
    %c0_116 = arith.constant 0 : index
    %134 = vector.load %arg8[%c0_115, %c0_116] : memref<1x128xf32, #tpu.memory_space<vmem>>, vector<1x128xf32>
    %135 = vector.broadcast %134 : vector<1x128xf32> to vector<16x128xf32>
    %136 = arith.addf %133, %135 : vector<16x128xf32>
    %c0_117 = arith.constant 0 : index
    %c0_118 = arith.constant 0 : index
    %c0_119 = arith.constant 0 : index
    %137 = vector.load %arg9[%c0_117, %c0_118, %c0_119] : memref<1x16x128xf32, #tpu.memory_space<vmem>>, vector<1x16x128xf32>
    %138 = vector.shape_cast %137 : vector<1x16x128xf32> to vector<16x128xf32>
    %139 = vector.shape_cast %136 : vector<16x128xf32> to vector<1x16x128xf32>
    tpu.vector_store %arg9[%c0_117, %c0_118, %c0_119], %139 {strides = array<i32>} : memref<1x16x128xf32, #tpu.memory_space<vmem>>, vector<1x16x128xf32>,
    return
  }
  func.func @transform_0(%arg0: i32) -> (i32, i32, i32) {
    %c0_i32 = arith.constant 0 : i32
    %c0_i32_0 = arith.constant 0 : i32
    %c0_i32_1 = arith.constant 0 : i32
    return %arg0, %c0_i32, %c0_i32_0 : i32, i32, i32
  }
  func.func @transform_1(%arg0: i32) -> (i32, i32) {
    %c0_i32 = arith.constant 0 : i32
    %c0_i32_0 = arith.constant 0 : i32
    %c0_i32_1 = arith.constant 0 : i32
    return %c0_i32, %c0_i32_0 : i32, i32
  }
  func.func @transform_2(%arg0: i32) -> (i32, i32, i32) {
    %c0_i32 = arith.constant 0 : i32
    %c0_i32_0 = arith.constant 0 : i32
    %c0_i32_1 = arith.constant 0 : i32
    %c0_i32_2 = arith.constant 0 : i32
    return %c0_i32, %c0_i32_0, %c0_i32_1 : i32, i32, i32
  }
  func.func @transform_3(%arg0: i32) -> (i32, i32) {
    %c0_i32 = arith.constant 0 : i32
    %c0_i32_0 = arith.constant 0 : i32
    %c0_i32_1 = arith.constant 0 : i32
    return %c0_i32, %c0_i32_0 : i32, i32
  }
  func.func @transform_4(%arg0: i32) -> (i32, i32) {
    %c0_i32 = arith.constant 0 : i32
    %c0_i32_0 = arith.constant 0 : i32
    %c0_i32_1 = arith.constant 0 : i32
    return %c0_i32, %c0_i32_0 : i32, i32
  }
  func.func @transform_5(%arg0: i32) -> (i32, i32) {
    %c0_i32 = arith.constant 0 : i32
    %c0_i32_0 = arith.constant 0 : i32
    %c0_i32_1 = arith.constant 0 : i32
    return %c0_i32, %c0_i32_0 : i32, i32
  }
  func.func @transform_6(%arg0: i32) -> (i32, i32) {
    %c0_i32 = arith.constant 0 : i32
    %c0_i32_0 = arith.constant 0 : i32
    %c0_i32_1 = arith.constant 0 : i32
    return %c0_i32, %c0_i32_0 : i32, i32
  }
  func.func @transform_7(%arg0: i32) -> (i32, i32) {
    %c0_i32 = arith.constant 0 : i32
    %c0_i32_0 = arith.constant 0 : i32
    %c0_i32_1 = arith.constant 0 : i32
    return %c0_i32, %c0_i32_0 : i32, i32
  }
  func.func @transform_8(%arg0: i32) -> (i32, i32, i32) {
    %c0_i32 = arith.constant 0 : i32
    %c0_i32_0 = arith.constant 0 : i32
    %c0_i32_1 = arith.constant 0 : i32
    return %arg0, %c0_i32, %c0_i32_0 : i32, i32, i32
  }
}

</mosaic_0001>

<bundles_post_ra>
// kernel: encoder_forward.4
= control target key start
LH: loop header
LB: loop body
LE: loop exit
PB: predicated region body
PF: predicated region fallthrough
CT: control target
= control target key end

     0   :  { %s570_s1 = inlined_call_operand.vmem [shape: bf16[128,128], index: 1, kind: input, shape index: {}]   ;;  %s571_s0 = inlined_call_operand.vmem [shape: f32[128,128], index: 0, kind: input, shape index: {}]   ;;  %s572_s2 = inlined_call_operand.vmem [shape: f32[1,128], index: 2, kind: input, shape index: {}]   ;;  %s573_s3 = inlined_call_operand.vmem [shape: f32[128,128], index: 3, kind: output, shape index: {}]  }
   0x1   :  { %v419_v0 = vld [vmem:[%s570_s1] sm:$0xff]   ;;  %v420_v1 = vld [vmem:[%s570_s1 + $0x8] sm:$0xff]   ;;  %v421_v2 = vld [vmem:[%s570_s1 + $0x10] sm:$0xff]  }
   0x2   :  { %371 = vmatprep.subr.bf16.mxu0 %v419_v0  ;;  %403 = vmatprep.subr.bf16.mxu1 %v419_v0  ;;  %v422_v3 = vld [vmem:[%s570_s1 + $0x18] sm:$0xff]   ;;  %v51_v4 = vld [vmem:[%s571_s0] sm:$0xff]  ;;  %v52_v5 = vld [vmem:[%s571_s0 + $0x8] sm:$0xff] }
   0x3   :  { %372 = vmatpush3.bf16.msra.mxu0 %v419_v0  ;;  %411 = vmatpush3.bf16.msra.mxu1 %v419_v0  ;;  %v59_v6 = vld [vmem:[%s571_s0 + $0x40] sm:$0xff]  ;;  %v67_v7 = vpack.c.bf16 %v52_v5, %v51_v4  ;;  %v60_v8 = vld [vmem:[%s571_s0 + $0x48] sm:$0xff]  ;;  %v425_v12 = vld [vmem:[%s570_s1 + $0x30] sm:$0xff]  }
   0x4   :  { %373 = vmatprep.subr.bf16.mxu0 %v420_v1  ;;  %404 = vmatprep.subr.bf16.mxu1 %v420_v1  ;;  %v71_v9 = vpack.c.bf16 %v60_v8, %v59_v6  ;;  %v423_v10 = vld [vmem:[%s570_s1 + $0x20] sm:$0xff]   ;;  %v424_v11 = vld [vmem:[%s570_s1 + $0x28] sm:$0xff]   ;;  %v426_v13 = vld [vmem:[%s570_s1 + $0x38] sm:$0xff]  }
   0x5   :  { %387 = vmatprep.mubr.bf16.mxu0 %v67_v7  ;;  %v53_v14 = vld [vmem:[%s571_s0 + $0x10] sm:$0xff]  ;;  %v54_v15 = vld [vmem:[%s571_s0 + $0x18] sm:$0xff]  ;;  %v55_v18 = vld [vmem:[%s571_s0 + $0x20] sm:$0xff] }
   0x6   :  { %395 = vmatprep.mubr.bf16.mxu1 %v71_v9  ;;  %v61_v16 = vld [vmem:[%s571_s0 + $0x50] sm:$0xff]  ;;  %v62_v17 = vld [vmem:[%s571_s0 + $0x58] sm:$0xff]  ;;  %v56_v19 = vld [vmem:[%s571_s0 + $0x28] sm:$0xff]  ;;  %v68_v22 = vpack.c.bf16 %v54_v15, %v53_v14 }
   0x7   :  { %374 = vmatpush3.bf16.msra.mxu0 %v420_v1  ;;  %412 = vmatpush3.bf16.msra.mxu1 %v420_v1  ;;  %v63_v20 = vld [vmem:[%s571_s0 + $0x60] sm:$0xff]  ;;  %v64_v21 = vld [vmem:[%s571_s0 + $0x68] sm:$0xff]  ;;  %v72_v23 = vpack.c.bf16 %v62_v17, %v61_v16  ;;  %v69_v24 = vpack.c.bf16 %v56_v19, %v55_v18  ;;  %v57_v26 = vld [vmem:[%s571_s0 + $0x30] sm:$0xff] }
   0x8   :  { %375 = vmatprep.subr.bf16.mxu0 %v421_v2  ;;  %405 = vmatprep.subr.bf16.mxu1 %v421_v2  ;;  %v73_v25 = vpack.c.bf16 %v64_v21, %v63_v20  ;;  %v58_v27 = vld [vmem:[%s571_s0 + $0x38] sm:$0xff]  ;;  %v65_v28 = vld [vmem:[%s571_s0 + $0x70] sm:$0xff]  ;;  %v354_v32 = vld [vmem:[%s572_s2] ss:$0 sm:$0xff] }
   0x9   :  { %v66_v29 = vld [vmem:[%s571_s0 + $0x78] sm:$0xff]  ;;  %v70_v30 = vpack.c.bf16 %v58_v27, %v57_v26 }
   0xa   :  { %v74_v31 = vpack.c.bf16 %v66_v29, %v65_v28 }
   0xb   :  { %376 = vmatpush3.bf16.msra.mxu0 %v421_v2  ;;  %413 = vmatpush3.bf16.msra.mxu1 %v421_v2 }
   0xc   :  { %377 = vmatprep.subr.bf16.mxu0 %v422_v3  ;;  %406 = vmatprep.subr.bf16.mxu1 %v422_v3 }
   0xf   :  { %378 = vmatpush3.bf16.msra.mxu0 %v422_v3  ;;  %414 = vmatpush3.bf16.msra.mxu1 %v422_v3 }
  0x10   :  { %379 = vmatprep.subr.bf16.mxu0 %v423_v10  ;;  %407 = vmatprep.subr.bf16.mxu1 %v423_v10 }
  0x13   :  { %380 = vmatpush3.bf16.msra.mxu0 %v423_v10  ;;  %415 = vmatpush3.bf16.msra.mxu1 %v423_v10 }
  0x14   :  { %381 = vmatprep.subr.bf16.mxu0 %v424_v11  ;;  %408 = vmatprep.subr.bf16.mxu1 %v424_v11 }
  0x17   :  { %382 = vmatpush3.bf16.msra.mxu0 %v424_v11  ;;  %416 = vmatpush3.bf16.msra.mxu1 %v424_v11 }
  0x18   :  { %383 = vmatprep.subr.bf16.mxu0 %v425_v12  ;;  %409 = vmatprep.subr.bf16.mxu1 %v425_v12 }
  0x1b   :  { %384 = vmatpush3.bf16.msra.mxu0 %v425_v12  ;;  %417 = vmatpush3.bf16.msra.mxu1 %v425_v12 }
  0x1c   :  { %385 = vmatprep.subr.bf16.mxu0 %v426_v13  ;;  %410 = vmatprep.subr.bf16.mxu1 %v426_v13 }
  0x1f   :  { %386 = vmatpush3.bf16.msra.mxu0 %v426_v13  ;;  %418 = vmatpush3.bf16.msra.mxu1 %v426_v13 }
  0x22   :  { %388 = vmatmul.mubr.bf16.vlgmr.msra.gmra.mrb[0].mxu0 %v68_v22  ;;  %396 = vmatmul.mubr.bf16.vlgmr.msra.gmra.mrb[0].mxu1 %v72_v23 }
  0x23   :  { %391 = vmatprep.mubr.bf16.mxu0 %v69_v24  ;;  %399 = vmatprep.mubr.bf16.mxu1 %v73_v25 }
  0x2a   :  { %392 = vmatmul.mubr.bf16.gmra.mrb[4].mxu0 %v70_v30  ;;  %400 = vmatmul.mubr.bf16.gmra.mrb[4].mxu1 %v74_v31 }
  0xf5   :  { %v389_v33 = vpop.f32.mrb[0].mxu0  ;;  %v397_v34 = vpop.f32.mrb[0].mxu1 }
  0xf6   :  { %v296_v35 = vadd.f32 %v389_v33, %v354_v32  ;;  %v304_v36 = vadd.f32 %v397_v34, %v354_v32  ;;  %v173_v37 = vpop.f32.mrb[1].mxu0  ;;  %v205_v38 = vpop.f32.mrb[1].mxu1 }
  0xf7   :  { %v294_v39 = vadd.f32 %v354_v32, %v173_v37  ;;  %v302_v40 = vadd.f32 %v354_v32, %v205_v38  ;;  %v390_v41 = vpop.f32.mrb[2].mxu0  ;;  %v398_v42 = vpop.f32.mrb[2].mxu1 }
  0xf8   :  { %v312_v43 = vmax.f32 %v296_v35, 0.0  ;;  %v320_v44 = vmax.f32 %v304_v36, 0.0  ;;  %v297_v45 = vadd.f32 %v390_v41, %v354_v32  ;;  %v305_v46 = vadd.f32 %v398_v42, %v354_v32  ;;  %v176_v47 = vpop.f32.mrb[3].mxu0  ;;  %v208_v48 = vpop.f32.mrb[3].mxu1 }
  0xf9   :  { %v310_v49 = vmax.f32 %v294_v39, 0.0  ;;  %v318_v50 = vmax.f32 %v302_v40, 0.0  ;;  %v295_v51 = vadd.f32 %v354_v32, %v176_v47  ;;  %v303_v52 = vadd.f32 %v354_v32, %v208_v48 }
  0xfa   :  { %328 = vst [vmem:[%s573_s3 + $0x10] sm:$0xff] %v312_v43  ;;  %336 = vst [vmem:[%s573_s3 + $0x50] sm:$0xff] %v320_v44  ;;  %v313_v53 = vmax.f32 %v297_v45, 0.0  ;;  %v321_v54 = vmax.f32 %v305_v46, 0.0 }
  0xfb   :  { %326 = vst [vmem:[%s573_s3] sm:$0xff] %v310_v49  ;;  %334 = vst [vmem:[%s573_s3 + $0x40] sm:$0xff] %v318_v50  ;;  %v311_v55 = vmax.f32 %v295_v51, 0.0  ;;  %v319_v56 = vmax.f32 %v303_v52, 0.0 }
  0xfc   :  { %329 = vst [vmem:[%s573_s3 + $0x18] sm:$0xff] %v313_v53  ;;  %337 = vst [vmem:[%s573_s3 + $0x58] sm:$0xff] %v321_v54 }
  0xfd   :  { %327 = vst [vmem:[%s573_s3 + $0x8] sm:$0xff] %v311_v55  ;;  %335 = vst [vmem:[%s573_s3 + $0x48] sm:$0xff] %v319_v56  ;;  %v393_v57 = vpop.f32.mrb[4].mxu0  ;;  %v401_v58 = vpop.f32.mrb[4].mxu1 }
  0xfe   :  { %v300_v59 = vadd.f32 %v393_v57, %v354_v32  ;;  %v308_v60 = vadd.f32 %v401_v58, %v354_v32  ;;  %v189_v61 = vpop.f32.mrb[5].mxu0  ;;  %v221_v62 = vpop.f32.mrb[5].mxu1 }
  0xff   :  { %v298_v63 = vadd.f32 %v354_v32, %v189_v61  ;;  %v306_v0 = vadd.f32 %v354_v32, %v221_v62  ;;  %v394_v1 = vpop.f32.mrb[6].mxu0  ;;  %v402_v2 = vpop.f32.mrb[6].mxu1 }
 0x100   :  { %v316_v3 = vmax.f32 %v300_v59, 0.0  ;;  %v324_v4 = vmax.f32 %v308_v60, 0.0  ;;  %v301_v5 = vadd.f32 %v394_v1, %v354_v32  ;;  %v309_v6 = vadd.f32 %v402_v2, %v354_v32  ;;  %v192_v7 = vpop.f32.mrb[7].mxu0  ;;  %v224_v8 = vpop.f32.mrb[7].mxu1 }
 0x101   :  { %v314_v9 = vmax.f32 %v298_v63, 0.0  ;;  %v322_v10 = vmax.f32 %v306_v0, 0.0  ;;  %v299_v11 = vadd.f32 %v354_v32, %v192_v7  ;;  %v307_v12 = vadd.f32 %v354_v32, %v224_v8 }
 0x102   :  { %332 = vst [vmem:[%s573_s3 + $0x30] sm:$0xff] %v316_v3  ;;  %340 = vst [vmem:[%s573_s3 + $0x70] sm:$0xff] %v324_v4  ;;  %v317_v13 = vmax.f32 %v301_v5, 0.0  ;;  %v325_v14 = vmax.f32 %v309_v6, 0.0 }
 0x103   :  { %330 = vst [vmem:[%s573_s3 + $0x20] sm:$0xff] %v314_v9  ;;  %338 = vst [vmem:[%s573_s3 + $0x60] sm:$0xff] %v322_v10  ;;  %v315_v15 = vmax.f32 %v299_v11, 0.0  ;;  %v323_v16 = vmax.f32 %v307_v12, 0.0 }
 0x104   :  { %333 = vst [vmem:[%s573_s3 + $0x38] sm:$0xff] %v317_v13  ;;  %341 = vst [vmem:[%s573_s3 + $0x78] sm:$0xff] %v325_v14 }
 0x105   :  { %331 = vst [vmem:[%s573_s3 + $0x28] sm:$0xff] %v315_v15  ;;  %339 = vst [vmem:[%s573_s3 + $0x68] sm:$0xff] %v323_v16 }

// kernel: encoder_forward.5
= control target key start
LH: loop header
LB: loop body
LE: loop exit
PB: predicated region body
PF: predicated region fallthrough
CT: control target
= control target key end

     0   :  { %s1081_s12 = smov 0   ;;  %s1083_s13 = smov 0   ;;  %s1233_s0 = inlined_call_operand.vmem [shape: f32[32,2048], index: 0, kind: input, shape index: {}]   ;;  %s1234_s1 = inlined_call_operand.vmem [shape: bf16[2048,128], index: 1, kind: input, shape index: {}]   ;;  %s1235_s2 = inlined_call_operand.vmem [shape: f32[1,128], index: 2, kind: input, shape index: {}]   ;;  %s1236_s3 = inlined_call_operand.vmem [shape: f32[32,128], index: 3, kind: output, shape index: {}]  }
   0x1   :  { %s1085_s14 = smov 0   ;;  %s1087_s15 = smov 0  }
   0x2   :  { %s1089_s16 = smov 0  }
   0x3 LB: > { %s25_s17 = sadd.s32 1, %s1054_s15  ;;  %p48_p1 = scmp.ne.s32.totalorder %s1046_s13, %s1042_s12  ;;  %s1058_s16 = sphi %s1089_s16, %s13_s16   ;;  %s1054_s15 = sphi %s1087_s15, %s1240_s15   ;;  %s1050_s14 = sphi %s1085_s14, %s1239_s14   ;;  %s1046_s13 = sphi %s1083_s13, %s1238_s13   ;;  %s1042_s12 = sphi %s1081_s12, %s1237_s12  }
   0x4   : > { %p26_p0 = scmp.ge.s32.totalorder %s25_s17, 4  ;;  %p49_p2 = scmp.eq.s32.totalorder %s1058_s16, 0 }
   0x5   : > { %s41_s19 = sadd.s32 1, %s1046_s13  ;;  %p843_p5 = scmp.ge.s32.totalorder %s1058_s16, 4 }
   0x6   : > { %s1242_s17 = smov (%p26_p0, %s25_s17), 0  ;;  %p50_p3 = por %p49_p2, %p48_p1 }
   0x7   : > { %s37_s18 = ssub.s32 %s1054_s15, %s1242_s17  ;;  %162 = sbr.rel (%p843_p5) target bundleno = 26 (0x1a), region = 20 }
   0x8   : > { %p39_p4 = scmp.eq.s32.totalorder %s37_s18, 0 }
   0xa   : > { %s1116_s20 = scalar_select %p39_p4, %s1046_s13, %s41_s19  }
   0xe   : > { %165 = sbr.rel (!%p50_p3) target bundleno = 26 (0x1a), region = 24  ;;  %s167_s21 = sand.u32 (%p50_p3), 1, %s1046_s13  }
   0xf   : > { %s890_s22 = sshll.u32 (%p50_p3), %s1054_s15, 5  ;;  %s844_s23 = sshll.u32 (%p50_p3), %s167_s21, 7 }
  0x10   : > { %s1124_s26 = scalar_lea.vmem (%p50_p3), %s1233_s0, %s890_s22  ;;  %s169_s27 = scalar_lea.vmem (%p50_p3), [#allocation3], %s844_s23 }
  0x11   : > { %v188_v0 = vld [vmem:[%s1124_s26] sm:$0xff] (%p50_p3)  ;;  %v190_v1 = vld [vmem:[%s1124_s26 + $0x8] sm:$0xff] (%p50_p3)  ;;  %v192_v2 = vld [vmem:[%s1124_s26 + $0x10] sm:$0xff] (%p50_p3) }
  0x12   : > { %189 = vst [vmem:[%s169_s27] sm:$0xff] (%p50_p3), %v188_v0  ;;  %191 = vst [vmem:[%s169_s27 + $0x8] sm:$0xff] (%p50_p3), %v190_v1  ;;  %v194_v3 = vld [vmem:[%s1124_s26 + $0x18] sm:$0xff] (%p50_p3)  ;;  %v196_v4 = vld [vmem:[%s1124_s26 + $0x80] sm:$0xff] (%p50_p3) }
  0x13   : > { %193 = vst [vmem:[%s169_s27 + $0x10] sm:$0xff] (%p50_p3), %v192_v2  ;;  %v198_v5 = vld [vmem:[%s1124_s26 + $0x88] sm:$0xff] (%p50_p3)  ;;  %195 = vst [vmem:[%s169_s27 + $0x18] sm:$0xff] (%p50_p3), %v194_v3  ;;  %v200_v6 = vld [vmem:[%s1124_s26 + $0x90] sm:$0xff] (%p50_p3) }
  0x14   : > { %197 = vst [vmem:[%s169_s27 + $0x20] sm:$0xff] (%p50_p3), %v196_v4  ;;  %199 = vst [vmem:[%s169_s27 + $0x28] sm:$0xff] (%p50_p3), %v198_v5  ;;  %v202_v7 = vld [vmem:[%s1124_s26 + $0x98] sm:$0xff] (%p50_p3)  ;;  %v204_v8 = vld [vmem:[%s1124_s26 + $0x100] sm:$0xff] (%p50_p3) }
  0x15   : > { %201 = vst [vmem:[%s169_s27 + $0x30] sm:$0xff] %v200_v6  ;;  %203 = vst [vmem:[%s169_s27 + $0x38] sm:$0xff] %v202_v7  ;;  %v206_v9 = vld [vmem:[%s1124_s26 + $0x108] sm:$0xff]  ;;  %v208_v10 = vld [vmem:[%s1124_s26 + $0x110] sm:$0xff] }
  0x16   : > { %205 = vst [vmem:[%s169_s27 + $0x40] sm:$0xff] %v204_v8  ;;  %v210_v11 = vld [vmem:[%s1124_s26 + $0x118] sm:$0xff]  ;;  %207 = vst [vmem:[%s169_s27 + $0x48] sm:$0xff] %v206_v9  ;;  %v212_v12 = vld [vmem:[%s1124_s26 + $0x180] sm:$0xff] }
  0x17   : > { %209 = vst [vmem:[%s169_s27 + $0x50] sm:$0xff] %v208_v10  ;;  %211 = vst [vmem:[%s169_s27 + $0x58] sm:$0xff] %v210_v11  ;;  %v214_v13 = vld [vmem:[%s1124_s26 + $0x188] sm:$0xff]  ;;  %v216_v14 = vld [vmem:[%s1124_s26 + $0x190] sm:$0xff] }
  0x18   : > { %213 = vst [vmem:[%s169_s27 + $0x60] sm:$0xff] %v212_v12  ;;  %215 = vst [vmem:[%s169_s27 + $0x68] sm:$0xff] %v214_v13  ;;  %v218_v15 = vld [vmem:[%s1124_s26 + $0x198] sm:$0xff] }
  0x19   : > { %217 = vst [vmem:[%s169_s27 + $0x70] sm:$0xff] %v216_v14  ;;  %219 = vst [vmem:[%s169_s27 + $0x78] sm:$0xff] %v218_v15 }
  0x1a PF: > { %p847_p6 = scmp.ge.s32.totalorder %s1058_s16, 1  ;;  %p236_p7 = scmp.lt.s32.totalorder %s1058_s16, 5 }
  0x1c   : > { %p237_p8 = pnand %p847_p6, %p236_p7 }
  0x1d   : > { %s243_s28 = sand.u32 (!%p237_p8), 1, %s1042_s12   ;;  %s849_s29 = sshll.u32 (!%p237_p8), %s1050_s14, 6 }
  0x1e   : > { %240 = sbr.rel (%p237_p8) target bundleno = 321 (0x141), region = 51  ;;  %s848_s30 = sshll.u32 (!%p237_p8), %s243_s28, 7 }
  0x1f   : > { %p283_p9 = scmp.lt.s32.totalorder (!%p237_p8), %s849_s29, 255  ;;  %s1151_s8 = scalar_lea.vmem (!%p237_p8), [#allocation3], %s848_s30 }
  0x20   : > { %p851_p10 = scmp.ne.s32.totalorder (!%p237_p8), %s1050_s14, 0 }
  0x25   : > { %s1244_s29 = smov (!%p283_p9, %s849_s29), 255  ;;  %307 = sbr.rel (%p851_p10) target bundleno = 44 (0x2c), region = 59 }
  0x26   : > { %s850_s4 = sshll.u32 %s1244_s29, 2  ;;  %v1060_v16 = vmov (!%p851_p10), 0.0  }
  0x27   : > { %s1149_s7 = scalar_lea.vmem %s1234_s1, %s850_s4  ;;  %308 = vst [vmem:[#allocation2] sm:$0xff] (!%p851_p10), %v1060_v16  ;;  %309 = vst [vmem:[#allocation2 + $0x8] sm:$0xff] (!%p851_p10), %v1060_v16 }
  0x28   : > { %310 = vst [vmem:[#allocation2 + $0x10] sm:$0xff] (!%p851_p10), %v1060_v16  ;;  %311 = vst [vmem:[#allocation2 + $0x18] sm:$0xff] (!%p851_p10), %v1060_v16 }
  0x2c PF: > { %v988_v17 = vld [vmem:[%s1149_s7 + $0x40] sm:$0xff]   ;;  %v992_v21 = vld [vmem:[%s1149_s7 + $0x48] sm:$0xff]   ;;  %v996_v25 = vld [vmem:[%s1149_s7 + $0x50] sm:$0xff]   ;;  %p884_p11 = scmp.ne.s32.totalorder %s1050_s14, 3 }
  0x2d   : > { %v989_v18 = vld [vmem:[%s1149_s7 + $0xc0] sm:$0xff]   ;;  %891 = vmatprep.subr.bf16.mxu0 %v988_v17  ;;  %v993_v22 = vld [vmem:[%s1149_s7 + $0xc8] sm:$0xff]   ;;  %v997_v26 = vld [vmem:[%s1149_s7 + $0xd0] sm:$0xff]  }
  0x2e   : > { %v990_v19 = vld [vmem:[%s1149_s7] sm:$0xff]   ;;  %919 = vmatprep.subr.bf16.mxu1 %v989_v18  ;;  %v994_v23 = vld [vmem:[%s1149_s7 + $0x8] sm:$0xff]   ;;  %v998_v27 = vld [vmem:[%s1149_s7 + $0x10] sm:$0xff]  }
  0x2f   : > { %v991_v20 = vld [vmem:[%s1149_s7 + $0x80] sm:$0xff]   ;;  %892 = vmatpush3.bf16.msra.mxu0 %v990_v19  ;;  %v995_v24 = vld [vmem:[%s1149_s7 + $0x88] sm:$0xff]   ;;  %v999_v28 = vld [vmem:[%s1149_s7 + $0x90] sm:$0xff]  }
  0x30   : > { %920 = vmatpush3.bf16.msra.mxu1 %v991_v20  ;;  %893 = vmatprep.subr.bf16.mxu0 %v992_v21  ;;  %v1000_v29 = vld [vmem:[%s1149_s7 + $0x58] sm:$0xff]   ;;  %v1004_v33 = vld [vmem:[%s1149_s7 + $0x60] sm:$0xff]   ;;  %v1008_v37 = vld [vmem:[%s1149_s7 + $0x68] sm:$0xff]  }
  0x31   : > { %921 = vmatprep.subr.bf16.mxu1 %v993_v22  ;;  %v1001_v30 = vld [vmem:[%s1149_s7 + $0xd8] sm:$0xff]   ;;  %v1005_v34 = vld [vmem:[%s1149_s7 + $0xe0] sm:$0xff]   ;;  %v1009_v38 = vld [vmem:[%s1149_s7 + $0xe8] sm:$0xff]  }
  0x32   : > { %v1002_v31 = vld [vmem:[%s1149_s7 + $0x18] sm:$0xff]   ;;  %v1006_v35 = vld [vmem:[%s1149_s7 + $0x20] sm:$0xff]   ;;  %v1010_v39 = vld [vmem:[%s1149_s7 + $0x28] sm:$0xff]  }
  0x33   : > { %894 = vmatpush3.bf16.msra.mxu0 %v994_v23  ;;  %v1003_v32 = vld [vmem:[%s1149_s7 + $0x98] sm:$0xff]   ;;  %v1007_v36 = vld [vmem:[%s1149_s7 + $0xa0] sm:$0xff]   ;;  %v1011_v40 = vld [vmem:[%s1149_s7 + $0xa8] sm:$0xff]  }
  0x34   : > { %922 = vmatpush3.bf16.msra.mxu1 %v995_v24  ;;  %895 = vmatprep.subr.bf16.mxu0 %v996_v25  ;;  %v1012_v41 = vld [vmem:[%s1149_s7 + $0x70] sm:$0xff]   ;;  %v1016_v45 = vld [vmem:[%s1149_s7 + $0x78] sm:$0xff]   ;;  %v317_v49 = vld [vmem:[%s1151_s8 + $0x8] sm:$0xff] }
  0x35   : > { %923 = vmatprep.subr.bf16.mxu1 %v997_v26  ;;  %v1013_v42 = vld [vmem:[%s1149_s7 + $0xf0] sm:$0xff]   ;;  %v1017_v46 = vld [vmem:[%s1149_s7 + $0xf8] sm:$0xff]   ;;  %v321_v50 = vld [vmem:[%s1151_s8 + $0x28] sm:$0xff] }
  0x36   : > { %v1014_v43 = vld [vmem:[%s1149_s7 + $0x30] sm:$0xff]   ;;  %v1018_v47 = vld [vmem:[%s1149_s7 + $0x38] sm:$0xff]   ;;  %v333_v52 = vpack.c.bf16 %v321_v50, %v317_v49  ;;  %v316_v54 = vld [vmem:[%s1151_s8] sm:$0xff] }
  0x37   : > { %896 = vmatpush3.bf16.msra.mxu0 %v998_v27  ;;  %v1015_v44 = vld [vmem:[%s1149_s7 + $0xb0] sm:$0xff]   ;;  %v1019_v48 = vld [vmem:[%s1149_s7 + $0xb8] sm:$0xff]   ;;  %v320_v55 = vld [vmem:[%s1151_s8 + $0x20] sm:$0xff] }
  0x38   : > { %924 = vmatpush3.bf16.msra.mxu1 %v999_v28  ;;  %897 = vmatprep.subr.bf16.mxu0 %v1000_v29  ;;  %v319_v51 = vld [vmem:[%s1151_s8 + $0x18] sm:$0xff]  ;;  %v332_v57 = vpack.c.bf16 %v320_v55, %v316_v54  ;;  %v318_v58 = vld [vmem:[%s1151_s8 + $0x10] sm:$0xff]  ;;  %v325_v60 = vld [vmem:[%s1151_s8 + $0x48] sm:$0xff] }
  0x39   : > { %925 = vmatprep.subr.bf16.mxu1 %v1001_v30  ;;  %v323_v53 = vld [vmem:[%s1151_s8 + $0x38] sm:$0xff]  ;;  %v322_v59 = vld [vmem:[%s1151_s8 + $0x30] sm:$0xff]  ;;  %628 = vmatprep.mubr.bf16.mxu0 %v333_v52  ;;  %v329_v62 = vld [vmem:[%s1151_s8 + $0x68] sm:$0xff] }
  0x3a   : > { %v335_v56 = vpack.c.bf16 %v323_v53, %v319_v51  ;;  %v334_v61 = vpack.c.bf16 %v322_v59, %v318_v58  ;;  %v327_v63 = vld [vmem:[%s1151_s8 + $0x58] sm:$0xff]  ;;  %v337_v1 = vpack.c.bf16 %v329_v62, %v325_v60  ;;  %v324_v3 = vld [vmem:[%s1151_s8 + $0x40] sm:$0xff]  ;;  %v326_v5 = vld [vmem:[%s1151_s8 + $0x50] sm:$0xff] }
  0x3b   : > { %898 = vmatpush3.bf16.msra.mxu0 %v1002_v31  ;;  %v331_v0 = vld [vmem:[%s1151_s8 + $0x78] sm:$0xff]  ;;  %v328_v4 = vld [vmem:[%s1151_s8 + $0x60] sm:$0xff]  ;;  %v330_v6 = vld [vmem:[%s1151_s8 + $0x70] sm:$0xff] }
  0x3c   : > { %926 = vmatpush3.bf16.msra.mxu1 %v1003_v32  ;;  %899 = vmatprep.subr.bf16.mxu0 %v1004_v33  ;;  %v339_v2 = vpack.c.bf16 %v331_v0, %v327_v63  ;;  %v336_v7 = vpack.c.bf16 %v328_v4, %v324_v3  ;;  %v338_v8 = vpack.c.bf16 %v330_v6, %v326_v5  ;;  %v312_v18 = vld [vmem:[#allocation2] sm:$0xff]  ;;  %v313_v23 = vld [vmem:[#allocation2 + $0x8] sm:$0xff] }
  0x3d   : > { %927 = vmatprep.subr.bf16.mxu1 %v1005_v34  ;;  %677 = vmatprep.mubr.bf16.mxu1 %v335_v56 }
  0x3f   : > { %900 = vmatpush3.bf16.msra.mxu0 %v1006_v35 }
  0x40   : > { %928 = vmatpush3.bf16.msra.mxu1 %v1007_v36  ;;  %901 = vmatprep.subr.bf16.mxu0 %v1008_v37  ;;  %v314_v36 = vld [vmem:[#allocation2 + $0x10] sm:$0xff] }
  0x41   : > { %929 = vmatprep.subr.bf16.mxu1 %v1009_v38 }
  0x43   : > { %902 = vmatpush3.bf16.msra.mxu0 %v1010_v39 }
  0x44   : > { %930 = vmatpush3.bf16.msra.mxu1 %v1011_v40  ;;  %903 = vmatprep.subr.bf16.mxu0 %v1012_v41  ;;  %v315_v41 = vld [vmem:[#allocation2 + $0x18] sm:$0xff] }
  0x45   : > { %931 = vmatprep.subr.bf16.mxu1 %v1013_v42 }
  0x47   : > { %904 = vmatpush3.bf16.msra.mxu0 %v1014_v43 }
  0x48   : > { %932 = vmatpush3.bf16.msra.mxu1 %v1015_v44  ;;  %905 = vmatprep.subr.bf16.mxu0 %v1016_v45 }
  0x49   : > { %933 = vmatprep.subr.bf16.mxu1 %v1017_v46  ;;  %v885_v46 = vld [vmem:[%s1235_s2] ss:$0 sm:$0xff] (!%p884_p11) }
  0x4b   : > { %906 = vmatpush3.bf16.msra.mxu0 %v1018_v47 }
  0x4c   : > { %934 = vmatpush3.bf16.msra.mxu1 %v1019_v48 }
  0x4e   : > { %629 = vmatmul.mubr.bf16.vlgmr.msra.gmra.mrb[0].mxu0 %v332_v57 }
  0x4f   : > { %678 = vmatmul.mubr.bf16.vlgmr.msra.gmra.mrb[0].mxu1 %v334_v61  ;;  %636 = vmatprep.mubr.bf16.mxu0 %v337_v1 }
  0x50   : > { %685 = vmatprep.mubr.bf16.mxu1 %v339_v2 }
  0x56   : > { %637 = vmatmul.mubr.bf16.gmra.mrb[4].mxu0 %v336_v7 }
  0x57   : > { %686 = vmatmul.mubr.bf16.gmra.mrb[4].mxu1 %v338_v8 }
 0x121   : > { %v907_v9 = vpop.f32.mrb[0].mxu0 }
 0x122   : > { %v935_v10 = vpop.f32.mrb[0].mxu1  ;;  %v908_v11 = vpop.f32.mrb[1].mxu0 }
 0x123   : > { %v909_v12 = vadd.f32 %v908_v11, %v907_v9  ;;  %v936_v13 = vpop.f32.mrb[1].mxu1  ;;  %v910_v14 = vpop.f32.mrb[2].mxu0 }
 0x124   : > { %v937_v15 = vadd.f32 %v936_v13, %v935_v10  ;;  %v938_v16 = vpop.f32.mrb[2].mxu1  ;;  %v911_v17 = vpop.f32.mrb[3].mxu0 }
 0x125   : > { %v912_v19 = vadd.f32 %v911_v17, %v910_v14  ;;  %v939_v20 = vpop.f32.mrb[3].mxu1 }
 0x126   : > { %v680_v21 = vadd.f32 %v937_v15, %v909_v12  ;;  %v940_v22 = vadd.f32 %v939_v20, %v938_v16 }
 0x128   : > { %v694_v24 = vadd.f32 %v680_v21, %v312_v18  ;;  %v683_v25 = vadd.f32 %v940_v22, %v912_v19 }
 0x129   : > { %v913_v26 = vpop.f32.mrb[4].mxu0 }
 0x12a   : > { %698 = vst [vmem:[#allocation2] sm:$0xff] %v694_v24  ;;  %v695_v27 = vadd.f32 %v683_v25, %v313_v23  ;;  %v941_v28 = vpop.f32.mrb[4].mxu1  ;;  %v914_v29 = vpop.f32.mrb[5].mxu0 }
 0x12b   : > { %v915_v30 = vadd.f32 %v914_v29, %v913_v26  ;;  %v942_v31 = vpop.f32.mrb[5].mxu1  ;;  %v916_v32 = vpop.f32.mrb[6].mxu0 }
 0x12c   : > { %699 = vst [vmem:[#allocation2 + $0x8] sm:$0xff] %v695_v27  ;;  %v943_v33 = vadd.f32 %v942_v31, %v941_v28  ;;  %v944_v34 = vpop.f32.mrb[6].mxu1  ;;  %v917_v35 = vpop.f32.mrb[7].mxu0 }
 0x12d   : > { %v918_v37 = vadd.f32 %v917_v35, %v916_v32  ;;  %v945_v38 = vpop.f32.mrb[7].mxu1 }
 0x12e   : > { %v688_v39 = vadd.f32 %v943_v33, %v915_v30  ;;  %v946_v40 = vadd.f32 %v945_v38, %v944_v34  ;;  %705 = sbr.rel (%p884_p11) target bundleno = 321 (0x141), region = 63 }
 0x130   : > { %v696_v42 = vadd.f32 %v688_v39, %v314_v36  ;;  %v691_v43 = vadd.f32 %v946_v40, %v918_v37 }
 0x131   : > { %v706_v45 = vld [vmem:[#allocation2] sm:$0xff] (!%p884_p11) }
 0x132   : > { %700 = vst [vmem:[#allocation2 + $0x10] sm:$0xff] %v696_v42  ;;  %v697_v44 = vadd.f32 %v691_v43, %v315_v41  ;;  %v717_v48 = vadd.f32 (!%p884_p11), %v885_v46, %v706_v45 }
 0x133   : > { %v707_v47 = vld [vmem:[#allocation2 + $0x8] sm:$0xff] (!%p884_p11) }
 0x134   : > { %701 = vst [vmem:[#allocation2 + $0x18] sm:$0xff] %v697_v44  ;;  %v718_v49 = vadd.f32 (!%p884_p11), %v885_v46, %v707_v47  ;;  %v721_v54 = vmax.f32 (!%p884_p11), %v717_v48, 0.0 }
 0x136   : > { %v722_v55 = vmax.f32 %v718_v49, 0.0  ;;  %725 = vst [vmem:[%s1236_s3] sm:$0xff] %v721_v54 }
 0x138   : > { %726 = vst [vmem:[%s1236_s3 + $0x8] sm:$0xff] %v722_v55 }
 0x139   : > { %v708_v50 = vld [vmem:[#allocation2 + $0x10] sm:$0xff] }
 0x13a   : > { %v719_v52 = vadd.f32 %v885_v46, %v708_v50 }
 0x13b   : > { %v709_v51 = vld [vmem:[#allocation2 + $0x18] sm:$0xff] }
 0x13c   : > { %v720_v53 = vadd.f32 %v885_v46, %v709_v51  ;;  %v723_v56 = vmax.f32 %v719_v52, 0.0 }
 0x13e   : > { %v724_v57 = vmax.f32 %v720_v53, 0.0  ;;  %727 = vst [vmem:[%s1236_s3 + $0x10] sm:$0xff] %v723_v56 }
 0x140   : > { %728 = vst [vmem:[%s1236_s3 + $0x18] sm:$0xff] %v724_v57 }
 0x141 PF: > { %s13_s16 = sadd.s32 1, %s1058_s16   ;;  %s1237_s12 = smov %s1046_s13 }
 0x142   : > { %p10_p12 = scmp.ge.s32.totalorder %s13_s16, 6   ;;  %s1238_s13 = smov %s1116_s20 }
 0x143   : > { %s1239_s14 = smov %s1054_s15  ;;  %s1240_s15 = smov %s1242_s17 }
 0x144   :  { %12 = sbr.rel (!%p10_p12) target bundleno = 3 (0x3), region = 104 }

// kernel: encoder_forward.6
= control target key start
LH: loop header
LB: loop body
LE: loop exit
PB: predicated region body
PF: predicated region fallthrough
CT: control target
= control target key end

     0   :  { %s2198_s21 = smov 0   ;;  %s2640_s0 = inlined_call_operand.vmem [shape: f32[2,26,128], index: 0, kind: input, shape index: {}]   ;;  %s2641_s1 = inlined_call_operand.vmem [shape: s32[16,1], index: 1, kind: input, shape index: {}]   ;;  %s2642_s2 = inlined_call_operand.vmem [shape: bf16[9,128,128], index: 2, kind: input, shape index: {}]   ;;  %s2643_s3 = inlined_call_operand.vmem [shape: f32[1,128], index: 3, kind: input, shape index: {}]   ;;  %s2644_s4 = inlined_call_operand.vmem [shape: bf16[128,128], index: 4, kind: input, shape index: {}]   ;;  %s2645_s5 = inlined_call_operand.vmem [shape: f32[1,128], index: 5, kind: input, shape index: {}]   ;;  %s2646_s6 = inlined_call_operand.vmem [shape: f32[2,16,128], index: 6, kind: output, shape index: {}]  }
   0x1 LB: > { %s1538_s22 = sadd.s32 4294967295, %s2158_s21   ;;  %p1542_p0 = scmp.ge.s32.totalorder %s2158_s21, 1  ;;  %s2158_s21 = sphi %s2198_s21, %s16_s21  }
   0x2   : > { %p212_p1 = scmp.lt.s32.totalorder %s2158_s21, 3 }
   0x4   : > { %p213_p2 = pnand %p1542_p0, %p212_p1 }
   0x5   : > { %v269_v0 = vld [vmem:[%s2641_s1] sm:$0xff] (!%p213_p2)  ;;  %v270_v1 = vld [vmem:[%s2641_s1 + $0x8] sm:$0xff] (!%p213_p2)  ;;  %v2160_v2 = vmov (!%p213_p2), 0   ;;  %v2161_v7 = vmov (!%p213_p2), 0.0   ;;  %vm2162_vm4 = vmmov (!%p213_p2), 0   ;;  %p242_p3 = scmp.lt.s32.totalorder (!%p213_p2), %s1538_s22, 1 }
   0x6   : > { %216 = sbr.rel (%p213_p2) target bundleno = 715 (0x2cb), region = 44  ;;  %2070 = vset.pattern.permute.xlu0 (!%p213_p2), %v2160_v2  ;;  %vm274_vm0 = vcmp.ne.s32.totalorder (!%p213_p2), %v269_v0, 0  ;;  %vm275_vm1 = vcmp.ne.s32.totalorder (!%p213_p2), %v270_v1, 0  ;;  %2071 = vset.pattern.permute.xlu1 (!%p213_p2), %v2160_v2  ;;  %vm524_vm2 = vcmp.ne.s32.totalorder (!%p213_p2), %v269_v0, 3  ;;  %vm525_vm3 = vcmp.ne.s32.totalorder (!%p213_p2), %v270_v1, 3  ;;  %v2072_v8 = vld [vmem:[%s2642_s2 + $0x40] sm:$0xff] (!%p213_p2)  }
   0x7   : > { %v276_v3 = vsel (!%p213_p2), %vm274_vm0, 1, %v2160_v2  ;;  %v277_v4 = vsel (!%p213_p2), %vm275_vm1, 1, %v2160_v2  ;;  %v526_v5 = vsel (!%p213_p2), %vm524_vm2, 1, %v2160_v2  ;;  %v527_v6 = vsel (!%p213_p2), %vm525_vm3, 1, %v2160_v2  ;;  %1879 = vmatprep.subr.bf16.mxu1 (!%p213_p2), %v2161_v7  ;;  %1859 = vmatprep.subr.bf16.mxu0 (!%p213_p2), %v2161_v7  ;;  %v2073_v9 = vld [vmem:[%s2642_s2 + $0x48] sm:$0xff] (!%p213_p2)   ;;  %v2074_v10 = vld [vmem:[%s2642_s2 + $0x50] sm:$0xff] (!%p213_p2)  }
   0x8   : > { %279 = vperm.xlu0 (!%p213_p2), %2070, %v276_v3   ;;  %529 = vperm.xlu1 (!%p213_p2), %2071, %v526_v5   ;;  %v2080_v11 = vld [vmem:[%s2642_s2] sm:$0xff] (!%p213_p2)   ;;  %v2075_v15 = vld [vmem:[%s2642_s2 + $0x58] sm:$0xff] (!%p213_p2)   ;;  %v2082_v19 = vld [vmem:[%s2642_s2 + $0x8] sm:$0xff] (!%p213_p2)  }
   0x9   : > { %1880 = vmatpush3.bf16.msra.mxu1 (!%p213_p2), %v2072_v8  ;;  %1895 = vmatprep.mubr.msk.bf16.mxu1 (!%p213_p2), %vm2162_vm4, %v2161_v7  ;;  %v2076_v20 = vld [vmem:[%s2642_s2 + $0x60] sm:$0xff] (!%p213_p2)   ;;  %v2084_v21 = vld [vmem:[%s2642_s2 + $0x10] sm:$0xff] (!%p213_p2)   ;;  %v2077_v22 = vld [vmem:[%s2642_s2 + $0x68] sm:$0xff] (!%p213_p2)  }
   0xa   : > { %1881 = vmatprep.subr.bf16.mxu1 (!%p213_p2), %v2161_v7  ;;  %1875 = vmatprep.mubr.msk.bf16.mxu0 (!%p213_p2), %vm2162_vm4, %v2161_v7  ;;  %v2086_v23 = vld [vmem:[%s2642_s2 + $0x18] sm:$0xff] (!%p213_p2)   ;;  %v2078_v24 = vld [vmem:[%s2642_s2 + $0x70] sm:$0xff] (!%p213_p2)   ;;  %v2088_v25 = vld [vmem:[%s2642_s2 + $0x20] sm:$0xff] (!%p213_p2)  }
   0xb   : > { %1860 = vmatpush3.bf16.msra.mxu0 (!%p213_p2), %v2080_v11  ;;  %v2079_v26 = vld [vmem:[%s2642_s2 + $0x78] sm:$0xff] (!%p213_p2)   ;;  %v2090_v29 = vld [vmem:[%s2642_s2 + $0x28] sm:$0xff] (!%p213_p2)   ;;  %v2081_v31 = vld [vmem:[%s2642_s2 + $0xc0] sm:$0xff] (!%p213_p2)  }
   0xc   : > { %282 = vperm.xlu0 (!%p213_p2), %2070, %v277_v4   ;;  %532 = vperm.xlu1 (!%p213_p2), %2071, %v527_v6   ;;  %v2092_v32 = vld [vmem:[%s2642_s2 + $0x30] sm:$0xff] (!%p213_p2)   ;;  %v2083_v33 = vld [vmem:[%s2642_s2 + $0xc8] sm:$0xff] (!%p213_p2)   ;;  %v2094_v34 = vld [vmem:[%s2642_s2 + $0x38] sm:$0xff] (!%p213_p2)  }
   0xd   : > { %s2652_s22 = smov (!%p242_p3, %s1538_s22), 1  ;;  %1882 = vmatpush3.bf16.msra.mxu1 %v2073_v9  ;;  %1861 = vmatprep.subr.bf16.mxu0 %v2161_v7  ;;  %v2085_v35 = vld [vmem:[%s2642_s2 + $0xd0] sm:$0xff]   ;;  %v2087_v36 = vld [vmem:[%s2642_s2 + $0xd8] sm:$0xff]   ;;  %v2089_v37 = vld [vmem:[%s2642_s2 + $0xe0] sm:$0xff]  }
   0xe   : > { %1883 = vmatprep.subr.bf16.mxu1 %v2161_v7  ;;  %s1767_s9 = sshll.u32 %s2652_s22, 5  ;;  %v2091_v38 = vld [vmem:[%s2642_s2 + $0xe8] sm:$0xff]   ;;  %v2093_v39 = vld [vmem:[%s2642_s2 + $0xf0] sm:$0xff]   ;;  %v2095_v40 = vld [vmem:[%s2642_s2 + $0xf8] sm:$0xff]   ;;  %s1768_s26 = sshll.u32 %s2652_s22, 4 }
   0xf   : > { %s2248_s14 = scalar_lea.vmem %s2640_s0, %s1767_s9  ;;  %1862 = vmatpush3.bf16.msra.mxu0 %v2082_v19  ;;  %v2096_v52 = vld [vmem:[%s2642_s2 + $0x80] sm:$0xff]   ;;  %v2098_v55 = vld [vmem:[%s2642_s2 + $0x88] sm:$0xff]   ;;  %v2100_v57 = vld [vmem:[%s2642_s2 + $0x90] sm:$0xff]   ;;  %s251_s29 = scalar_lea.vmem %s2646_s6, %s1768_s26 }
  0x10   : > { %v2251_v12 = vld [vmem:[%s2248_s14] sm:$0xff]  ;;  %v256_v13 = vld [vmem:[%s2248_s14 + $0x8] sm:$0xff]  ;;  %v2255_v14 = vld [vmem:[%s2248_s14 + $0x10] sm:$0xff]  ;;  %1863 = vmatprep.subr.bf16.mxu0 %v2161_v7 }
  0x11   : > { %1884 = vmatpush3.bf16.msra.mxu1 %v2074_v10  ;;  %v259_v16 = vmax.f32 %v2251_v12, 0.0  ;;  %v2261_v17 = vmax.f32 %v256_v13, 0.0  ;;  %v261_v18 = vmax.f32 %v2255_v14, 0.0  ;;  %v258_v41 = vld [vmem:[%s2248_s14 + $0x18] sm:$0x3]  ;;  %v2097_v53 = vld [vmem:[%s2642_s2 + $0x140] sm:$0xff]  }
  0x12   : > { %1885 = vmatprep.subr.bf16.mxu1 %v2161_v7  ;;  %v262_v42 = vmax.f32 %v258_v41, 0.0  ;;  %v2099_v56 = vld [vmem:[%s2642_s2 + $0x148] sm:$0xff]   ;;  %v2101_v58 = vld [vmem:[%s2642_s2 + $0x150] sm:$0xff]   ;;  %v2102_v59 = vld [vmem:[%s2642_s2 + $0x98] sm:$0xff]  }
  0x13   : > { %263 = vst [vmem:[#allocation2] sm:$0xff] %v259_v16  ;;  %264 = vst [vmem:[#allocation2 + $0x8] sm:$0xff] %v2261_v17  ;;  %1864 = vmatpush3.bf16.msra.mxu0 %v2084_v21  ;;  %v273_v49 = vpack.c.bf16 %v2261_v17, %v259_v16  ;;  %v2103_v60 = vld [vmem:[%s2642_s2 + $0x158] sm:$0xff]   ;;  %v2104_v62 = vld [vmem:[%s2642_s2 + $0xa0] sm:$0xff]  }
  0x14   : > { %265 = vst [vmem:[#allocation2 + $0x10] sm:$0xff] %v261_v18  ;;  %1865 = vmatprep.subr.bf16.mxu0 %v2161_v7  ;;  %266 = vst [vmem:[#allocation2 + $0x18] sm:$0x3] %v262_v42  ;;  %v2105_v63 = vld [vmem:[%s2642_s2 + $0x160] sm:$0xff]   ;;  %v2106_v1 = vld [vmem:[%s2642_s2 + $0xa8] sm:$0xff]  }
  0x15   : > { %1886 = vmatpush3.bf16.msra.mxu1 %v2075_v15  ;;  %v2107_v3 = vld [vmem:[%s2642_s2 + $0x168] sm:$0xff]   ;;  %v2108_v4 = vld [vmem:[%s2642_s2 + $0xb0] sm:$0xff]   ;;  %v2110_v9 = vld [vmem:[%s2642_s2 + $0xb8] sm:$0xff]  }
  0x16   : > { %1887 = vmatprep.subr.bf16.mxu1 %v2161_v7  ;;  %v2109_v5 = vld [vmem:[%s2642_s2 + $0x170] sm:$0xff]   ;;  %v2111_v10 = vld [vmem:[%s2642_s2 + $0x178] sm:$0xff]   ;;  %v2121_v21 = vld [vmem:[%s2642_s2 + $0x1c0] sm:$0xff]  }
  0x17   : > { %1866 = vmatpush3.bf16.msra.mxu0 %v2086_v23  ;;  %v2113_v23 = vld [vmem:[%s2642_s2 + $0x108] sm:$0xff]   ;;  %v2120_v42 = vld [vmem:[%s2642_s2 + $0x180] sm:$0xff]   ;;  %v2138_v14 = vld [vmem:[%s2642_s2 + $0x210] sm:$0xff]  }
  0x18   : > { %1867 = vmatprep.subr.bf16.mxu0 %v2161_v7 }
  0x19   : > { %1888 = vmatpush3.bf16.msra.mxu1 %v2076_v20  ;;  %v2112_v20 = vld [vmem:[%s2642_s2 + $0x100] sm:$0xff]  }
  0x1a   : > { %1889 = vmatprep.subr.bf16.mxu1 %v2161_v7  ;;  %v406_v27 = vld [vmem:[#allocation2 + $0x1] sm:$0xff] }
  0x1b   : > { %v2301_v28 = vld [vmem:[#allocation2 + $0x9] sm:$0xff]  ;;  %1868 = vmatpush3.bf16.msra.mxu0 %v2088_v25 }
  0x1c   : > { %1869 = vmatprep.subr.bf16.mxu0 %v2161_v7  ;;  %v408_v30 = vpack.c.bf16 %v2301_v28, %v406_v27  ;;  %v657_v45 = vld [vmem:[#allocation2 + $0x4] sm:$0xff]  ;;  %v658_v46 = vld [vmem:[#allocation2 + $0xc] sm:$0xff]  ;;  %v2115_v27 = vld [vmem:[%s2642_s2 + $0x118] sm:$0xff]  }
  0x1d   : > { %1890 = vmatpush3.bf16.msra.mxu1 %v2077_v22  ;;  %v659_v50 = vpack.c.bf16 %v658_v46, %v657_v45  ;;  %v521_v11 = vld [vmem:[#allocation2 + $0x2] sm:$0xff]  ;;  %v2433_v12 = vld [vmem:[#allocation2 + $0xa] sm:$0xff]  ;;  %v2126_v45 = vld [vmem:[%s2642_s2 + $0x198] sm:$0xff]  }
  0x1e   : > { %1891 = vmatprep.subr.bf16.mxu1 %v2161_v7  ;;  %v888_v13 = vld [vmem:[#allocation2 + $0x6] sm:$0xff]  ;;  %v889_v15 = vld [vmem:[#allocation2 + $0xe] sm:$0xff]  ;;  %v523_v16 = vpack.c.bf16 %v2433_v12, %v521_v11 }
  0x1f   : > { %1870 = vmatpush3.bf16.msra.mxu0 %v2090_v29  ;;  %v890_v19 = vpack.c.bf16 %v889_v15, %v888_v13  ;;  %v2114_v25 = vld [vmem:[%s2642_s2 + $0x110] sm:$0xff]   ;;  %v2127_v29 = vld [vmem:[%s2642_s2 + $0x1d8] sm:$0xff]   ;;  %v2128_v46 = vld [vmem:[%s2642_s2 + $0x1a0] sm:$0xff]  }
  0x20   : > { %1871 = vmatprep.subr.bf16.mxu0 %v2161_v7  ;;  %v2150_v13 = vld [vmem:[%s2644_s4 + $0x30] sm:$0xff]  }
  0x21   : > { %1892 = vmatpush3.bf16.msra.mxu1 %v2078_v24  ;;  %v2123_v24 = vld [vmem:[%s2642_s2 + $0x1c8] sm:$0xff]  }
  0x22   : > { %1893 = vmatprep.subr.bf16.mxu1 %v2161_v7 }
  0x23   : > { %1872 = vmatpush3.bf16.msra.mxu0 %v2092_v32  ;;  %v2117_v32 = vld [vmem:[%s2642_s2 + $0x128] sm:$0xff]  }
  0x24   : > { %1873 = vmatprep.subr.bf16.mxu0 %v2161_v7 }
  0x25   : > { %1894 = vmatpush3.bf16.msra.mxu1 %v2079_v26  ;;  %v2125_v26 = vld [vmem:[%s2642_s2 + $0x1d0] sm:$0xff]  }
  0x26   : > { %1919 = vmatprep.subr.bf16.mxu1 %v2161_v7 }
  0x27   : > { %1874 = vmatpush3.bf16.msra.mxu0 %v2094_v34  ;;  %v2118_v34 = vld [vmem:[%s2642_s2 + $0x130] sm:$0xff]  }
  0x28   : > { %1896 = vmatmul.mubr.bf16.vlgmr.msra.gmra.mrb[0].mxu1 %v408_v30  ;;  %1899 = vmatprep.subr.bf16.mxu0 %v2161_v7  ;;  %v2116_v30 = vld [vmem:[%s2642_s2 + $0x120] sm:$0xff]  }
  0x29   : > { %1920 = vmatpush3.bf16.msra.mxu1 %v2081_v31  ;;  %1935 = vmatprep.mubr.msk.bf16.mxu1 %vm2162_vm4, %v2161_v7  ;;  %v2129_v31 = vld [vmem:[%s2642_s2 + $0x1e0] sm:$0xff]  }
  0x2a   : > { %1921 = vmatprep.subr.bf16.mxu1 %v2161_v7 }
  0x2d   : > { %1922 = vmatpush3.bf16.msra.mxu1 %v2083_v33  ;;  %v2131_v33 = vld [vmem:[%s2642_s2 + $0x1e8] sm:$0xff]  }
  0x2e   : > { %1923 = vmatprep.subr.bf16.mxu1 %v2161_v7 }
  0x31   : > { %1924 = vmatpush3.bf16.msra.mxu1 %v2085_v35  ;;  %v2133_v35 = vld [vmem:[%s2642_s2 + $0x1f0] sm:$0xff]  }
  0x32   : > { %1925 = vmatprep.subr.bf16.mxu1 %v2161_v7 }
  0x35   : > { %1926 = vmatpush3.bf16.msra.mxu1 %v2087_v36  ;;  %v2119_v36 = vld [vmem:[%s2642_s2 + $0x138] sm:$0xff]  }
  0x36   : > { %1927 = vmatprep.subr.bf16.mxu1 %v2161_v7 }
  0x39   : > { %1928 = vmatpush3.bf16.msra.mxu1 %v2089_v37  ;;  %v773_v37 = vld [vmem:[#allocation2 + $0x5] sm:$0xff] }
  0x3a   : > { %1929 = vmatprep.subr.bf16.mxu1 %v2161_v7 }
  0x3d   : > { %1930 = vmatpush3.bf16.msra.mxu1 %v2091_v38  ;;  %v774_v38 = vld [vmem:[#allocation2 + $0xd] sm:$0xff] }
  0x3e   : > { %1931 = vmatprep.subr.bf16.mxu1 %v2161_v7  ;;  %v775_v41 = vpack.c.bf16 %v774_v38, %v773_v37 }
  0x41   : > { %1932 = vmatpush3.bf16.msra.mxu1 %v2093_v39  ;;  %v2135_v39 = vld [vmem:[%s2642_s2 + $0x1f8] sm:$0xff]  }
  0x42   : > { %1933 = vmatprep.subr.bf16.mxu1 %v2161_v7 }
  0x45   : > { %1934 = vmatpush3.bf16.msra.mxu1 %v2095_v40  ;;  %v1121_v40 = vld [vmem:[#allocation2 + $0x11] sm:$0xff] }
  0x46   : > { %1959 = vmatprep.subr.bf16.mxu1 %v2161_v7 }
  0x87   : > { %v280_v43 = vpop.permute.xlu0 %279  ;;  %v530_v61 = vpop.permute.xlu1 %529 }
  0x88   : > { %vm284_vm5 = vcmp.eq.s32.totalorder %v280_v43, 1  ;;  %vm534_vm10 = vcmp.eq.s32.totalorder %v530_v61, 1  ;;  %v1122_v43 = vpack.c.bf16 %v1121_v40, %v2301_v28  ;;  %v2124_v28 = vld [vmem:[%s2642_s2 + $0x190] sm:$0xff]  }
  0x89   : > { %vm286_vm6 = vmpackc.low %vm284_vm5, %vm284_vm5 }
  0x8a   : > { %v288_v47 = vsel %vm286_vm6, 65537, %v2160_v2  ;;  %vm536_vm12 = vmpackc.low %vm534_vm10, %vm534_vm10 }
  0x8b   : > { %v283_v44 = vpop.permute.xlu0 %282  ;;  %v533_v0 = vpop.permute.xlu1 %532  ;;  %v538_v6 = vsel %vm536_vm12, 65537, %v2160_v2 }
  0x8c   : > { %vm285_vm7 = vcmp.eq.s32.totalorder %v283_v44, 1  ;;  %vm535_vm11 = vcmp.eq.s32.totalorder %v533_v0, 1  ;;  %v2122_v44 = vld [vmem:[%s2642_s2 + $0x188] sm:$0xff]   ;;  %v2146_v0 = vld [vmem:[%s2644_s4 + $0x10] sm:$0xff]  }
  0x8d   : > { %vm287_vm8 = vmpackc.low %vm285_vm7, %vm285_vm7 }
  0x8e   : > { %v289_v48 = vsel %vm287_vm8, 65537, %v2160_v2  ;;  %vm537_vm13 = vmpackc.low %vm535_vm11, %vm535_vm11 }
  0x8f   : > { %v1547_v51 = vcombine.low %v288_v47, %v289_v48  ;;  %v539_v8 = vsel %vm537_vm13, 65537, %v2160_v2  ;;  %v2130_v47 = vld [vmem:[%s2642_s2 + $0x1a8] sm:$0xff]   ;;  %v2132_v48 = vld [vmem:[%s2642_s2 + $0x1b0] sm:$0xff]  }
  0x90   : > { %v1581_v2 = vcombine.low %v538_v6, %v539_v8 }
  0x91   : > { %vm2365_vm9 = vcmp.ne.s16.totalorder %v1547_v51, 0  ;;  %v2136_v51 = vld [vmem:[%s2642_s2 + $0x200] sm:$0xff]  }
  0x92   : > { %1876 = vmatmul.mubr.msk.bf16.vlgmr.msra.gmra.mrb[0].mxu0 %vm2365_vm9, %v273_v49  ;;  %1936 = vmatmul.mubr.msk.bf16.vlgmr.msra.gmra.mrb[4].mxu1 %vm2365_vm9, %v659_v50  ;;  %vm2446_vm14 = vcmp.ne.s16.totalorder %v1581_v2, 0  ;;  %v2134_v49 = vld [vmem:[%s2642_s2 + $0x1b8] sm:$0xff]   ;;  %v1006_v50 = vpack.c.bf16 %v261_v18, %v2261_v17 }
  0x93   : > { %1900 = vmatpush3.bf16.msra.mxu0 %v2096_v52  ;;  %1960 = vmatpush3.bf16.msra.mxu1 %v2097_v53  ;;  %v2137_v52 = vld [vmem:[%s2642_s2 + $0x208] sm:$0xff]   ;;  %v2139_v17 = vld [vmem:[%s2642_s2 + $0x218] sm:$0xff]  }
  0x94   : > { %1901 = vmatprep.subr.bf16.mxu0 %v2161_v7  ;;  %1961 = vmatprep.subr.bf16.mxu1 %v2161_v7 }
  0x95   : > { %1915 = vmatprep.mubr.msk.bf16.mxu0 %vm2162_vm4, %v2161_v7  ;;  %1975 = vmatprep.mubr.msk.bf16.mxu1 %vm2162_vm4, %v2161_v7 }
  0x97   : > { %1902 = vmatpush3.bf16.msra.mxu0 %v2098_v55  ;;  %1962 = vmatpush3.bf16.msra.mxu1 %v2099_v56  ;;  %v2140_v56 = vld [vmem:[%s2642_s2 + $0x220] sm:$0xff]  }
  0x98   : > { %1903 = vmatprep.subr.bf16.mxu0 %v2161_v7  ;;  %1963 = vmatprep.subr.bf16.mxu1 %v2161_v7 }
  0x9b   : > { %1904 = vmatpush3.bf16.msra.mxu0 %v2100_v57  ;;  %1964 = vmatpush3.bf16.msra.mxu1 %v2101_v58  ;;  %v2141_v57 = vld [vmem:[%s2642_s2 + $0x228] sm:$0xff]   ;;  %v2142_v58 = vld [vmem:[%s2642_s2 + $0x230] sm:$0xff]  }
  0x9c   : > { %1905 = vmatprep.subr.bf16.mxu0 %v2161_v7  ;;  %1965 = vmatprep.subr.bf16.mxu1 %v2161_v7 }
  0x9f   : > { %1906 = vmatpush3.bf16.msra.mxu0 %v2102_v59  ;;  %1966 = vmatpush3.bf16.msra.mxu1 %v2103_v60  ;;  %v2143_v59 = vld [vmem:[%s2642_s2 + $0x238] sm:$0xff]  }
  0xa0   : > { %1907 = vmatprep.subr.bf16.mxu0 %v2161_v7  ;;  %1967 = vmatprep.subr.bf16.mxu1 %v2161_v7  ;;  %v1236_v60 = vld [vmem:[#allocation2 + $0x12] sm:$0xff] }
  0xa1   : > { %v1237_v61 = vpack.c.bf16 %v1236_v60, %v2433_v12  ;;  %v1756_v60 = vld [vmem:[%s2645_s5] ss:$0 sm:$0xff] }
  0xa3   : > { %1908 = vmatpush3.bf16.msra.mxu0 %v2104_v62  ;;  %1968 = vmatpush3.bf16.msra.mxu1 %v2105_v63  ;;  %v2144_v62 = vld [vmem:[%s2644_s4] sm:$0xff]   ;;  %v2145_v63 = vld [vmem:[%s2644_s4 + $0x8] sm:$0xff]  }
  0xa4   : > { %1909 = vmatprep.subr.bf16.mxu0 %v2161_v7  ;;  %1969 = vmatprep.subr.bf16.mxu1 %v2161_v7 }
  0xa7   : > { %1910 = vmatpush3.bf16.msra.mxu0 %v2106_v1  ;;  %1970 = vmatpush3.bf16.msra.mxu1 %v2107_v3  ;;  %v2147_v1 = vld [vmem:[%s2644_s4 + $0x18] sm:$0xff]   ;;  %v2148_v3 = vld [vmem:[%s2644_s4 + $0x20] sm:$0xff]  }
  0xa8   : > { %1911 = vmatprep.subr.bf16.mxu0 %v2161_v7  ;;  %1971 = vmatprep.subr.bf16.mxu1 %v2161_v7 }
  0xab   : > { %1912 = vmatpush3.bf16.msra.mxu0 %v2108_v4  ;;  %1972 = vmatpush3.bf16.msra.mxu1 %v2109_v5  ;;  %v2149_v4 = vld [vmem:[%s2644_s4 + $0x28] sm:$0xff]  }
  0xac   : > { %1913 = vmatprep.subr.bf16.mxu0 %v2161_v7  ;;  %1973 = vmatprep.subr.bf16.mxu1 %v2161_v7 }
  0xaf   : > { %1914 = vmatpush3.bf16.msra.mxu0 %v2110_v9  ;;  %1974 = vmatpush3.bf16.msra.mxu1 %v2111_v10 }
  0xb0   : > { %1939 = vmatprep.subr.bf16.mxu0 %v2161_v7  ;;  %1999 = vmatprep.subr.bf16.mxu1 %v2161_v7 }
  0xb2   : > { %1916 = vmatmul.mubr.msk.bf16.vlgmr.msra.gmra.mrb[4].mxu0 %vm2446_vm14, %v523_v16  ;;  %1976 = vmatmul.mubr.msk.bf16.vlgmr.msra.gmra.mrb[8].mxu1 %vm2446_vm14, %v890_v19  ;;  %v2151_v19 = vld [vmem:[%s2644_s4 + $0x38] sm:$0xff]  }
  0xb3   : > { %1940 = vmatpush3.bf16.msra.mxu0 %v2112_v20  ;;  %1955 = vmatprep.mubr.msk.bf16.mxu0 %vm2162_vm4, %v2161_v7 }
  0xb4   : > { %1941 = vmatprep.subr.bf16.mxu0 %v2161_v7  ;;  %2000 = vmatpush3.bf16.msra.mxu1 %v2121_v21 }
  0xb5   : > { %2001 = vmatprep.subr.bf16.mxu1 %v2161_v7  ;;  %2015 = vmatprep.mubr.msk.bf16.mxu1 %vm2162_vm4, %v2161_v7 }
  0xb7   : > { %1942 = vmatpush3.bf16.msra.mxu0 %v2113_v23 }
  0xb8   : > { %1943 = vmatprep.subr.bf16.mxu0 %v2161_v7  ;;  %2002 = vmatpush3.bf16.msra.mxu1 %v2123_v24 }
  0xb9   : > { %2003 = vmatprep.subr.bf16.mxu1 %v2161_v7 }
  0xbb   : > { %1944 = vmatpush3.bf16.msra.mxu0 %v2114_v25 }
  0xbc   : > { %1945 = vmatprep.subr.bf16.mxu0 %v2161_v7  ;;  %2004 = vmatpush3.bf16.msra.mxu1 %v2125_v26 }
  0xbd   : > { %2005 = vmatprep.subr.bf16.mxu1 %v2161_v7 }
  0xbf   : > { %1946 = vmatpush3.bf16.msra.mxu0 %v2115_v27 }
  0xc0   : > { %1947 = vmatprep.subr.bf16.mxu0 %v2161_v7  ;;  %2006 = vmatpush3.bf16.msra.mxu1 %v2127_v29 }
  0xc1   : > { %2007 = vmatprep.subr.bf16.mxu1 %v2161_v7 }
  0xc3   : > { %1948 = vmatpush3.bf16.msra.mxu0 %v2116_v30 }
  0xc4   : > { %1949 = vmatprep.subr.bf16.mxu0 %v2161_v7  ;;  %2008 = vmatpush3.bf16.msra.mxu1 %v2129_v31 }
  0xc5   : > { %2009 = vmatprep.subr.bf16.mxu1 %v2161_v7 }
  0xc7   : > { %1950 = vmatpush3.bf16.msra.mxu0 %v2117_v32 }
  0xc8   : > { %1951 = vmatprep.subr.bf16.mxu0 %v2161_v7  ;;  %2010 = vmatpush3.bf16.msra.mxu1 %v2131_v33 }
  0xc9   : > { %2011 = vmatprep.subr.bf16.mxu1 %v2161_v7 }
  0xcb   : > { %1952 = vmatpush3.bf16.msra.mxu0 %v2118_v34 }
  0xcc   : > { %1953 = vmatprep.subr.bf16.mxu0 %v2161_v7  ;;  %2012 = vmatpush3.bf16.msra.mxu1 %v2133_v35 }
  0xcd   : > { %2013 = vmatprep.subr.bf16.mxu1 %v2161_v7 }
  0xcf   : > { %1954 = vmatpush3.bf16.msra.mxu0 %v2119_v36 }
  0xd0   : > { %1979 = vmatprep.subr.bf16.mxu0 %v2161_v7  ;;  %2014 = vmatpush3.bf16.msra.mxu1 %v2135_v39 }
  0xd1   : > { %2039 = vmatprep.subr.bf16.mxu1 %v2161_v7 }
  0xd2   : > { %1956 = vmatmul.mubr.bf16.vlgmr.msra.gmra.mrb[8].mxu0 %v775_v41 }
  0xd3   : > { %1980 = vmatpush3.bf16.msra.mxu0 %v2120_v42  ;;  %1995 = vmatprep.mubr.msk.bf16.mxu0 %vm2162_vm4, %v2161_v7 }
  0xd4   : > { %1981 = vmatprep.subr.bf16.mxu0 %v2161_v7  ;;  %2016 = vmatmul.mubr.bf16.vlgmr.msra.gmra.mrb[12].mxu1 %v1122_v43 }
  0xd5   : > { %2055 = vmatprep.mubr.msk.bf16.mxu1 %vm2162_vm4, %v2161_v7  ;;  %2040 = vmatpush3.bf16.msra.mxu1 %v2144_v62  ;;  %v1477_v62 = vld [vmem:[%s2248_s14 + $0x5] sm:$0xff] }
  0xd6   : > { %2041 = vmatprep.subr.bf16.mxu1 %v2161_v7 }
  0xd7   : > { %1982 = vmatpush3.bf16.msra.mxu0 %v2122_v44 }
  0xd8   : > { %1983 = vmatprep.subr.bf16.mxu0 %v2161_v7 }
  0xd9   : > { %2042 = vmatpush3.bf16.msra.mxu1 %v2145_v63 }
  0xda   : > { %2043 = vmatprep.subr.bf16.mxu1 %v2161_v7 }
  0xdb   : > { %1984 = vmatpush3.bf16.msra.mxu0 %v2124_v28 }
  0xdc   : > { %1985 = vmatprep.subr.bf16.mxu0 %v2161_v7 }
  0xdd   : > { %2044 = vmatpush3.bf16.msra.mxu1 %v2146_v0 }
  0xde   : > { %2045 = vmatprep.subr.bf16.mxu1 %v2161_v7 }
  0xdf   : > { %1986 = vmatpush3.bf16.msra.mxu0 %v2126_v45 }
  0xe0   : > { %1987 = vmatprep.subr.bf16.mxu0 %v2161_v7 }
  0xe1   : > { %2046 = vmatpush3.bf16.msra.mxu1 %v2147_v1 }
  0xe2   : > { %2047 = vmatprep.subr.bf16.mxu1 %v2161_v7 }
  0xe3   : > { %1988 = vmatpush3.bf16.msra.mxu0 %v2128_v46 }
  0xe4   : > { %1989 = vmatprep.subr.bf16.mxu0 %v2161_v7 }
  0xe5   : > { %2048 = vmatpush3.bf16.msra.mxu1 %v2148_v3  ;;  %v1478_v3 = vld [vmem:[%s2248_s14 + $0xd] sm:$0xff] }
  0xe6   : > { %2049 = vmatprep.subr.bf16.mxu1 %v2161_v7 }
  0xe7   : > { %1990 = vmatpush3.bf16.msra.mxu0 %v2130_v47 }
  0xe8   : > { %1991 = vmatprep.subr.bf16.mxu0 %v2161_v7 }
  0xe9   : > { %2050 = vmatpush3.bf16.msra.mxu1 %v2149_v4 }
  0xea   : > { %2051 = vmatprep.subr.bf16.mxu1 %v2161_v7 }
  0xeb   : > { %1992 = vmatpush3.bf16.msra.mxu0 %v2132_v48 }
  0xec   : > { %1993 = vmatprep.subr.bf16.mxu0 %v2161_v7 }
  0xed   : > { %2052 = vmatpush3.bf16.msra.mxu1 %v2150_v13 }
  0xee   : > { %2053 = vmatprep.subr.bf16.mxu1 %v2161_v7 }
  0xef   : > { %1994 = vmatpush3.bf16.msra.mxu0 %v2134_v49 }
  0xf0   : > { %2019 = vmatprep.subr.bf16.mxu0 %v2161_v7 }
  0xf1   : > { %2054 = vmatpush3.bf16.msra.mxu1 %v2151_v19 }
  0xf2   : > { %1996 = vmatmul.mubr.msk.bf16.vlgmr.msra.gmra.mrb[12].mxu0 %vm2365_vm9, %v1006_v50 }
  0xf3   : > { %2020 = vmatpush3.bf16.msra.mxu0 %v2136_v51  ;;  %2035 = vmatprep.mubr.msk.bf16.mxu0 %vm2162_vm4, %v2161_v7 }
  0xf4   : > { %2021 = vmatprep.subr.bf16.mxu0 %v2161_v7 }
  0xf7   : > { %2022 = vmatpush3.bf16.msra.mxu0 %v2137_v52  ;;  %v1755_v52 = vld [vmem:[%s2643_s3] ss:$0 sm:$0xff] }
  0xf8   : > { %2023 = vmatprep.subr.bf16.mxu0 %v2161_v7 }
  0xfb   : > { %2024 = vmatpush3.bf16.msra.mxu0 %v2138_v14  ;;  %v510_v18 = vpop.f32.mrb[0].mxu1 }
  0xfc   : > { %2025 = vmatprep.subr.bf16.mxu0 %v2161_v7  ;;  %v1897_v53 = vpop.f32.mrb[1].mxu1 }
  0xfd   : > { %v513_v54 = vpop.f32.mrb[2].mxu1 }
  0xfe   : > { %v1898_v55 = vpop.f32.mrb[3].mxu1 }
  0xff   : > { %2026 = vmatpush3.bf16.msra.mxu0 %v2139_v17 }
 0x100   : > { %2027 = vmatprep.subr.bf16.mxu0 %v2161_v7 }
 0x103   : > { %2028 = vmatpush3.bf16.msra.mxu0 %v2140_v56 }
 0x104   : > { %2029 = vmatprep.subr.bf16.mxu0 %v2161_v7 }
 0x107   : > { %2030 = vmatpush3.bf16.msra.mxu0 %v2141_v57 }
 0x108   : > { %2031 = vmatprep.subr.bf16.mxu0 %v2161_v7 }
 0x10b   : > { %2032 = vmatpush3.bf16.msra.mxu0 %v2142_v58 }
 0x10c   : > { %2033 = vmatprep.subr.bf16.mxu0 %v2161_v7 }
 0x10f   : > { %2034 = vmatpush3.bf16.msra.mxu0 %v2143_v59 }
 0x112   : > { %2036 = vmatmul.mubr.msk.bf16.vlgmr.msra.gmra.mrb[16].mxu0 %vm2446_vm14, %v1237_v61 }
 0x165   : > { %v395_v5 = vpop.f32.mrb[0].mxu0  ;;  %v762_v6 = vpop.f32.mrb[4].mxu1 }
 0x166   : > { %v517_v8 = vadd.f32 %v510_v18, %v395_v5  ;;  %v1877_v9 = vpop.f32.mrb[1].mxu0  ;;  %v1937_v10 = vpop.f32.mrb[5].mxu1 }
 0x167   : > { %v398_v11 = vpop.f32.mrb[2].mxu0  ;;  %v765_v12 = vpop.f32.mrb[6].mxu1 }
 0x168   : > { %v518_v15 = vadd.f32 %v513_v54, %v398_v11  ;;  %v1878_v2 = vpop.f32.mrb[3].mxu0  ;;  %v1938_v16 = vpop.f32.mrb[7].mxu1 }
 0x185   : > { %v646_v20 = vpop.f32.mrb[4].mxu0  ;;  %v993_v21 = vpop.f32.mrb[8].mxu1 }
 0x186   : > { %v653_v22 = vadd.f32 %v646_v20, %v517_v8  ;;  %v1917_v23 = vpop.f32.mrb[5].mxu0  ;;  %v1977_v24 = vpop.f32.mrb[9].mxu1 }
 0x187   : > { %v649_v25 = vpop.f32.mrb[6].mxu0  ;;  %v996_v26 = vpop.f32.mrb[10].mxu1 }
 0x188   : > { %v654_v27 = vadd.f32 %v649_v25, %v518_v15  ;;  %v1918_v29 = vpop.f32.mrb[7].mxu0  ;;  %v1978_v30 = vpop.f32.mrb[11].mxu1  ;;  %v769_v31 = vadd.f32 %v762_v6, %v653_v22 }
 0x18a   : > { %v770_v32 = vadd.f32 %v765_v12, %v654_v27 }
 0x1a5   : > { %v877_v33 = vpop.f32.mrb[8].mxu0 }
 0x1a6   : > { %v884_v34 = vadd.f32 %v877_v33, %v769_v31  ;;  %v1957_v7 = vpop.f32.mrb[9].mxu0 }
 0x1a7   : > { %v880_v35 = vpop.f32.mrb[10].mxu0  ;;  %v1224_v36 = vpop.f32.mrb[12].mxu1 }
 0x1a8   : > { %v885_v37 = vadd.f32 %v880_v35, %v770_v32  ;;  %v1958_v38 = vpop.f32.mrb[11].mxu0  ;;  %v1000_v39 = vadd.f32 %v993_v21, %v884_v34  ;;  %v2017_v40 = vpop.f32.mrb[13].mxu1 }
 0x1a9   : > { %v1227_v41 = vpop.f32.mrb[14].mxu1 }
 0x1aa   : > { %v1001_v42 = vadd.f32 %v996_v26, %v885_v37  ;;  %v2018_v43 = vpop.f32.mrb[15].mxu1 }
 0x1c5   : > { %v1109_v44 = vpop.f32.mrb[12].mxu0 }
 0x1c6   : > { %v1116_v28 = vadd.f32 %v1109_v44, %v1000_v39  ;;  %v1997_v45 = vpop.f32.mrb[13].mxu0 }
 0x1c7   : > { %v1112_v46 = vpop.f32.mrb[14].mxu0 }
 0x1c8   : > { %v1117_v47 = vadd.f32 %v1112_v46, %v1001_v42  ;;  %v1231_v48 = vadd.f32 %v1224_v36, %v1116_v28  ;;  %v1998_v49 = vpop.f32.mrb[15].mxu0 }
 0x1ca   : > { %v1232_v50 = vadd.f32 %v1227_v41, %v1117_v47 }
 0x1e5   : > { %v1340_v51 = vpop.f32.mrb[16].mxu0 }
 0x1e6   : > { %v1347_v14 = vadd.f32 %v1340_v51, %v1231_v48  ;;  %v2037_v17 = vpop.f32.mrb[17].mxu0 }
 0x1e7   : > { %v1343_v18 = vpop.f32.mrb[18].mxu0 }
 0x1e8   : > { %v1360_v53 = vadd.f32 %v1755_v52, %v1347_v14  ;;  %v1348_v54 = vadd.f32 %v1343_v18, %v1232_v50  ;;  %v2038_v55 = vpop.f32.mrb[19].mxu0 }
 0x1ea   : > { %v1361_v56 = vadd.f32 %v1755_v52, %v1348_v54  ;;  %v1362_v57 = vmax.f32 %v1360_v53, 0.0 }
 0x1ec   : > { %v1363_v58 = vmax.f32 %v1361_v56, 0.0 }
 0x1ee   : > { %v1364_v59 = vpack.c.bf16 %v1363_v58, %v1362_v57 }
 0x1f0   : > { %2056 = vmatmul.mubr.bf16.vlgmr.msra.gmra.mrb[16].mxu1 %v1364_v59 }
 0x2c3   : > { %v1470_v61 = vpop.f32.mrb[16].mxu1 }
 0x2c4   : > { %v1471_v63 = vadd.f32 %v1756_v60, %v1470_v61  ;;  %v2057_v0 = vpop.f32.mrb[17].mxu1 }
 0x2c5   : > { %v1473_v1 = vpop.f32.mrb[18].mxu1 }
 0x2c6   : > { %v1479_v4 = vadd.f32 %v1477_v62, %v1471_v63  ;;  %v1474_v5 = vadd.f32 %v1756_v60, %v1473_v1  ;;  %v2058_v6 = vpop.f32.mrb[19].mxu1 }
 0x2c8   : > { %1481 = vst [vmem:[%s251_s29] sm:$0xff] %v1479_v4  ;;  %v1480_v8 = vadd.f32 %v1478_v3, %v1474_v5 }
 0x2ca   : > { %1482 = vst [vmem:[%s251_s29 + $0x8] sm:$0xff] %v1480_v8 }
 0x2cb PF: > { %s16_s21 = sadd.s32 1, %s2158_s21  }
 0x2cc   : > { %p13_p4 = scmp.ge.s32.totalorder %s16_s21, 4  }
 0x2ce   :  { %15 = sbr.rel (!%p13_p4) target bundleno = 1 (0x1), region = 82 }

// kernel: encoder_forward.7
= control target key start
LH: loop header
LB: loop body
LE: loop exit
PB: predicated region body
PF: predicated region fallthrough
CT: control target
= control target key end

     0   :  { %s2421_s27 = smov 0   ;;  %s2900_s0 = inlined_call_operand.vmem [shape: f32[2,26,128], index: 0, kind: input, shape index: {}]   ;;  %s2901_s1 = inlined_call_operand.vmem [shape: s32[16,1], index: 1, kind: input, shape index: {}]   ;;  %s2902_s2 = inlined_call_operand.vmem [shape: bf16[9,128,128], index: 2, kind: input, shape index: {}]   ;;  %s2903_s3 = inlined_call_operand.vmem [shape: f32[1,128], index: 3, kind: input, shape index: {}]   ;;  %s2904_s4 = inlined_call_operand.vmem [shape: bf16[128,128], index: 4, kind: input, shape index: {}]   ;;  %s2905_s5 = inlined_call_operand.vmem [shape: f32[1,128], index: 5, kind: input, shape index: {}]   ;;  %s2906_s6 = inlined_call_operand.vmem [shape: bf16[128,128], index: 6, kind: input, shape index: {}]   ;;  %s2907_s7 = inlined_call_operand.vmem [shape: f32[1,128], index: 7, kind: input, shape index: {}]   ;;  %s2908_s8 = inlined_call_operand.vmem [shape: f32[2,16,128], index: 8, kind: output, shape index: {}]  }
   0x1 LB: > { %s1705_s28 = sadd.s32 4294967295, %s2371_s27   ;;  %p1709_p0 = scmp.ge.s32.totalorder %s2371_s27, 1  ;;  %s2371_s27 = sphi %s2421_s27, %s18_s27  }
   0x2   : > { %p262_p1 = scmp.lt.s32.totalorder %s2371_s27, 3 }
   0x4   : > { %p263_p2 = pnand %p1709_p0, %p262_p1 }
   0x5   : > { %v323_v0 = vld [vmem:[%s2901_s1] sm:$0xff] (!%p263_p2)  ;;  %v324_v1 = vld [vmem:[%s2901_s1 + $0x8] sm:$0xff] (!%p263_p2)  ;;  %v2373_v2 = vmov (!%p263_p2), 0   ;;  %v2374_v7 = vmov (!%p263_p2), 0.0   ;;  %vm2375_vm4 = vmmov (!%p263_p2), 0   ;;  %p296_p3 = scmp.lt.s32.totalorder (!%p263_p2), %s1705_s28, 1 }
   0x6   : > { %266 = sbr.rel (%p263_p2) target bundleno = 933 (0x3a5), region = 52  ;;  %2275 = vset.pattern.permute.xlu0 (!%p263_p2), %v2373_v2  ;;  %vm328_vm0 = vcmp.ne.s32.totalorder (!%p263_p2), %v323_v0, 0  ;;  %vm329_vm1 = vcmp.ne.s32.totalorder (!%p263_p2), %v324_v1, 0  ;;  %2276 = vset.pattern.permute.xlu1 (!%p263_p2), %v2373_v2  ;;  %vm578_vm2 = vcmp.ne.s32.totalorder (!%p263_p2), %v323_v0, 3  ;;  %vm579_vm3 = vcmp.ne.s32.totalorder (!%p263_p2), %v324_v1, 3  ;;  %v2277_v8 = vld [vmem:[%s2902_s2 + $0x40] sm:$0xff] (!%p263_p2)  }
   0x7   : > { %v330_v3 = vsel (!%p263_p2), %vm328_vm0, 1, %v2373_v2  ;;  %v331_v4 = vsel (!%p263_p2), %vm329_vm1, 1, %v2373_v2  ;;  %v580_v5 = vsel (!%p263_p2), %vm578_vm2, 1, %v2373_v2  ;;  %v581_v6 = vsel (!%p263_p2), %vm579_vm3, 1, %v2373_v2  ;;  %2064 = vmatprep.subr.bf16.mxu1 (!%p263_p2), %v2374_v7  ;;  %2044 = vmatprep.subr.bf16.mxu0 (!%p263_p2), %v2374_v7  ;;  %v2278_v9 = vld [vmem:[%s2902_s2 + $0x48] sm:$0xff] (!%p263_p2)   ;;  %v2279_v10 = vld [vmem:[%s2902_s2 + $0x50] sm:$0xff] (!%p263_p2)  }
   0x8   : > { %333 = vperm.xlu0 (!%p263_p2), %2275, %v330_v3   ;;  %583 = vperm.xlu1 (!%p263_p2), %2276, %v580_v5   ;;  %v2285_v11 = vld [vmem:[%s2902_s2] sm:$0xff] (!%p263_p2)   ;;  %v2280_v15 = vld [vmem:[%s2902_s2 + $0x58] sm:$0xff] (!%p263_p2)   ;;  %v2287_v19 = vld [vmem:[%s2902_s2 + $0x8] sm:$0xff] (!%p263_p2)  }
   0x9   : > { %2065 = vmatpush3.bf16.msra.mxu1 (!%p263_p2), %v2277_v8  ;;  %2080 = vmatprep.mubr.msk.bf16.mxu1 (!%p263_p2), %vm2375_vm4, %v2374_v7  ;;  %v2281_v20 = vld [vmem:[%s2902_s2 + $0x60] sm:$0xff] (!%p263_p2)   ;;  %v2289_v21 = vld [vmem:[%s2902_s2 + $0x10] sm:$0xff] (!%p263_p2)   ;;  %v2282_v22 = vld [vmem:[%s2902_s2 + $0x68] sm:$0xff] (!%p263_p2)  }
   0xa   : > { %2066 = vmatprep.subr.bf16.mxu1 (!%p263_p2), %v2374_v7  ;;  %2060 = vmatprep.mubr.msk.bf16.mxu0 (!%p263_p2), %vm2375_vm4, %v2374_v7  ;;  %v2291_v23 = vld [vmem:[%s2902_s2 + $0x18] sm:$0xff] (!%p263_p2)   ;;  %v2283_v24 = vld [vmem:[%s2902_s2 + $0x70] sm:$0xff] (!%p263_p2)   ;;  %v2293_v25 = vld [vmem:[%s2902_s2 + $0x20] sm:$0xff] (!%p263_p2)  }
   0xb   : > { %2045 = vmatpush3.bf16.msra.mxu0 (!%p263_p2), %v2285_v11  ;;  %v2284_v26 = vld [vmem:[%s2902_s2 + $0x78] sm:$0xff] (!%p263_p2)   ;;  %v2295_v29 = vld [vmem:[%s2902_s2 + $0x28] sm:$0xff] (!%p263_p2)   ;;  %v2286_v31 = vld [vmem:[%s2902_s2 + $0xc0] sm:$0xff] (!%p263_p2)  }
   0xc   : > { %336 = vperm.xlu0 (!%p263_p2), %2275, %v331_v4   ;;  %586 = vperm.xlu1 (!%p263_p2), %2276, %v581_v6   ;;  %v2297_v32 = vld [vmem:[%s2902_s2 + $0x30] sm:$0xff] (!%p263_p2)   ;;  %v2288_v33 = vld [vmem:[%s2902_s2 + $0xc8] sm:$0xff] (!%p263_p2)   ;;  %v2299_v34 = vld [vmem:[%s2902_s2 + $0x38] sm:$0xff] (!%p263_p2)  }
   0xd   : > { %s2914_s28 = smov (!%p296_p3, %s1705_s28), 1  ;;  %2067 = vmatpush3.bf16.msra.mxu1 %v2278_v9  ;;  %2046 = vmatprep.subr.bf16.mxu0 %v2374_v7  ;;  %v2290_v35 = vld [vmem:[%s2902_s2 + $0xd0] sm:$0xff]   ;;  %v2292_v36 = vld [vmem:[%s2902_s2 + $0xd8] sm:$0xff]   ;;  %v2294_v37 = vld [vmem:[%s2902_s2 + $0xe0] sm:$0xff]  }
   0xe   : > { %2068 = vmatprep.subr.bf16.mxu1 %v2374_v7  ;;  %s1943_s17 = sshll.u32 %s2914_s28, 5  ;;  %v2296_v38 = vld [vmem:[%s2902_s2 + $0xe8] sm:$0xff]   ;;  %v2298_v39 = vld [vmem:[%s2902_s2 + $0xf0] sm:$0xff]   ;;  %v2300_v40 = vld [vmem:[%s2902_s2 + $0xf8] sm:$0xff]   ;;  %s1944_s24 = sshll.u32 %s2914_s28, 4 }
   0xf   : > { %s2471_s22 = scalar_lea.vmem %s2900_s0, %s1943_s17  ;;  %2047 = vmatpush3.bf16.msra.mxu0 %v2287_v19  ;;  %v2301_v52 = vld [vmem:[%s2902_s2 + $0x80] sm:$0xff]   ;;  %v2303_v55 = vld [vmem:[%s2902_s2 + $0x88] sm:$0xff]   ;;  %v2305_v57 = vld [vmem:[%s2902_s2 + $0x90] sm:$0xff]   ;;  %s305_s9 = scalar_lea.vmem %s2908_s8, %s1944_s24 }
  0x10   : > { %v2474_v12 = vld [vmem:[%s2471_s22] sm:$0xff]  ;;  %v310_v13 = vld [vmem:[%s2471_s22 + $0x8] sm:$0xff]  ;;  %v2478_v14 = vld [vmem:[%s2471_s22 + $0x10] sm:$0xff]  ;;  %2048 = vmatprep.subr.bf16.mxu0 %v2374_v7 }
  0x11   : > { %2069 = vmatpush3.bf16.msra.mxu1 %v2279_v10  ;;  %v313_v16 = vmax.f32 %v2474_v12, 0.0  ;;  %v2484_v17 = vmax.f32 %v310_v13, 0.0  ;;  %v315_v18 = vmax.f32 %v2478_v14, 0.0  ;;  %v312_v41 = vld [vmem:[%s2471_s22 + $0x18] sm:$0x3]  ;;  %v2302_v53 = vld [vmem:[%s2902_s2 + $0x140] sm:$0xff]  }
  0x12   : > { %2070 = vmatprep.subr.bf16.mxu1 %v2374_v7  ;;  %v316_v42 = vmax.f32 %v312_v41, 0.0  ;;  %v2304_v56 = vld [vmem:[%s2902_s2 + $0x148] sm:$0xff]   ;;  %v2306_v58 = vld [vmem:[%s2902_s2 + $0x150] sm:$0xff]   ;;  %v2307_v59 = vld [vmem:[%s2902_s2 + $0x98] sm:$0xff]  }
  0x13   : > { %317 = vst [vmem:[#allocation2] sm:$0xff] %v313_v16  ;;  %318 = vst [vmem:[#allocation2 + $0x8] sm:$0xff] %v2484_v17  ;;  %2049 = vmatpush3.bf16.msra.mxu0 %v2289_v21  ;;  %v327_v49 = vpack.c.bf16 %v2484_v17, %v313_v16  ;;  %v2308_v60 = vld [vmem:[%s2902_s2 + $0x158] sm:$0xff]   ;;  %v2309_v62 = vld [vmem:[%s2902_s2 + $0xa0] sm:$0xff]  }
  0x14   : > { %319 = vst [vmem:[#allocation2 + $0x10] sm:$0xff] %v315_v18  ;;  %2050 = vmatprep.subr.bf16.mxu0 %v2374_v7  ;;  %320 = vst [vmem:[#allocation2 + $0x18] sm:$0x3] %v316_v42  ;;  %v2310_v63 = vld [vmem:[%s2902_s2 + $0x160] sm:$0xff]   ;;  %v2311_v1 = vld [vmem:[%s2902_s2 + $0xa8] sm:$0xff]  }
  0x15   : > { %2071 = vmatpush3.bf16.msra.mxu1 %v2280_v15  ;;  %v2312_v3 = vld [vmem:[%s2902_s2 + $0x168] sm:$0xff]   ;;  %v2313_v4 = vld [vmem:[%s2902_s2 + $0xb0] sm:$0xff]   ;;  %v2315_v9 = vld [vmem:[%s2902_s2 + $0xb8] sm:$0xff]  }
  0x16   : > { %2072 = vmatprep.subr.bf16.mxu1 %v2374_v7  ;;  %v2314_v5 = vld [vmem:[%s2902_s2 + $0x170] sm:$0xff]   ;;  %v2316_v10 = vld [vmem:[%s2902_s2 + $0x178] sm:$0xff]   ;;  %v2326_v21 = vld [vmem:[%s2902_s2 + $0x1c0] sm:$0xff]  }
  0x17   : > { %2051 = vmatpush3.bf16.msra.mxu0 %v2291_v23  ;;  %v2318_v23 = vld [vmem:[%s2902_s2 + $0x108] sm:$0xff]   ;;  %v2325_v42 = vld [vmem:[%s2902_s2 + $0x180] sm:$0xff]   ;;  %v2343_v14 = vld [vmem:[%s2902_s2 + $0x210] sm:$0xff]  }
  0x18   : > { %2052 = vmatprep.subr.bf16.mxu0 %v2374_v7 }
  0x19   : > { %2073 = vmatpush3.bf16.msra.mxu1 %v2281_v20  ;;  %v2317_v20 = vld [vmem:[%s2902_s2 + $0x100] sm:$0xff]  }
  0x1a   : > { %2074 = vmatprep.subr.bf16.mxu1 %v2374_v7  ;;  %v460_v27 = vld [vmem:[#allocation2 + $0x1] sm:$0xff] }
  0x1b   : > { %v2524_v28 = vld [vmem:[#allocation2 + $0x9] sm:$0xff]  ;;  %2053 = vmatpush3.bf16.msra.mxu0 %v2293_v25 }
  0x1c   : > { %2054 = vmatprep.subr.bf16.mxu0 %v2374_v7  ;;  %v462_v30 = vpack.c.bf16 %v2524_v28, %v460_v27  ;;  %v711_v45 = vld [vmem:[#allocation2 + $0x4] sm:$0xff]  ;;  %v712_v46 = vld [vmem:[#allocation2 + $0xc] sm:$0xff]  ;;  %v2320_v27 = vld [vmem:[%s2902_s2 + $0x118] sm:$0xff]  }
  0x1d   : > { %2075 = vmatpush3.bf16.msra.mxu1 %v2282_v22  ;;  %v713_v50 = vpack.c.bf16 %v712_v46, %v711_v45  ;;  %v575_v11 = vld [vmem:[#allocation2 + $0x2] sm:$0xff]  ;;  %v2656_v12 = vld [vmem:[#allocation2 + $0xa] sm:$0xff]  ;;  %v2331_v45 = vld [vmem:[%s2902_s2 + $0x198] sm:$0xff]  }
  0x1e   : > { %2076 = vmatprep.subr.bf16.mxu1 %v2374_v7  ;;  %v942_v13 = vld [vmem:[#allocation2 + $0x6] sm:$0xff]  ;;  %v943_v15 = vld [vmem:[#allocation2 + $0xe] sm:$0xff]  ;;  %v577_v16 = vpack.c.bf16 %v2656_v12, %v575_v11 }
  0x1f   : > { %2055 = vmatpush3.bf16.msra.mxu0 %v2295_v29  ;;  %v944_v19 = vpack.c.bf16 %v943_v15, %v942_v13  ;;  %v2319_v25 = vld [vmem:[%s2902_s2 + $0x110] sm:$0xff]   ;;  %v2332_v29 = vld [vmem:[%s2902_s2 + $0x1d8] sm:$0xff]   ;;  %v2333_v46 = vld [vmem:[%s2902_s2 + $0x1a0] sm:$0xff]  }
  0x20   : > { %2056 = vmatprep.subr.bf16.mxu0 %v2374_v7  ;;  %v2355_v13 = vld [vmem:[%s2904_s4 + $0x30] sm:$0xff]  }
  0x21   : > { %2077 = vmatpush3.bf16.msra.mxu1 %v2283_v24  ;;  %v2328_v24 = vld [vmem:[%s2902_s2 + $0x1c8] sm:$0xff]   ;;  %v2359_v22 = vld [vmem:[%s2906_s6 + $0x10] sm:$0xff]  }
  0x22   : > { %2078 = vmatprep.subr.bf16.mxu1 %v2374_v7 }
  0x23   : > { %2057 = vmatpush3.bf16.msra.mxu0 %v2297_v32  ;;  %v2322_v32 = vld [vmem:[%s2902_s2 + $0x128] sm:$0xff]  }
  0x24   : > { %2058 = vmatprep.subr.bf16.mxu0 %v2374_v7 }
  0x25   : > { %2079 = vmatpush3.bf16.msra.mxu1 %v2284_v26  ;;  %v2330_v26 = vld [vmem:[%s2902_s2 + $0x1d0] sm:$0xff]  }
  0x26   : > { %2104 = vmatprep.subr.bf16.mxu1 %v2374_v7 }
  0x27   : > { %2059 = vmatpush3.bf16.msra.mxu0 %v2299_v34  ;;  %v2323_v34 = vld [vmem:[%s2902_s2 + $0x130] sm:$0xff]  }
  0x28   : > { %2081 = vmatmul.mubr.bf16.vlgmr.msra.gmra.mrb[0].mxu1 %v462_v30  ;;  %2084 = vmatprep.subr.bf16.mxu0 %v2374_v7  ;;  %v2321_v30 = vld [vmem:[%s2902_s2 + $0x120] sm:$0xff]  }
  0x29   : > { %2105 = vmatpush3.bf16.msra.mxu1 %v2286_v31  ;;  %2120 = vmatprep.mubr.msk.bf16.mxu1 %vm2375_vm4, %v2374_v7  ;;  %v2334_v31 = vld [vmem:[%s2902_s2 + $0x1e0] sm:$0xff]  }
  0x2a   : > { %2106 = vmatprep.subr.bf16.mxu1 %v2374_v7 }
  0x2d   : > { %2107 = vmatpush3.bf16.msra.mxu1 %v2288_v33  ;;  %v2336_v33 = vld [vmem:[%s2902_s2 + $0x1e8] sm:$0xff]  }
  0x2e   : > { %2108 = vmatprep.subr.bf16.mxu1 %v2374_v7 }
  0x31   : > { %2109 = vmatpush3.bf16.msra.mxu1 %v2290_v35  ;;  %v2338_v35 = vld [vmem:[%s2902_s2 + $0x1f0] sm:$0xff]  }
  0x32   : > { %2110 = vmatprep.subr.bf16.mxu1 %v2374_v7 }
  0x35   : > { %2111 = vmatpush3.bf16.msra.mxu1 %v2292_v36  ;;  %v2324_v36 = vld [vmem:[%s2902_s2 + $0x138] sm:$0xff]  }
  0x36   : > { %2112 = vmatprep.subr.bf16.mxu1 %v2374_v7 }
  0x39   : > { %2113 = vmatpush3.bf16.msra.mxu1 %v2294_v37  ;;  %v827_v37 = vld [vmem:[#allocation2 + $0x5] sm:$0xff] }
  0x3a   : > { %2114 = vmatprep.subr.bf16.mxu1 %v2374_v7 }
  0x3d   : > { %2115 = vmatpush3.bf16.msra.mxu1 %v2296_v38  ;;  %v828_v38 = vld [vmem:[#allocation2 + $0xd] sm:$0xff] }
  0x3e   : > { %2116 = vmatprep.subr.bf16.mxu1 %v2374_v7  ;;  %v829_v41 = vpack.c.bf16 %v828_v38, %v827_v37 }
  0x41   : > { %2117 = vmatpush3.bf16.msra.mxu1 %v2298_v39  ;;  %v2340_v39 = vld [vmem:[%s2902_s2 + $0x1f8] sm:$0xff]  }
  0x42   : > { %2118 = vmatprep.subr.bf16.mxu1 %v2374_v7 }
  0x45   : > { %2119 = vmatpush3.bf16.msra.mxu1 %v2300_v40  ;;  %v1175_v40 = vld [vmem:[#allocation2 + $0x11] sm:$0xff] }
  0x46   : > { %2144 = vmatprep.subr.bf16.mxu1 %v2374_v7 }
  0x87   : > { %v334_v43 = vpop.permute.xlu0 %333  ;;  %v584_v61 = vpop.permute.xlu1 %583 }
  0x88   : > { %vm338_vm5 = vcmp.eq.s32.totalorder %v334_v43, 1  ;;  %vm588_vm10 = vcmp.eq.s32.totalorder %v584_v61, 1  ;;  %v1176_v43 = vpack.c.bf16 %v1175_v40, %v2524_v28  ;;  %v2329_v28 = vld [vmem:[%s2902_s2 + $0x190] sm:$0xff]  }
  0x89   : > { %vm340_vm6 = vmpackc.low %vm338_vm5, %vm338_vm5 }
  0x8a   : > { %v342_v47 = vsel %vm340_vm6, 65537, %v2373_v2  ;;  %vm590_vm12 = vmpackc.low %vm588_vm10, %vm588_vm10 }
  0x8b   : > { %v337_v44 = vpop.permute.xlu0 %336  ;;  %v587_v0 = vpop.permute.xlu1 %586  ;;  %v592_v6 = vsel %vm590_vm12, 65537, %v2373_v2 }
  0x8c   : > { %vm339_vm7 = vcmp.eq.s32.totalorder %v337_v44, 1  ;;  %vm589_vm11 = vcmp.eq.s32.totalorder %v587_v0, 1  ;;  %v2327_v44 = vld [vmem:[%s2902_s2 + $0x188] sm:$0xff]   ;;  %v2351_v0 = vld [vmem:[%s2904_s4 + $0x10] sm:$0xff]  }
  0x8d   : > { %vm341_vm8 = vmpackc.low %vm339_vm7, %vm339_vm7 }
  0x8e   : > { %v343_v48 = vsel %vm341_vm8, 65537, %v2373_v2  ;;  %vm591_vm13 = vmpackc.low %vm589_vm11, %vm589_vm11 }
  0x8f   : > { %v1714_v51 = vcombine.low %v342_v47, %v343_v48  ;;  %v593_v8 = vsel %vm591_vm13, 65537, %v2373_v2  ;;  %v2335_v47 = vld [vmem:[%s2902_s2 + $0x1a8] sm:$0xff]   ;;  %v2337_v48 = vld [vmem:[%s2902_s2 + $0x1b0] sm:$0xff]  }
  0x90   : > { %v1748_v2 = vcombine.low %v592_v6, %v593_v8 }
  0x91   : > { %vm2588_vm9 = vcmp.ne.s16.totalorder %v1714_v51, 0  ;;  %v2341_v51 = vld [vmem:[%s2902_s2 + $0x200] sm:$0xff]  }
  0x92   : > { %2061 = vmatmul.mubr.msk.bf16.vlgmr.msra.gmra.mrb[0].mxu0 %vm2588_vm9, %v327_v49  ;;  %2121 = vmatmul.mubr.msk.bf16.vlgmr.msra.gmra.mrb[4].mxu1 %vm2588_vm9, %v713_v50  ;;  %vm2669_vm14 = vcmp.ne.s16.totalorder %v1748_v2, 0  ;;  %v2339_v49 = vld [vmem:[%s2902_s2 + $0x1b8] sm:$0xff]   ;;  %v1060_v50 = vpack.c.bf16 %v315_v18, %v2484_v17 }
  0x93   : > { %2085 = vmatpush3.bf16.msra.mxu0 %v2301_v52  ;;  %2145 = vmatpush3.bf16.msra.mxu1 %v2302_v53  ;;  %v2342_v52 = vld [vmem:[%s2902_s2 + $0x208] sm:$0xff]   ;;  %v2344_v17 = vld [vmem:[%s2902_s2 + $0x218] sm:$0xff]  }
  0x94   : > { %2086 = vmatprep.subr.bf16.mxu0 %v2374_v7  ;;  %2146 = vmatprep.subr.bf16.mxu1 %v2374_v7 }
  0x95   : > { %2100 = vmatprep.mubr.msk.bf16.mxu0 %vm2375_vm4, %v2374_v7  ;;  %2160 = vmatprep.mubr.msk.bf16.mxu1 %vm2375_vm4, %v2374_v7 }
  0x97   : > { %2087 = vmatpush3.bf16.msra.mxu0 %v2303_v55  ;;  %2147 = vmatpush3.bf16.msra.mxu1 %v2304_v56  ;;  %v2345_v56 = vld [vmem:[%s2902_s2 + $0x220] sm:$0xff]  }
  0x98   : > { %2088 = vmatprep.subr.bf16.mxu0 %v2374_v7  ;;  %2148 = vmatprep.subr.bf16.mxu1 %v2374_v7 }
  0x9b   : > { %2089 = vmatpush3.bf16.msra.mxu0 %v2305_v57  ;;  %2149 = vmatpush3.bf16.msra.mxu1 %v2306_v58  ;;  %v2346_v57 = vld [vmem:[%s2902_s2 + $0x228] sm:$0xff]   ;;  %v2347_v58 = vld [vmem:[%s2902_s2 + $0x230] sm:$0xff]  }
  0x9c   : > { %2090 = vmatprep.subr.bf16.mxu0 %v2374_v7  ;;  %2150 = vmatprep.subr.bf16.mxu1 %v2374_v7 }
  0x9f   : > { %2091 = vmatpush3.bf16.msra.mxu0 %v2307_v59  ;;  %2151 = vmatpush3.bf16.msra.mxu1 %v2308_v60  ;;  %v2348_v59 = vld [vmem:[%s2902_s2 + $0x238] sm:$0xff]  }
  0xa0   : > { %2092 = vmatprep.subr.bf16.mxu0 %v2374_v7  ;;  %2152 = vmatprep.subr.bf16.mxu1 %v2374_v7  ;;  %v1290_v60 = vld [vmem:[#allocation2 + $0x12] sm:$0xff] }
  0xa1   : > { %v1291_v61 = vpack.c.bf16 %v1290_v60, %v2656_v12 }
  0xa3   : > { %2093 = vmatpush3.bf16.msra.mxu0 %v2309_v62  ;;  %2153 = vmatpush3.bf16.msra.mxu1 %v2310_v63  ;;  %v2349_v62 = vld [vmem:[%s2904_s4] sm:$0xff]   ;;  %v2350_v63 = vld [vmem:[%s2904_s4 + $0x8] sm:$0xff]  }
  0xa4   : > { %2094 = vmatprep.subr.bf16.mxu0 %v2374_v7  ;;  %2154 = vmatprep.subr.bf16.mxu1 %v2374_v7 }
  0xa7   : > { %2095 = vmatpush3.bf16.msra.mxu0 %v2311_v1  ;;  %2155 = vmatpush3.bf16.msra.mxu1 %v2312_v3  ;;  %v2352_v1 = vld [vmem:[%s2904_s4 + $0x18] sm:$0xff]   ;;  %v2353_v3 = vld [vmem:[%s2904_s4 + $0x20] sm:$0xff]  }
  0xa8   : > { %2096 = vmatprep.subr.bf16.mxu0 %v2374_v7  ;;  %2156 = vmatprep.subr.bf16.mxu1 %v2374_v7 }
  0xab   : > { %2097 = vmatpush3.bf16.msra.mxu0 %v2313_v4  ;;  %2157 = vmatpush3.bf16.msra.mxu1 %v2314_v5  ;;  %v2354_v4 = vld [vmem:[%s2904_s4 + $0x28] sm:$0xff]  }
  0xac   : > { %2098 = vmatprep.subr.bf16.mxu0 %v2374_v7  ;;  %2158 = vmatprep.subr.bf16.mxu1 %v2374_v7 }
  0xaf   : > { %2099 = vmatpush3.bf16.msra.mxu0 %v2315_v9  ;;  %2159 = vmatpush3.bf16.msra.mxu1 %v2316_v10 }
  0xb0   : > { %2124 = vmatprep.subr.bf16.mxu0 %v2374_v7  ;;  %2184 = vmatprep.subr.bf16.mxu1 %v2374_v7 }
  0xb2   : > { %2101 = vmatmul.mubr.msk.bf16.vlgmr.msra.gmra.mrb[4].mxu0 %vm2669_vm14, %v577_v16  ;;  %2161 = vmatmul.mubr.msk.bf16.vlgmr.msra.gmra.mrb[8].mxu1 %vm2669_vm14, %v944_v19  ;;  %v2356_v19 = vld [vmem:[%s2904_s4 + $0x38] sm:$0xff]  }
  0xb3   : > { %2125 = vmatpush3.bf16.msra.mxu0 %v2317_v20  ;;  %2140 = vmatprep.mubr.msk.bf16.mxu0 %vm2375_vm4, %v2374_v7  ;;  %v2357_v20 = vld [vmem:[%s2906_s6] sm:$0xff]  }
  0xb4   : > { %2126 = vmatprep.subr.bf16.mxu0 %v2374_v7  ;;  %2185 = vmatpush3.bf16.msra.mxu1 %v2326_v21  ;;  %v2358_v21 = vld [vmem:[%s2906_s6 + $0x8] sm:$0xff]  }
  0xb5   : > { %2186 = vmatprep.subr.bf16.mxu1 %v2374_v7  ;;  %2200 = vmatprep.mubr.msk.bf16.mxu1 %vm2375_vm4, %v2374_v7 }
  0xb7   : > { %2127 = vmatpush3.bf16.msra.mxu0 %v2318_v23  ;;  %v2360_v23 = vld [vmem:[%s2906_s6 + $0x18] sm:$0xff]  }
  0xb8   : > { %2128 = vmatprep.subr.bf16.mxu0 %v2374_v7  ;;  %2187 = vmatpush3.bf16.msra.mxu1 %v2328_v24  ;;  %v2361_v24 = vld [vmem:[%s2906_s6 + $0x20] sm:$0xff]  }
  0xb9   : > { %2188 = vmatprep.subr.bf16.mxu1 %v2374_v7 }
  0xbb   : > { %2129 = vmatpush3.bf16.msra.mxu0 %v2319_v25  ;;  %v2362_v25 = vld [vmem:[%s2906_s6 + $0x28] sm:$0xff]  }
  0xbc   : > { %2130 = vmatprep.subr.bf16.mxu0 %v2374_v7  ;;  %2189 = vmatpush3.bf16.msra.mxu1 %v2330_v26 }
  0xbd   : > { %2190 = vmatprep.subr.bf16.mxu1 %v2374_v7 }
  0xbf   : > { %2131 = vmatpush3.bf16.msra.mxu0 %v2320_v27 }
  0xc0   : > { %2132 = vmatprep.subr.bf16.mxu0 %v2374_v7  ;;  %2191 = vmatpush3.bf16.msra.mxu1 %v2332_v29 }
  0xc1   : > { %2192 = vmatprep.subr.bf16.mxu1 %v2374_v7 }
  0xc3   : > { %2133 = vmatpush3.bf16.msra.mxu0 %v2321_v30 }
  0xc4   : > { %2134 = vmatprep.subr.bf16.mxu0 %v2374_v7  ;;  %2193 = vmatpush3.bf16.msra.mxu1 %v2334_v31 }
  0xc5   : > { %2194 = vmatprep.subr.bf16.mxu1 %v2374_v7 }
  0xc7   : > { %2135 = vmatpush3.bf16.msra.mxu0 %v2322_v32 }
  0xc8   : > { %2136 = vmatprep.subr.bf16.mxu0 %v2374_v7  ;;  %2195 = vmatpush3.bf16.msra.mxu1 %v2336_v33 }
  0xc9   : > { %2196 = vmatprep.subr.bf16.mxu1 %v2374_v7 }
  0xcb   : > { %2137 = vmatpush3.bf16.msra.mxu0 %v2323_v34 }
  0xcc   : > { %2138 = vmatprep.subr.bf16.mxu0 %v2374_v7  ;;  %2197 = vmatpush3.bf16.msra.mxu1 %v2338_v35 }
  0xcd   : > { %2198 = vmatprep.subr.bf16.mxu1 %v2374_v7 }
  0xcf   : > { %2139 = vmatpush3.bf16.msra.mxu0 %v2324_v36 }
  0xd0   : > { %2164 = vmatprep.subr.bf16.mxu0 %v2374_v7  ;;  %2199 = vmatpush3.bf16.msra.mxu1 %v2340_v39 }
  0xd1   : > { %2224 = vmatprep.subr.bf16.mxu1 %v2374_v7 }
  0xd2   : > { %2141 = vmatmul.mubr.bf16.vlgmr.msra.gmra.mrb[8].mxu0 %v829_v41 }
  0xd3   : > { %2165 = vmatpush3.bf16.msra.mxu0 %v2325_v42  ;;  %2180 = vmatprep.mubr.msk.bf16.mxu0 %vm2375_vm4, %v2374_v7 }
  0xd4   : > { %2166 = vmatprep.subr.bf16.mxu0 %v2374_v7  ;;  %2201 = vmatmul.mubr.bf16.vlgmr.msra.gmra.mrb[12].mxu1 %v1176_v43 }
  0xd5   : > { %2240 = vmatprep.mubr.msk.bf16.mxu1 %vm2375_vm4, %v2374_v7  ;;  %2225 = vmatpush3.bf16.msra.mxu1 %v2349_v62 }
  0xd6   : > { %2226 = vmatprep.subr.bf16.mxu1 %v2374_v7 }
  0xd7   : > { %2167 = vmatpush3.bf16.msra.mxu0 %v2327_v44 }
  0xd8   : > { %2168 = vmatprep.subr.bf16.mxu0 %v2374_v7 }
  0xd9   : > { %2227 = vmatpush3.bf16.msra.mxu1 %v2350_v63 }
  0xda   : > { %2228 = vmatprep.subr.bf16.mxu1 %v2374_v7 }
  0xdb   : > { %2169 = vmatpush3.bf16.msra.mxu0 %v2329_v28 }
  0xdc   : > { %2170 = vmatprep.subr.bf16.mxu0 %v2374_v7 }
  0xdd   : > { %2229 = vmatpush3.bf16.msra.mxu1 %v2351_v0 }
  0xde   : > { %2230 = vmatprep.subr.bf16.mxu1 %v2374_v7 }
  0xdf   : > { %2171 = vmatpush3.bf16.msra.mxu0 %v2331_v45 }
  0xe0   : > { %2172 = vmatprep.subr.bf16.mxu0 %v2374_v7 }
  0xe1   : > { %2231 = vmatpush3.bf16.msra.mxu1 %v2352_v1 }
  0xe2   : > { %2232 = vmatprep.subr.bf16.mxu1 %v2374_v7 }
  0xe3   : > { %2173 = vmatpush3.bf16.msra.mxu0 %v2333_v46 }
  0xe4   : > { %2174 = vmatprep.subr.bf16.mxu0 %v2374_v7 }
  0xe5   : > { %2233 = vmatpush3.bf16.msra.mxu1 %v2353_v3 }
  0xe6   : > { %2234 = vmatprep.subr.bf16.mxu1 %v2374_v7 }
  0xe7   : > { %2175 = vmatpush3.bf16.msra.mxu0 %v2335_v47 }
  0xe8   : > { %2176 = vmatprep.subr.bf16.mxu0 %v2374_v7 }
  0xe9   : > { %2235 = vmatpush3.bf16.msra.mxu1 %v2354_v4  ;;  %v2363_v4 = vld [vmem:[%s2906_s6 + $0x30] sm:$0xff]  }
  0xea   : > { %2236 = vmatprep.subr.bf16.mxu1 %v2374_v7 }
  0xeb   : > { %2177 = vmatpush3.bf16.msra.mxu0 %v2337_v48 }
  0xec   : > { %2178 = vmatprep.subr.bf16.mxu0 %v2374_v7 }
  0xed   : > { %2237 = vmatpush3.bf16.msra.mxu1 %v2355_v13  ;;  %v1532_v13 = vld [vmem:[%s2471_s22 + $0xd] sm:$0xff] }
  0xee   : > { %2238 = vmatprep.subr.bf16.mxu1 %v2374_v7 }
  0xef   : > { %2179 = vmatpush3.bf16.msra.mxu0 %v2339_v49 }
  0xf0   : > { %2204 = vmatprep.subr.bf16.mxu0 %v2374_v7 }
  0xf1   : > { %2239 = vmatpush3.bf16.msra.mxu1 %v2356_v19 }
  0xf2   : > { %2181 = vmatmul.mubr.msk.bf16.vlgmr.msra.gmra.mrb[12].mxu0 %vm2588_vm9, %v1060_v50 }
  0xf3   : > { %2205 = vmatpush3.bf16.msra.mxu0 %v2341_v51  ;;  %2220 = vmatprep.mubr.msk.bf16.mxu0 %vm2375_vm4, %v2374_v7 }
  0xf4   : > { %2206 = vmatprep.subr.bf16.mxu0 %v2374_v7 }
  0xf7   : > { %2207 = vmatpush3.bf16.msra.mxu0 %v2342_v52 }
  0xf8   : > { %2208 = vmatprep.subr.bf16.mxu0 %v2374_v7 }
  0xfb   : > { %2209 = vmatpush3.bf16.msra.mxu0 %v2343_v14  ;;  %v564_v18 = vpop.f32.mrb[0].mxu1 }
  0xfc   : > { %2210 = vmatprep.subr.bf16.mxu0 %v2374_v7  ;;  %v2082_v53 = vpop.f32.mrb[1].mxu1 }
  0xfd   : > { %v567_v54 = vpop.f32.mrb[2].mxu1 }
  0xfe   : > { %v2083_v55 = vpop.f32.mrb[3].mxu1 }
  0xff   : > { %2211 = vmatpush3.bf16.msra.mxu0 %v2344_v17 }
 0x100   : > { %2212 = vmatprep.subr.bf16.mxu0 %v2374_v7 }
 0x103   : > { %2213 = vmatpush3.bf16.msra.mxu0 %v2345_v56  ;;  %v1922_v56 = vld [vmem:[%s2903_s3] ss:$0 sm:$0xff] }
 0x104   : > { %2214 = vmatprep.subr.bf16.mxu0 %v2374_v7 }
 0x107   : > { %2215 = vmatpush3.bf16.msra.mxu0 %v2346_v57 }
 0x108   : > { %2216 = vmatprep.subr.bf16.mxu0 %v2374_v7 }
 0x10b   : > { %2217 = vmatpush3.bf16.msra.mxu0 %v2347_v58 }
 0x10c   : > { %2218 = vmatprep.subr.bf16.mxu0 %v2374_v7 }
 0x10f   : > { %2219 = vmatpush3.bf16.msra.mxu0 %v2348_v59 }
 0x110   : > { %2244 = vmatprep.subr.bf16.mxu0 %v2374_v7 }
 0x112   : > { %2221 = vmatmul.mubr.msk.bf16.vlgmr.msra.gmra.mrb[16].mxu0 %vm2669_vm14, %v1291_v61 }
 0x113   : > { %2260 = vmatprep.mubr.msk.bf16.mxu0 %vm2375_vm4, %v2374_v7  ;;  %2245 = vmatpush3.bf16.msra.mxu0 %v2357_v20  ;;  %v1932_v20 = vld [vmem:[%s2907_s7] ss:$0 sm:$0xff] }
 0x114   : > { %2246 = vmatprep.subr.bf16.mxu0 %v2374_v7 }
 0x117   : > { %2247 = vmatpush3.bf16.msra.mxu0 %v2358_v21 }
 0x118   : > { %2248 = vmatprep.subr.bf16.mxu0 %v2374_v7 }
 0x11b   : > { %2249 = vmatpush3.bf16.msra.mxu0 %v2359_v22 }
 0x11c   : > { %2250 = vmatprep.subr.bf16.mxu0 %v2374_v7 }
 0x11f   : > { %2251 = vmatpush3.bf16.msra.mxu0 %v2360_v23 }
 0x120   : > { %2252 = vmatprep.subr.bf16.mxu0 %v2374_v7 }
 0x123   : > { %2253 = vmatpush3.bf16.msra.mxu0 %v2361_v24 }
 0x124   : > { %2254 = vmatprep.subr.bf16.mxu0 %v2374_v7 }
 0x127   : > { %2255 = vmatpush3.bf16.msra.mxu0 %v2362_v25 }
 0x128   : > { %2256 = vmatprep.subr.bf16.mxu0 %v2374_v7 }
 0x12b   : > { %2257 = vmatpush3.bf16.msra.mxu0 %v2363_v4 }
 0x12c   : > { %2258 = vmatprep.subr.bf16.mxu0 %v2374_v7 }
 0x165   : > { %v449_v5 = vpop.f32.mrb[0].mxu0  ;;  %v816_v6 = vpop.f32.mrb[4].mxu1 }
 0x166   : > { %v571_v8 = vadd.f32 %v564_v18, %v449_v5  ;;  %v2062_v9 = vpop.f32.mrb[1].mxu0  ;;  %v2122_v10 = vpop.f32.mrb[5].mxu1  ;;  %v2364_v5 = vld [vmem:[%s2906_s6 + $0x38] sm:$0xff]  }
 0x167   : > { %v452_v11 = vpop.f32.mrb[2].mxu0  ;;  %v819_v12 = vpop.f32.mrb[6].mxu1  ;;  %2259 = vmatpush3.bf16.msra.mxu0 %v2364_v5 }
 0x168   : > { %v572_v15 = vadd.f32 %v567_v54, %v452_v11  ;;  %v2063_v2 = vpop.f32.mrb[3].mxu0  ;;  %v2123_v16 = vpop.f32.mrb[7].mxu1  ;;  %v1531_v11 = vld [vmem:[%s2471_s22 + $0x5] sm:$0xff] }
 0x185   : > { %v700_v26 = vpop.f32.mrb[4].mxu0  ;;  %v1047_v27 = vpop.f32.mrb[8].mxu1 }
 0x186   : > { %v707_v29 = vadd.f32 %v700_v26, %v571_v8  ;;  %v2102_v30 = vpop.f32.mrb[5].mxu0  ;;  %v2162_v31 = vpop.f32.mrb[9].mxu1 }
 0x187   : > { %v703_v32 = vpop.f32.mrb[6].mxu0  ;;  %v1050_v33 = vpop.f32.mrb[10].mxu1 }
 0x188   : > { %v708_v34 = vadd.f32 %v703_v32, %v572_v15  ;;  %v2103_v35 = vpop.f32.mrb[7].mxu0  ;;  %v2163_v36 = vpop.f32.mrb[11].mxu1  ;;  %v823_v37 = vadd.f32 %v816_v6, %v707_v29  ;;  %v1923_v6 = vld [vmem:[%s2905_s5] ss:$0 sm:$0xff] }
 0x18a   : > { %v824_v38 = vadd.f32 %v819_v12, %v708_v34 }
 0x1a5   : > { %v931_v39 = vpop.f32.mrb[8].mxu0 }
 0x1a6   : > { %v938_v40 = vadd.f32 %v931_v39, %v823_v37  ;;  %v2142_v41 = vpop.f32.mrb[9].mxu0 }
 0x1a7   : > { %v934_v42 = vpop.f32.mrb[10].mxu0  ;;  %v1278_v43 = vpop.f32.mrb[12].mxu1 }
 0x1a8   : > { %v939_v44 = vadd.f32 %v934_v42, %v824_v38  ;;  %v2143_v28 = vpop.f32.mrb[11].mxu0  ;;  %v1054_v45 = vadd.f32 %v1047_v27, %v938_v40  ;;  %v2202_v46 = vpop.f32.mrb[13].mxu1 }
 0x1a9   : > { %v1281_v47 = vpop.f32.mrb[14].mxu1 }
 0x1aa   : > { %v1055_v48 = vadd.f32 %v1050_v33, %v939_v44  ;;  %v2203_v49 = vpop.f32.mrb[15].mxu1 }
 0x1c5   : > { %v1163_v50 = vpop.f32.mrb[12].mxu0 }
 0x1c6   : > { %v1170_v51 = vadd.f32 %v1163_v50, %v1054_v45  ;;  %v2182_v52 = vpop.f32.mrb[13].mxu0 }
 0x1c7   : > { %v1166_v14 = vpop.f32.mrb[14].mxu0 }
 0x1c8   : > { %v1171_v17 = vadd.f32 %v1166_v14, %v1055_v48  ;;  %v1285_v18 = vadd.f32 %v1278_v43, %v1170_v51  ;;  %v2183_v53 = vpop.f32.mrb[15].mxu0 }
 0x1ca   : > { %v1286_v54 = vadd.f32 %v1281_v47, %v1171_v17 }
 0x1e5   : > { %v1394_v55 = vpop.f32.mrb[16].mxu0 }
 0x1e6   : > { %v1401_v57 = vadd.f32 %v1394_v55, %v1285_v18  ;;  %v2222_v58 = vpop.f32.mrb[17].mxu0 }
 0x1e7   : > { %v1397_v59 = vpop.f32.mrb[18].mxu0 }
 0x1e8   : > { %v1414_v60 = vadd.f32 %v1922_v56, %v1401_v57  ;;  %v1402_v61 = vadd.f32 %v1397_v59, %v1286_v54  ;;  %v2223_v62 = vpop.f32.mrb[19].mxu0 }
 0x1ea   : > { %v1415_v63 = vadd.f32 %v1922_v56, %v1402_v61  ;;  %v1416_v0 = vmax.f32 %v1414_v60, 0.0 }
 0x1ec   : > { %v1417_v1 = vmax.f32 %v1415_v63, 0.0 }
 0x1ee   : > { %v1418_v3 = vpack.c.bf16 %v1417_v1, %v1416_v0 }
 0x1f0   : > { %2241 = vmatmul.mubr.bf16.vlgmr.msra.gmra.mrb[16].mxu1 %v1418_v3 }
 0x2c3   : > { %v1524_v8 = vpop.f32.mrb[16].mxu1 }
 0x2c4   : > { %v1525_v9 = vadd.f32 %v1923_v6, %v1524_v8  ;;  %v2242_v10 = vpop.f32.mrb[17].mxu1 }
 0x2c5   : > { %v1527_v12 = vpop.f32.mrb[18].mxu1 }
 0x2c6   : > { %v1528_v15 = vadd.f32 %v1923_v6, %v1527_v12  ;;  %v2243_v2 = vpop.f32.mrb[19].mxu1  ;;  %v1533_v16 = vadd.f32 %v1531_v11, %v1525_v9 }
 0x2c8   : > { %v1534_v7 = vadd.f32 %v1532_v13, %v1528_v15 }
 0x2ca   : > { %v1535_v19 = vpack.c.bf16 %v1534_v7, %v1533_v16 }
 0x2cc   : > { %2261 = vmatmul.mubr.bf16.vlgmr.msra.gmra.mrb[20].mxu0 %v1535_v19 }
 0x39f   : > { %v1641_v21 = vpop.f32.mrb[20].mxu0 }
 0x3a0   : > { %v1642_v22 = vadd.f32 %v1932_v20, %v1641_v21  ;;  %v2262_v23 = vpop.f32.mrb[21].mxu0 }
 0x3a1   : > { %v1644_v24 = vpop.f32.mrb[22].mxu0 }
 0x3a2   : > { %1648 = vst [vmem:[%s305_s9] sm:$0xff] %v1642_v22  ;;  %v1645_v25 = vadd.f32 %v1932_v20, %v1644_v24  ;;  %v2263_v26 = vpop.f32.mrb[23].mxu0 }
 0x3a4   : > { %1649 = vst [vmem:[%s305_s9 + $0x8] sm:$0xff] %v1645_v25 }
 0x3a5 PF: > { %s18_s27 = sadd.s32 1, %s2371_s27  }
 0x3a6   : > { %p15_p4 = scmp.ge.s32.totalorder %s18_s27, 4  }
 0x3a8   :  { %17 = sbr.rel (!%p15_p4) target bundleno = 1 (0x1), region = 90 }

</bundles_post_ra>
